<compile_context>
chip_gen: v7x
topology: tpu7x:2x2x1
jax: 0.10.0
libtpu: 0.0.40
codegen_flags: <defaults>
</compile_context>

<pallas_src>
import jax
import jax.numpy as jnp
from jax.experimental import pallas as pl
from jax.experimental.pallas import tpu as pltpu


# ------------------------------ Pallas kernel -------------------------------

def _disc_kernel(cols1_ref, w1_ref, b1_ref, w2_ref, g2_ref, be2_ref,
                 w3_ref, b3_ref, o_ref, xpad_ref):
    f32, bf16 = jnp.float32, jnp.bfloat16
    n = o_ref.shape[0]
    fm = w1_ref.shape[1]           # 64
    c2 = w2_ref.shape[1]           # 128

    # ---- conv1 (4x4 / s2 / p1, cin=2) + LeakyReLU(0.2) ---------------------
    y1 = jnp.dot(cols1_ref[...], w1_ref[...],
                 preferred_element_type=f32) + b1_ref[...]        # (n*256, fm) f32
    x1 = jnp.where(y1 > 0, y1, 0.2 * y1)
    # Rows are parity-major: (batch, (oh%2)*2 + ow%2, oh//2, ow//2).
    x1 = x1.reshape(n, 4, 8, 8, fm)

    # ---- stage parity grids into a zero-padded VMEM scratch (conv2 halo) ---
    xpad_ref[...] = jnp.zeros_like(xpad_ref)
    for pc in range(4):
        xpad_ref[pc, :, 1:9, 1:9, :] = x1[:, pc]

    # ---- conv2 (4x4 / s2 / p1) as 16 accumulated per-tap matmuls -----------
    # Tap t = (ph*2+pw)*4 + a*2 + b corresponds to (ki, kj) with
    # ki = [0, 2][a] if ph == 1 else [1, 3][a] (same rule for kj / pw / b).
    # w2's K rows are laid out in exactly this (parity-group-major) order,
    # so each tap's weight slab is one contiguous 64-row slice.
    acc = jnp.zeros((n * 64, c2), f32)
    t = 0
    for ph in range(2):
        for pw in range(2):
            pc = ph * 2 + pw
            for a in range(2):
                for b in range(2):
                    h0 = (1 - ph) + a
                    w0 = (1 - pw) + b
                    patch = xpad_ref[pc, :, h0:h0 + 8, w0:w0 + 8, :]   # (n,8,8,fm)
                    acc = acc + jnp.dot(
                        patch.reshape(n * 64, fm).astype(bf16),
                        w2_ref[t * fm:(t + 1) * fm, :],
                        preferred_element_type=f32)
                    t += 1

    # ---- BatchNorm2d (batch statistics) + LeakyReLU(0.2) -------------------
    # conv2 bias omitted on purpose: exactly cancelled by the mean subtraction.
    mu = jnp.mean(acc, axis=0, keepdims=True)
    var = jnp.mean(jnp.square(acc - mu), axis=0, keepdims=True)
    y2 = (acc - mu) * jax.lax.rsqrt(var + 1e-5) * g2_ref[...] + be2_ref[...]
    x2 = jnp.where(y2 > 0, y2, 0.2 * y2).reshape(n, 8, 8, c2)

    # ---- conv3 (4x4 / s1 / p0, cout=1) + exact sigmoid ----------------------
    # cout == 1: per-tap VPU multiply + lane reduction (no N=1 MXU matmul,
    # no concatenated (n,5,5,16*c2) intermediate).
    y3 = jnp.zeros((n, 5, 5), f32)
    for ki in range(4):
        for kj in range(4):
            w_t = w3_ref[ki * 4 + kj].reshape(1, 1, 1, c2)
            y3 = y3 + jnp.sum(x2[:, ki:ki + 5, kj:kj + 5, :] * w_t, axis=-1)
    y3 = y3 + b3_ref[...]
    o_ref[...] = 1.0 / (1.0 + jnp.exp(-y3))


# ------------------------------- JAX wrapper ---------------------------------

def init_params(key, text_dim=64, feature_maps=64):
    ks = jax.random.split(key, 7)

    def u(k, shape, fan_in):
        bound = 1.0 / float(fan_in) ** 0.5
        return jax.random.uniform(k, shape, jnp.float32, -bound, bound)

    fm = feature_maps
    return {
        # text_proj: Linear(text_dim -> 32*32)
        "w_lin": u(ks[0], (text_dim, 32 * 32), text_dim),
        "b_lin": u(ks[1], (32 * 32,), text_dim),
        # Conv2d(2, fm, 4, 2, 1), im2col layout: K rows = [img taps 0..15,
        # proj taps 0..15], taps in ki*4+kj order.
        "w1": u(ks[2], (32, fm), 4 * 4 * 2),
        "b1": u(ks[3], (fm,), 4 * 4 * 2),
        # Conv2d(fm, 2fm, 4, 2, 1), im2col layout: K rows grouped per tap in
        # the kernel's parity-group-major tap order, cin minor.  Bias omitted:
        # cancelled by batch-stats BatchNorm.
        "w2": u(ks[4], (16 * fm, 2 * fm), 4 * 4 * fm),
        "gamma2": jnp.ones((2 * fm,), jnp.float32),
        "beta2": jnp.zeros((2 * fm,), jnp.float32),
        # Conv2d(2fm, 1, 4, 1, 0): row = tap (ki*4+kj), col = cin.
        "w3": u(ks[5], (16, 2 * fm), 4 * 4 * 2 * fm),
        "b3": u(ks[6], (1,), 4 * 4 * 2 * fm),
    }


def discriminator_forward(params, img_nchw, text_embed):
    # Assumes module defaults: 1x32x32 images, text_dim=64, feature_maps=64.
    n = img_nchw.shape[0]
    f32, bf16 = jnp.float32, jnp.bfloat16
    fm = params["w1"].shape[1]

    # --- XLA-side prep (tiny, fused): text projection + conv1 im2col built
    # from STATIC strided slices of a zero-padded plane (no gathers). --------
    proj = jnp.dot(text_embed.astype(f32), params["w_lin"]) + params["b_lin"]
    planes = jnp.stack([img_nchw.reshape(n, 32, 32).astype(f32),
                        proj.reshape(n, 32, 32)], axis=1)         # (n, 2, 32, 32)
    planes = jnp.pad(planes, ((0, 0), (0, 0), (1, 1), (1, 1)))    # (n, 2, 34, 34)
    taps = [planes[:, :, ki:ki + 32:2, kj:kj + 32:2]               # (n, 2, 16, 16)
            for ki in range(4) for kj in range(4)]
    cols = jnp.stack(taps, axis=2)                                 # (n, cin, tap, oh, ow)
    cols = cols.reshape(n, 2, 16, 8, 2, 8, 2)                      # oh->(ah,bh), ow->(aw,bw)
    cols = cols.transpose(0, 4, 6, 3, 5, 1, 2)                     # (n, bh, bw, ah, aw, cin, tap)
    cols1 = cols.reshape(n * 256, 32).astype(bf16)                 # parity-major rows

    out = pl.pallas_call(
        _disc_kernel,
        out_shape=jax.ShapeDtypeStruct((n, 5, 5), f32),
        in_specs=[pl.BlockSpec(memory_space=pltpu.MemorySpace.VMEM)] * 8,
        out_specs=pl.BlockSpec(memory_space=pltpu.MemorySpace.VMEM),
        scratch_shapes=[pltpu.VMEM((4, n, 10, 10, fm), jnp.float32)],
    )(cols1,
      params["w1"].astype(bf16), params["b1"].reshape(1, -1),
      params["w2"].astype(bf16),
      params["gamma2"].reshape(1, -1), params["beta2"].reshape(1, -1),
      params["w3"], params["b3"].reshape(1, 1))

    return out.reshape(n, 1, 5, 5)                                 # NCHW: (n, 1, 5, 5)


if __name__ == "__main__":
    key = jax.random.PRNGKey(0)
    k_img, k_txt, k_p = jax.random.split(key, 3)

    # Module implies 32x32 single-channel images and text_dim=64; batch=2.
    img = jax.random.normal(k_img, (2, 1, 32, 32), jnp.float32)
    text_embed = jax.random.normal(k_txt, (2, 64), jnp.float32)
    params = init_params(k_p)

    out = jax.jit(discriminator_forward)(params, img, text_embed)
    out = jax.block_until_ready(out)
    assert out.shape == (2, 1, 5, 5), out.shape
    assert bool(jnp.all(jnp.isfinite(out)))
    assert bool(jnp.all((out >= 0.0) & (out <= 1.0)))
    print("KERNEL_OK")
</pallas_src>

<mosaic_0001>
module attributes {stable_mosaic.version = 11 : i64} {
  func.func @_disc_kernel(%arg0: memref<512x32xbf16, #tpu.memory_space<vmem>>, %arg1: memref<32x64xbf16, #tpu.memory_space<vmem>>, %arg2: memref<1x64xf32, #tpu.memory_space<vmem>>, %arg3: memref<1024x128xbf16, #tpu.memory_space<vmem>>, %arg4: memref<1x128xf32, #tpu.memory_space<vmem>>, %arg5: memref<1x128xf32, #tpu.memory_space<vmem>>, %arg6: memref<16x128xf32, #tpu.memory_space<vmem>>, %arg7: memref<1x1xf32, #tpu.memory_space<vmem>>, %arg8: memref<2x5x5xf32, #tpu.memory_space<vmem>>, %arg9: memref<4x2x10x10x64xf32, #tpu.memory_space<vmem>>) attributes {dimension_semantics = [], scalar_prefetch = 0 : i64, scratch_operands = 1 : i64, tpu.core_type = #tpu.core_type<tc>} {
    %c0 = arith.constant 0 : index
    %c0_0 = arith.constant 0 : index
    %0 = vector.load %arg0[%c0, %c0_0] : memref<512x32xbf16, #tpu.memory_space<vmem>>, vector<512x32xbf16>
    %c0_1 = arith.constant 0 : index
    %c0_2 = arith.constant 0 : index
    %1 = vector.load %arg1[%c0_1, %c0_2] : memref<32x64xbf16, #tpu.memory_space<vmem>>, vector<32x64xbf16>
    %cst = arith.constant dense<0.000000e+00> : vector<512x64xf32>
    %2 = tpu.matmul %0, %1, %cst {dimension_numbers = #tpu.dot_dimension_numbers<[1], [0], [0], [1], [0, 0, 1, 1], [], []>} : vector<512x32xbf16>, vector<32x64xbf16>, vector<512x64xf32> -> vector<512x64xf32>
    %c0_3 = arith.constant 0 : index
    %c0_4 = arith.constant 0 : index
    %3 = vector.load %arg2[%c0_3, %c0_4] : memref<1x64xf32, #tpu.memory_space<vmem>>, vector<1x64xf32>
    %4 = vector.broadcast %3 : vector<1x64xf32> to vector<512x64xf32>
    %5 = arith.addf %2, %4 : vector<512x64xf32>
    %cst_5 = arith.constant 0.000000e+00 : f32
    %6 = vector.broadcast %cst_5 : f32 to vector<512x64xf32>
    %7 = arith.cmpf ogt, %5, %6 : vector<512x64xf32>
    %cst_6 = arith.constant 2.000000e-01 : f32
    %8 = vector.broadcast %cst_6 : f32 to vector<512x64xf32>
    %9 = arith.mulf %8, %5 : vector<512x64xf32>
    %10 = arith.select %7, %5, %9 : vector<512x64xi1>, vector<512x64xf32>
    %11 = vector.shape_cast %10 : vector<512x64xf32> to vector<2x4x8x8x64xf32>
    %cst_7 = arith.constant 0.000000e+00 : f32
    %12 = vector.broadcast %cst_7 : f32 to vector<4x2x10x10x64xf32>
    %c0_8 = arith.constant 0 : index
    %c0_9 = arith.constant 0 : index
    %c0_10 = arith.constant 0 : index
    %c0_11 = arith.constant 0 : index
    %c0_12 = arith.constant 0 : index
    %13 = vector.load %arg9[%c0_8, %c0_9, %c0_10, %c0_11, %c0_12] : memref<4x2x10x10x64xf32, #tpu.memory_space<vmem>>, vector<4x2x10x10x64xf32>
    tpu.vector_store %arg9[%c0_8, %c0_9, %c0_10, %c0_11, %c0_12], %12 {strides = array<i32>} : memref<4x2x10x10x64xf32, #tpu.memory_space<vmem>>, vector<4x2x10x10x64xf32>,
    %14 = vector.extract_strided_slice %11 {offsets = [0, 0, 0, 0, 0], sizes = [2, 1, 8, 8, 64], strides = [1, 1, 1, 1, 1]} : vector<2x4x8x8x64xf32> to vector<2x1x8x8x64xf32>
    %15 = vector.shape_cast %14 : vector<2x1x8x8x64xf32> to vector<2x8x8x64xf32>
    %c0_13 = arith.constant 0 : index
    %c0_14 = arith.constant 0 : index
    %c1 = arith.constant 1 : index
    %c1_15 = arith.constant 1 : index
    %c0_16 = arith.constant 0 : index
    %16 = vector.load %arg9[%c0_13, %c0_14, %c1, %c1_15, %c0_16] : memref<4x2x10x10x64xf32, #tpu.memory_space<vmem>>, vector<1x2x8x8x64xf32>
    %17 = vector.shape_cast %16 : vector<1x2x8x8x64xf32> to vector<2x8x8x64xf32>
    %18 = vector.shape_cast %15 : vector<2x8x8x64xf32> to vector<1x2x8x8x64xf32>
    tpu.vector_store %arg9[%c0_13, %c0_14, %c1, %c1_15, %c0_16], %18 {strides = array<i32>} : memref<4x2x10x10x64xf32, #tpu.memory_space<vmem>>, vector<1x2x8x8x64xf32>,
    %19 = vector.extract_strided_slice %11 {offsets = [0, 1, 0, 0, 0], sizes = [2, 1, 8, 8, 64], strides = [1, 1, 1, 1, 1]} : vector<2x4x8x8x64xf32> to vector<2x1x8x8x64xf32>
    %20 = vector.shape_cast %19 : vector<2x1x8x8x64xf32> to vector<2x8x8x64xf32>
    %c1_17 = arith.constant 1 : index
    %c0_18 = arith.constant 0 : index
    %c1_19 = arith.constant 1 : index
    %c1_20 = arith.constant 1 : index
    %c0_21 = arith.constant 0 : index
    %21 = vector.load %arg9[%c1_17, %c0_18, %c1_19, %c1_20, %c0_21] : memref<4x2x10x10x64xf32, #tpu.memory_space<vmem>>, vector<1x2x8x8x64xf32>
    %22 = vector.shape_cast %21 : vector<1x2x8x8x64xf32> to vector<2x8x8x64xf32>
    %23 = vector.shape_cast %20 : vector<2x8x8x64xf32> to vector<1x2x8x8x64xf32>
    tpu.vector_store %arg9[%c1_17, %c0_18, %c1_19, %c1_20, %c0_21], %23 {strides = array<i32>} : memref<4x2x10x10x64xf32, #tpu.memory_space<vmem>>, vector<1x2x8x8x64xf32>,
    %24 = vector.extract_strided_slice %11 {offsets = [0, 2, 0, 0, 0], sizes = [2, 1, 8, 8, 64], strides = [1, 1, 1, 1, 1]} : vector<2x4x8x8x64xf32> to vector<2x1x8x8x64xf32>
    %25 = vector.shape_cast %24 : vector<2x1x8x8x64xf32> to vector<2x8x8x64xf32>
    %c2 = arith.constant 2 : index
    %c0_22 = arith.constant 0 : index
    %c1_23 = arith.constant 1 : index
    %c1_24 = arith.constant 1 : index
    %c0_25 = arith.constant 0 : index
    %26 = vector.load %arg9[%c2, %c0_22, %c1_23, %c1_24, %c0_25] : memref<4x2x10x10x64xf32, #tpu.memory_space<vmem>>, vector<1x2x8x8x64xf32>
    %27 = vector.shape_cast %26 : vector<1x2x8x8x64xf32> to vector<2x8x8x64xf32>
    %28 = vector.shape_cast %25 : vector<2x8x8x64xf32> to vector<1x2x8x8x64xf32>
    tpu.vector_store %arg9[%c2, %c0_22, %c1_23, %c1_24, %c0_25], %28 {strides = array<i32>} : memref<4x2x10x10x64xf32, #tpu.memory_space<vmem>>, vector<1x2x8x8x64xf32>,
    %29 = vector.extract_strided_slice %11 {offsets = [0, 3, 0, 0, 0], sizes = [2, 1, 8, 8, 64], strides = [1, 1, 1, 1, 1]} : vector<2x4x8x8x64xf32> to vector<2x1x8x8x64xf32>
    %30 = vector.shape_cast %29 : vector<2x1x8x8x64xf32> to vector<2x8x8x64xf32>
    %c3 = arith.constant 3 : index
    %c0_26 = arith.constant 0 : index
    %c1_27 = arith.constant 1 : index
    %c1_28 = arith.constant 1 : index
    %c0_29 = arith.constant 0 : index
    %31 = vector.load %arg9[%c3, %c0_26, %c1_27, %c1_28, %c0_29] : memref<4x2x10x10x64xf32, #tpu.memory_space<vmem>>, vector<1x2x8x8x64xf32>
    %32 = vector.shape_cast %31 : vector<1x2x8x8x64xf32> to vector<2x8x8x64xf32>
    %33 = vector.shape_cast %30 : vector<2x8x8x64xf32> to vector<1x2x8x8x64xf32>
    tpu.vector_store %arg9[%c3, %c0_26, %c1_27, %c1_28, %c0_29], %33 {strides = array<i32>} : memref<4x2x10x10x64xf32, #tpu.memory_space<vmem>>, vector<1x2x8x8x64xf32>,
    %cst_30 = arith.constant 0.000000e+00 : f32
    %34 = vector.broadcast %cst_30 : f32 to vector<128x128xf32>
    %c0_31 = arith.constant 0 : index
    %c0_32 = arith.constant 0 : index
    %c1_33 = arith.constant 1 : index
    %c1_34 = arith.constant 1 : index
    %c0_35 = arith.constant 0 : index
    %35 = vector.load %arg9[%c0_31, %c0_32, %c1_33, %c1_34, %c0_35] : memref<4x2x10x10x64xf32, #tpu.memory_space<vmem>>, vector<1x2x8x8x64xf32>
    %36 = vector.shape_cast %35 : vector<1x2x8x8x64xf32> to vector<2x8x8x64xf32>
    %37 = vector.shape_cast %36 : vector<2x8x8x64xf32> to vector<128x64xf32>
    %38 = arith.truncf %37 : vector<128x64xf32> to vector<128x64xbf16>
    %c0_36 = arith.constant 0 : index
    %c0_37 = arith.constant 0 : index
    %39 = vector.load %arg3[%c0_36, %c0_37] : memref<1024x128xbf16, #tpu.memory_space<vmem>>, vector<64x128xbf16>
    %cst_38 = arith.constant dense<0.000000e+00> : vector<128x128xf32>
    %40 = tpu.matmul %38, %39, %cst_38 {dimension_numbers = #tpu.dot_dimension_numbers<[1], [0], [0], [1], [0, 0, 1, 1], [], []>} : vector<128x64xbf16>, vector<64x128xbf16>, vector<128x128xf32> -> vector<128x128xf32>
    %41 = arith.addf %34, %40 : vector<128x128xf32>
    %c0_39 = arith.constant 0 : index
    %c0_40 = arith.constant 0 : index
    %c1_41 = arith.constant 1 : index
    %c2_42 = arith.constant 2 : index
    %c0_43 = arith.constant 0 : index
    %42 = vector.load %arg9[%c0_39, %c0_40, %c1_41, %c2_42, %c0_43] : memref<4x2x10x10x64xf32, #tpu.memory_space<vmem>>, vector<1x2x8x8x64xf32>
    %43 = vector.shape_cast %42 : vector<1x2x8x8x64xf32> to vector<2x8x8x64xf32>
    %44 = vector.shape_cast %43 : vector<2x8x8x64xf32> to vector<128x64xf32>
    %45 = arith.truncf %44 : vector<128x64xf32> to vector<128x64xbf16>
    %c64 = arith.constant 64 : index
    %c0_44 = arith.constant 0 : index
    %46 = vector.load %arg3[%c64, %c0_44] : memref<1024x128xbf16, #tpu.memory_space<vmem>>, vector<64x128xbf16>
    %cst_45 = arith.constant dense<0.000000e+00> : vector<128x128xf32>
    %47 = tpu.matmul %45, %46, %cst_45 {dimension_numbers = #tpu.dot_dimension_numbers<[1], [0], [0], [1], [0, 0, 1, 1], [], []>} : vector<128x64xbf16>, vector<64x128xbf16>, vector<128x128xf32> -> vector<128x128xf32>
    %48 = arith.addf %41, %47 : vector<128x128xf32>
    %c0_46 = arith.constant 0 : index
    %c0_47 = arith.constant 0 : index
    %c2_48 = arith.constant 2 : index
    %c1_49 = arith.constant 1 : index
    %c0_50 = arith.constant 0 : index
    %49 = vector.load %arg9[%c0_46, %c0_47, %c2_48, %c1_49, %c0_50] : memref<4x2x10x10x64xf32, #tpu.memory_space<vmem>>, vector<1x2x8x8x64xf32>
    %50 = vector.shape_cast %49 : vector<1x2x8x8x64xf32> to vector<2x8x8x64xf32>
    %51 = vector.shape_cast %50 : vector<2x8x8x64xf32> to vector<128x64xf32>
    %52 = arith.truncf %51 : vector<128x64xf32> to vector<128x64xbf16>
    %c128 = arith.constant 128 : index
    %c0_51 = arith.constant 0 : index
    %53 = vector.load %arg3[%c128, %c0_51] : memref<1024x128xbf16, #tpu.memory_space<vmem>>, vector<64x128xbf16>
    %cst_52 = arith.constant dense<0.000000e+00> : vector<128x128xf32>
    %54 = tpu.matmul %52, %53, %cst_52 {dimension_numbers = #tpu.dot_dimension_numbers<[1], [0], [0], [1], [0, 0, 1, 1], [], []>} : vector<128x64xbf16>, vector<64x128xbf16>, vector<128x128xf32> -> vector<128x128xf32>
    %55 = arith.addf %48, %54 : vector<128x128xf32>
    %c0_53 = arith.constant 0 : index
    %c0_54 = arith.constant 0 : index
    %c2_55 = arith.constant 2 : index
    %c2_56 = arith.constant 2 : index
    %c0_57 = arith.constant 0 : index
    %56 = vector.load %arg9[%c0_53, %c0_54, %c2_55, %c2_56, %c0_57] : memref<4x2x10x10x64xf32, #tpu.memory_space<vmem>>, vector<1x2x8x8x64xf32>
    %57 = vector.shape_cast %56 : vector<1x2x8x8x64xf32> to vector<2x8x8x64xf32>
    %58 = vector.shape_cast %57 : vector<2x8x8x64xf32> to vector<128x64xf32>
    %59 = arith.truncf %58 : vector<128x64xf32> to vector<128x64xbf16>
    %c192 = arith.constant 192 : index
    %c0_58 = arith.constant 0 : index
    %60 = vector.load %arg3[%c192, %c0_58] : memref<1024x128xbf16, #tpu.memory_space<vmem>>, vector<64x128xbf16>
    %cst_59 = arith.constant dense<0.000000e+00> : vector<128x128xf32>
    %61 = tpu.matmul %59, %60, %cst_59 {dimension_numbers = #tpu.dot_dimension_numbers<[1], [0], [0], [1], [0, 0, 1, 1], [], []>} : vector<128x64xbf16>, vector<64x128xbf16>, vector<128x128xf32> -> vector<128x128xf32>
    %62 = arith.addf %55, %61 : vector<128x128xf32>
    %c1_60 = arith.constant 1 : index
    %c0_61 = arith.constant 0 : index
    %c1_62 = arith.constant 1 : index
    %c0_63 = arith.constant 0 : index
    %c0_64 = arith.constant 0 : index
    %63 = vector.load %arg9[%c1_60, %c0_61, %c1_62, %c0_63, %c0_64] : memref<4x2x10x10x64xf32, #tpu.memory_space<vmem>>, vector<1x2x8x8x64xf32>
    %64 = vector.shape_cast %63 : vector<1x2x8x8x64xf32> to vector<2x8x8x64xf32>
    %65 = vector.shape_cast %64 : vector<2x8x8x64xf32> to vector<128x64xf32>
    %66 = arith.truncf %65 : vector<128x64xf32> to vector<128x64xbf16>
    %c256 = arith.constant 256 : index
    %c0_65 = arith.constant 0 : index
    %67 = vector.load %arg3[%c256, %c0_65] : memref<1024x128xbf16, #tpu.memory_space<vmem>>, vector<64x128xbf16>
    %cst_66 = arith.constant dense<0.000000e+00> : vector<128x128xf32>
    %68 = tpu.matmul %66, %67, %cst_66 {dimension_numbers = #tpu.dot_dimension_numbers<[1], [0], [0], [1], [0, 0, 1, 1], [], []>} : vector<128x64xbf16>, vector<64x128xbf16>, vector<128x128xf32> -> vector<128x128xf32>
    %69 = arith.addf %62, %68 : vector<128x128xf32>
    %c1_67 = arith.constant 1 : index
    %c0_68 = arith.constant 0 : index
    %c1_69 = arith.constant 1 : index
    %c1_70 = arith.constant 1 : index
    %c0_71 = arith.constant 0 : index
    %70 = vector.load %arg9[%c1_67, %c0_68, %c1_69, %c1_70, %c0_71] : memref<4x2x10x10x64xf32, #tpu.memory_space<vmem>>, vector<1x2x8x8x64xf32>
    %71 = vector.shape_cast %70 : vector<1x2x8x8x64xf32> to vector<2x8x8x64xf32>
    %72 = vector.shape_cast %71 : vector<2x8x8x64xf32> to vector<128x64xf32>
    %73 = arith.truncf %72 : vector<128x64xf32> to vector<128x64xbf16>
    %c320 = arith.constant 320 : index
    %c0_72 = arith.constant 0 : index
    %74 = vector.load %arg3[%c320, %c0_72] : memref<1024x128xbf16, #tpu.memory_space<vmem>>, vector<64x128xbf16>
    %cst_73 = arith.constant dense<0.000000e+00> : vector<128x128xf32>
    %75 = tpu.matmul %73, %74, %cst_73 {dimension_numbers = #tpu.dot_dimension_numbers<[1], [0], [0], [1], [0, 0, 1, 1], [], []>} : vector<128x64xbf16>, vector<64x128xbf16>, vector<128x128xf32> -> vector<128x128xf32>
    %76 = arith.addf %69, %75 : vector<128x128xf32>
    %c1_74 = arith.constant 1 : index
    %c0_75 = arith.constant 0 : index
    %c2_76 = arith.constant 2 : index
    %c0_77 = arith.constant 0 : index
    %c0_78 = arith.constant 0 : index
    %77 = vector.load %arg9[%c1_74, %c0_75, %c2_76, %c0_77, %c0_78] : memref<4x2x10x10x64xf32, #tpu.memory_space<vmem>>, vector<1x2x8x8x64xf32>
    %78 = vector.shape_cast %77 : vector<1x2x8x8x64xf32> to vector<2x8x8x64xf32>
    %79 = vector.shape_cast %78 : vector<2x8x8x64xf32> to vector<128x64xf32>
    %80 = arith.truncf %79 : vector<128x64xf32> to vector<128x64xbf16>
    %c384 = arith.constant 384 : index
    %c0_79 = arith.constant 0 : index
    %81 = vector.load %arg3[%c384, %c0_79] : memref<1024x128xbf16, #tpu.memory_space<vmem>>, vector<64x128xbf16>
    %cst_80 = arith.constant dense<0.000000e+00> : vector<128x128xf32>
    %82 = tpu.matmul %80, %81, %cst_80 {dimension_numbers = #tpu.dot_dimension_numbers<[1], [0], [0], [1], [0, 0, 1, 1], [], []>} : vector<128x64xbf16>, vector<64x128xbf16>, vector<128x128xf32> -> vector<128x128xf32>
    %83 = arith.addf %76, %82 : vector<128x128xf32>
    %c1_81 = arith.constant 1 : index
    %c0_82 = arith.constant 0 : index
    %c2_83 = arith.constant 2 : index
    %c1_84 = arith.constant 1 : index
    %c0_85 = arith.constant 0 : index
    %84 = vector.load %arg9[%c1_81, %c0_82, %c2_83, %c1_84, %c0_85] : memref<4x2x10x10x64xf32, #tpu.memory_space<vmem>>, vector<1x2x8x8x64xf32>
    %85 = vector.shape_cast %84 : vector<1x2x8x8x64xf32> to vector<2x8x8x64xf32>
    %86 = vector.shape_cast %85 : vector<2x8x8x64xf32> to vector<128x64xf32>
    %87 = arith.truncf %86 : vector<128x64xf32> to vector<128x64xbf16>
    %c448 = arith.constant 448 : index
    %c0_86 = arith.constant 0 : index
    %88 = vector.load %arg3[%c448, %c0_86] : memref<1024x128xbf16, #tpu.memory_space<vmem>>, vector<64x128xbf16>
    %cst_87 = arith.constant dense<0.000000e+00> : vector<128x128xf32>
    %89 = tpu.matmul %87, %88, %cst_87 {dimension_numbers = #tpu.dot_dimension_numbers<[1], [0], [0], [1], [0, 0, 1, 1], [], []>} : vector<128x64xbf16>, vector<64x128xbf16>, vector<128x128xf32> -> vector<128x128xf32>
    %90 = arith.addf %83, %89 : vector<128x128xf32>
    %c2_88 = arith.constant 2 : index
    %c0_89 = arith.constant 0 : index
    %c0_90 = arith.constant 0 : index
    %c1_91 = arith.constant 1 : index
    %c0_92 = arith.constant 0 : index
    %91 = vector.load %arg9[%c2_88, %c0_89, %c0_90, %c1_91, %c0_92] : memref<4x2x10x10x64xf32, #tpu.memory_space<vmem>>, vector<1x2x8x8x64xf32>
    %92 = vector.shape_cast %91 : vector<1x2x8x8x64xf32> to vector<2x8x8x64xf32>
    %93 = vector.shape_cast %92 : vector<2x8x8x64xf32> to vector<128x64xf32>
    %94 = arith.truncf %93 : vector<128x64xf32> to vector<128x64xbf16>
    %c512 = arith.constant 512 : index
    %c0_93 = arith.constant 0 : index
    %95 = vector.load %arg3[%c512, %c0_93] : memref<1024x128xbf16, #tpu.memory_space<vmem>>, vector<64x128xbf16>
    %cst_94 = arith.constant dense<0.000000e+00> : vector<128x128xf32>
    %96 = tpu.matmul %94, %95, %cst_94 {dimension_numbers = #tpu.dot_dimension_numbers<[1], [0], [0], [1], [0, 0, 1, 1], [], []>} : vector<128x64xbf16>, vector<64x128xbf16>, vector<128x128xf32> -> vector<128x128xf32>
    %97 = arith.addf %90, %96 : vector<128x128xf32>
    %c2_95 = arith.constant 2 : index
    %c0_96 = arith.constant 0 : index
    %c0_97 = arith.constant 0 : index
    %c2_98 = arith.constant 2 : index
    %c0_99 = arith.constant 0 : index
    %98 = vector.load %arg9[%c2_95, %c0_96, %c0_97, %c2_98, %c0_99] : memref<4x2x10x10x64xf32, #tpu.memory_space<vmem>>, vector<1x2x8x8x64xf32>
    %99 = vector.shape_cast %98 : vector<1x2x8x8x64xf32> to vector<2x8x8x64xf32>
    %100 = vector.shape_cast %99 : vector<2x8x8x64xf32> to vector<128x64xf32>
    %101 = arith.truncf %100 : vector<128x64xf32> to vector<128x64xbf16>
    %c576 = arith.constant 576 : index
    %c0_100 = arith.constant 0 : index
    %102 = vector.load %arg3[%c576, %c0_100] : memref<1024x128xbf16, #tpu.memory_space<vmem>>, vector<64x128xbf16>
    %cst_101 = arith.constant dense<0.000000e+00> : vector<128x128xf32>
    %103 = tpu.matmul %101, %102, %cst_101 {dimension_numbers = #tpu.dot_dimension_numbers<[1], [0], [0], [1], [0, 0, 1, 1], [], []>} : vector<128x64xbf16>, vector<64x128xbf16>, vector<128x128xf32> -> vector<128x128xf32>
    %104 = arith.addf %97, %103 : vector<128x128xf32>
    %c2_102 = arith.constant 2 : index
    %c0_103 = arith.constant 0 : index
    %c1_104 = arith.constant 1 : index
    %c1_105 = arith.constant 1 : index
    %c0_106 = arith.constant 0 : index
    %105 = vector.load %arg9[%c2_102, %c0_103, %c1_104, %c1_105, %c0_106] : memref<4x2x10x10x64xf32, #tpu.memory_space<vmem>>, vector<1x2x8x8x64xf32>
    %106 = vector.shape_cast %105 : vector<1x2x8x8x64xf32> to vector<2x8x8x64xf32>
    %107 = vector.shape_cast %106 : vector<2x8x8x64xf32> to vector<128x64xf32>
    %108 = arith.truncf %107 : vector<128x64xf32> to vector<128x64xbf16>
    %c640 = arith.constant 640 : index
    %c0_107 = arith.constant 0 : index
    %109 = vector.load %arg3[%c640, %c0_107] : memref<1024x128xbf16, #tpu.memory_space<vmem>>, vector<64x128xbf16>
    %cst_108 = arith.constant dense<0.000000e+00> : vector<128x128xf32>
    %110 = tpu.matmul %108, %109, %cst_108 {dimension_numbers = #tpu.dot_dimension_numbers<[1], [0], [0], [1], [0, 0, 1, 1], [], []>} : vector<128x64xbf16>, vector<64x128xbf16>, vector<128x128xf32> -> vector<128x128xf32>
    %111 = arith.addf %104, %110 : vector<128x128xf32>
    %c2_109 = arith.constant 2 : index
    %c0_110 = arith.constant 0 : index
    %c1_111 = arith.constant 1 : index
    %c2_112 = arith.constant 2 : index
    %c0_113 = arith.constant 0 : index
    %112 = vector.load %arg9[%c2_109, %c0_110, %c1_111, %c2_112, %c0_113] : memref<4x2x10x10x64xf32, #tpu.memory_space<vmem>>, vector<1x2x8x8x64xf32>
    %113 = vector.shape_cast %112 : vector<1x2x8x8x64xf32> to vector<2x8x8x64xf32>
    %114 = vector.shape_cast %113 : vector<2x8x8x64xf32> to vector<128x64xf32>
    %115 = arith.truncf %114 : vector<128x64xf32> to vector<128x64xbf16>
    %c704 = arith.constant 704 : index
    %c0_114 = arith.constant 0 : index
    %116 = vector.load %arg3[%c704, %c0_114] : memref<1024x128xbf16, #tpu.memory_space<vmem>>, vector<64x128xbf16>
    %cst_115 = arith.constant dense<0.000000e+00> : vector<128x128xf32>
    %117 = tpu.matmul %115, %116, %cst_115 {dimension_numbers = #tpu.dot_dimension_numbers<[1], [0], [0], [1], [0, 0, 1, 1], [], []>} : vector<128x64xbf16>, vector<64x128xbf16>, vector<128x128xf32> -> vector<128x128xf32>
    %118 = arith.addf %111, %117 : vector<128x128xf32>
    %c3_116 = arith.constant 3 : index
    %c0_117 = arith.constant 0 : index
    %c0_118 = arith.constant 0 : index
    %c0_119 = arith.constant 0 : index
    %c0_120 = arith.constant 0 : index
    %119 = vector.load %arg9[%c3_116, %c0_117, %c0_118, %c0_119, %c0_120] : memref<4x2x10x10x64xf32, #tpu.memory_space<vmem>>, vector<1x2x8x8x64xf32>
    %120 = vector.shape_cast %119 : vector<1x2x8x8x64xf32> to vector<2x8x8x64xf32>
    %121 = vector.shape_cast %120 : vector<2x8x8x64xf32> to vector<128x64xf32>
    %122 = arith.truncf %121 : vector<128x64xf32> to vector<128x64xbf16>
    %c768 = arith.constant 768 : index
    %c0_121 = arith.constant 0 : index
    %123 = vector.load %arg3[%c768, %c0_121] : memref<1024x128xbf16, #tpu.memory_space<vmem>>, vector<64x128xbf16>
    %cst_122 = arith.constant dense<0.000000e+00> : vector<128x128xf32>
    %124 = tpu.matmul %122, %123, %cst_122 {dimension_numbers = #tpu.dot_dimension_numbers<[1], [0], [0], [1], [0, 0, 1, 1], [], []>} : vector<128x64xbf16>, vector<64x128xbf16>, vector<128x128xf32> -> vector<128x128xf32>
    %125 = arith.addf %118, %124 : vector<128x128xf32>
    %c3_123 = arith.constant 3 : index
    %c0_124 = arith.constant 0 : index
    %c0_125 = arith.constant 0 : index
    %c1_126 = arith.constant 1 : index
    %c0_127 = arith.constant 0 : index
    %126 = vector.load %arg9[%c3_123, %c0_124, %c0_125, %c1_126, %c0_127] : memref<4x2x10x10x64xf32, #tpu.memory_space<vmem>>, vector<1x2x8x8x64xf32>
    %127 = vector.shape_cast %126 : vector<1x2x8x8x64xf32> to vector<2x8x8x64xf32>
    %128 = vector.shape_cast %127 : vector<2x8x8x64xf32> to vector<128x64xf32>
    %129 = arith.truncf %128 : vector<128x64xf32> to vector<128x64xbf16>
    %c832 = arith.constant 832 : index
    %c0_128 = arith.constant 0 : index
    %130 = vector.load %arg3[%c832, %c0_128] : memref<1024x128xbf16, #tpu.memory_space<vmem>>, vector<64x128xbf16>
    %cst_129 = arith.constant dense<0.000000e+00> : vector<128x128xf32>
    %131 = tpu.matmul %129, %130, %cst_129 {dimension_numbers = #tpu.dot_dimension_numbers<[1], [0], [0], [1], [0, 0, 1, 1], [], []>} : vector<128x64xbf16>, vector<64x128xbf16>, vector<128x128xf32> -> vector<128x128xf32>
    %132 = arith.addf %125, %131 : vector<128x128xf32>
    %c3_130 = arith.constant 3 : index
    %c0_131 = arith.constant 0 : index
    %c1_132 = arith.constant 1 : index
    %c0_133 = arith.constant 0 : index
    %c0_134 = arith.constant 0 : index
    %133 = vector.load %arg9[%c3_130, %c0_131, %c1_132, %c0_133, %c0_134] : memref<4x2x10x10x64xf32, #tpu.memory_space<vmem>>, vector<1x2x8x8x64xf32>
    %134 = vector.shape_cast %133 : vector<1x2x8x8x64xf32> to vector<2x8x8x64xf32>
    %135 = vector.shape_cast %134 : vector<2x8x8x64xf32> to vector<128x64xf32>
    %136 = arith.truncf %135 : vector<128x64xf32> to vector<128x64xbf16>
    %c896 = arith.constant 896 : index
    %c0_135 = arith.constant 0 : index
    %137 = vector.load %arg3[%c896, %c0_135] : memref<1024x128xbf16, #tpu.memory_space<vmem>>, vector<64x128xbf16>
    %cst_136 = arith.constant dense<0.000000e+00> : vector<128x128xf32>
    %138 = tpu.matmul %136, %137, %cst_136 {dimension_numbers = #tpu.dot_dimension_numbers<[1], [0], [0], [1], [0, 0, 1, 1], [], []>} : vector<128x64xbf16>, vector<64x128xbf16>, vector<128x128xf32> -> vector<128x128xf32>
    %139 = arith.addf %132, %138 : vector<128x128xf32>
    %c3_137 = arith.constant 3 : index
    %c0_138 = arith.constant 0 : index
    %c1_139 = arith.constant 1 : index
    %c1_140 = arith.constant 1 : index
    %c0_141 = arith.constant 0 : index
    %140 = vector.load %arg9[%c3_137, %c0_138, %c1_139, %c1_140, %c0_141] : memref<4x2x10x10x64xf32, #tpu.memory_space<vmem>>, vector<1x2x8x8x64xf32>
    %141 = vector.shape_cast %140 : vector<1x2x8x8x64xf32> to vector<2x8x8x64xf32>
    %142 = vector.shape_cast %141 : vector<2x8x8x64xf32> to vector<128x64xf32>
    %143 = arith.truncf %142 : vector<128x64xf32> to vector<128x64xbf16>
    %c960 = arith.constant 960 : index
    %c0_142 = arith.constant 0 : index
    %144 = vector.load %arg3[%c960, %c0_142] : memref<1024x128xbf16, #tpu.memory_space<vmem>>, vector<64x128xbf16>
    %cst_143 = arith.constant dense<0.000000e+00> : vector<128x128xf32>
    %145 = tpu.matmul %143, %144, %cst_143 {dimension_numbers = #tpu.dot_dimension_numbers<[1], [0], [0], [1], [0, 0, 1, 1], [], []>} : vector<128x64xbf16>, vector<64x128xbf16>, vector<128x128xf32> -> vector<128x128xf32>
    %146 = arith.addf %139, %145 : vector<128x128xf32>
    %cst_144 = arith.constant dense<0.000000e+00> : vector<128xf32>
    %147 = vector.multi_reduction <add>, %146, %cst_144 [0] : vector<128x128xf32> to vector<128xf32>
    %148 = vector.shape_cast %147 : vector<128xf32> to vector<1x128xf32>
    %cst_145 = arith.constant 1.280000e+02 : f32
    %149 = vector.broadcast %cst_145 : f32 to vector<1x128xf32>
    %150 = arith.divf %148, %149 : vector<1x128xf32>
    %151 = vector.broadcast %150 : vector<1x128xf32> to vector<128x128xf32>
    %152 = arith.subf %146, %151 : vector<128x128xf32>
    %153 = arith.mulf %152, %152 : vector<128x128xf32>
    %cst_146 = arith.constant dense<0.000000e+00> : vector<128xf32>
    %154 = vector.multi_reduction <add>, %153, %cst_146 [0] : vector<128x128xf32> to vector<128xf32>
    %155 = vector.shape_cast %154 : vector<128xf32> to vector<1x128xf32>
    %cst_147 = arith.constant 1.280000e+02 : f32
    %156 = vector.broadcast %cst_147 : f32 to vector<1x128xf32>
    %157 = arith.divf %155, %156 : vector<1x128xf32>
    %158 = vector.broadcast %150 : vector<1x128xf32> to vector<128x128xf32>
    %159 = arith.subf %146, %158 : vector<128x128xf32>
    %cst_148 = arith.constant 9.99999974E-6 : f32
    %160 = vector.broadcast %cst_148 : f32 to vector<1x128xf32>
    %161 = arith.addf %157, %160 : vector<1x128xf32>
    %162 = math.rsqrt %161 : vector<1x128xf32>
    %163 = vector.broadcast %162 : vector<1x128xf32> to vector<128x128xf32>
    %164 = arith.mulf %159, %163 : vector<128x128xf32>
    %c0_149 = arith.constant 0 : index
    %c0_150 = arith.constant 0 : index
    %165 = vector.load %arg4[%c0_149, %c0_150] : memref<1x128xf32, #tpu.memory_space<vmem>>, vector<1x128xf32>
    %166 = vector.broadcast %165 : vector<1x128xf32> to vector<128x128xf32>
    %167 = arith.mulf %164, %166 : vector<128x128xf32>
    %c0_151 = arith.constant 0 : index
    %c0_152 = arith.constant 0 : index
    %168 = vector.load %arg5[%c0_151, %c0_152] : memref<1x128xf32, #tpu.memory_space<vmem>>, vector<1x128xf32>
    %169 = vector.broadcast %168 : vector<1x128xf32> to vector<128x128xf32>
    %170 = arith.addf %167, %169 : vector<128x128xf32>
    %cst_153 = arith.constant 0.000000e+00 : f32
    %171 = vector.broadcast %cst_153 : f32 to vector<128x128xf32>
    %172 = arith.cmpf ogt, %170, %171 : vector<128x128xf32>
    %cst_154 = arith.constant 2.000000e-01 : f32
    %173 = vector.broadcast %cst_154 : f32 to vector<128x128xf32>
    %174 = arith.mulf %173, %170 : vector<128x128xf32>
    %175 = arith.select %172, %170, %174 : vector<128x128xi1>, vector<128x128xf32>
    %176 = vector.shape_cast %175 : vector<128x128xf32> to vector<2x8x8x128xf32>
    %cst_155 = arith.constant 0.000000e+00 : f32
    %177 = vector.broadcast %cst_155 : f32 to vector<2x5x5xf32>
    %c0_156 = arith.constant 0 : index
    %c0_157 = arith.constant 0 : index
    %178 = vector.load %arg6[%c0_156, %c0_157] : memref<16x128xf32, #tpu.memory_space<vmem>>, vector<1x128xf32>
    %179 = vector.shape_cast %178 : vector<1x128xf32> to vector<128xf32>
    %180 = vector.shape_cast %179 : vector<128xf32> to vector<1x1x1x128xf32>
    %181 = vector.extract_strided_slice %176 {offsets = [0, 0, 0, 0], sizes = [2, 5, 5, 128], strides = [1, 1, 1, 1]} : vector<2x8x8x128xf32> to vector<2x5x5x128xf32>
    %182 = vector.broadcast %180 : vector<1x1x1x128xf32> to vector<2x5x5x128xf32>
    %183 = arith.mulf %181, %182 : vector<2x5x5x128xf32>
    %cst_158 = arith.constant dense<0.000000e+00> : vector<2x5x5xf32>
    %184 = vector.multi_reduction <add>, %183, %cst_158 [3] : vector<2x5x5x128xf32> to vector<2x5x5xf32>
    %185 = arith.addf %177, %184 : vector<2x5x5xf32>
    %c1_159 = arith.constant 1 : index
    %c0_160 = arith.constant 0 : index
    %186 = vector.load %arg6[%c1_159, %c0_160] : memref<16x128xf32, #tpu.memory_space<vmem>>, vector<1x128xf32>
    %187 = vector.shape_cast %186 : vector<1x128xf32> to vector<128xf32>
    %188 = vector.shape_cast %187 : vector<128xf32> to vector<1x1x1x128xf32>
    %189 = vector.extract_strided_slice %176 {offsets = [0, 0, 1, 0], sizes = [2, 5, 5, 128], strides = [1, 1, 1, 1]} : vector<2x8x8x128xf32> to vector<2x5x5x128xf32>
    %190 = vector.broadcast %188 : vector<1x1x1x128xf32> to vector<2x5x5x128xf32>
    %191 = arith.mulf %189, %190 : vector<2x5x5x128xf32>
    %cst_161 = arith.constant dense<0.000000e+00> : vector<2x5x5xf32>
    %192 = vector.multi_reduction <add>, %191, %cst_161 [3] : vector<2x5x5x128xf32> to vector<2x5x5xf32>
    %193 = arith.addf %185, %192 : vector<2x5x5xf32>
    %c2_162 = arith.constant 2 : index
    %c0_163 = arith.constant 0 : index
    %194 = vector.load %arg6[%c2_162, %c0_163] : memref<16x128xf32, #tpu.memory_space<vmem>>, vector<1x128xf32>
    %195 = vector.shape_cast %194 : vector<1x128xf32> to vector<128xf32>
    %196 = vector.shape_cast %195 : vector<128xf32> to vector<1x1x1x128xf32>
    %197 = vector.extract_strided_slice %176 {offsets = [0, 0, 2, 0], sizes = [2, 5, 5, 128], strides = [1, 1, 1, 1]} : vector<2x8x8x128xf32> to vector<2x5x5x128xf32>
    %198 = vector.broadcast %196 : vector<1x1x1x128xf32> to vector<2x5x5x128xf32>
    %199 = arith.mulf %197, %198 : vector<2x5x5x128xf32>
    %cst_164 = arith.constant dense<0.000000e+00> : vector<2x5x5xf32>
    %200 = vector.multi_reduction <add>, %199, %cst_164 [3] : vector<2x5x5x128xf32> to vector<2x5x5xf32>
    %201 = arith.addf %193, %200 : vector<2x5x5xf32>
    %c3_165 = arith.constant 3 : index
    %c0_166 = arith.constant 0 : index
    %202 = vector.load %arg6[%c3_165, %c0_166] : memref<16x128xf32, #tpu.memory_space<vmem>>, vector<1x128xf32>
    %203 = vector.shape_cast %202 : vector<1x128xf32> to vector<128xf32>
    %204 = vector.shape_cast %203 : vector<128xf32> to vector<1x1x1x128xf32>
    %205 = vector.extract_strided_slice %176 {offsets = [0, 0, 3, 0], sizes = [2, 5, 5, 128], strides = [1, 1, 1, 1]} : vector<2x8x8x128xf32> to vector<2x5x5x128xf32>
    %206 = vector.broadcast %204 : vector<1x1x1x128xf32> to vector<2x5x5x128xf32>
    %207 = arith.mulf %205, %206 : vector<2x5x5x128xf32>
    %cst_167 = arith.constant dense<0.000000e+00> : vector<2x5x5xf32>
    %208 = vector.multi_reduction <add>, %207, %cst_167 [3] : vector<2x5x5x128xf32> to vector<2x5x5xf32>
    %209 = arith.addf %201, %208 : vector<2x5x5xf32>
    %c4 = arith.constant 4 : index
    %c0_168 = arith.constant 0 : index
    %210 = vector.load %arg6[%c4, %c0_168] : memref<16x128xf32, #tpu.memory_space<vmem>>, vector<1x128xf32>
    %211 = vector.shape_cast %210 : vector<1x128xf32> to vector<128xf32>
    %212 = vector.shape_cast %211 : vector<128xf32> to vector<1x1x1x128xf32>
    %213 = vector.extract_strided_slice %176 {offsets = [0, 1, 0, 0], sizes = [2, 5, 5, 128], strides = [1, 1, 1, 1]} : vector<2x8x8x128xf32> to vector<2x5x5x128xf32>
    %214 = vector.broadcast %212 : vector<1x1x1x128xf32> to vector<2x5x5x128xf32>
    %215 = arith.mulf %213, %214 : vector<2x5x5x128xf32>
    %cst_169 = arith.constant dense<0.000000e+00> : vector<2x5x5xf32>
    %216 = vector.multi_reduction <add>, %215, %cst_169 [3] : vector<2x5x5x128xf32> to vector<2x5x5xf32>
    %217 = arith.addf %209, %216 : vector<2x5x5xf32>
    %c5 = arith.constant 5 : index
    %c0_170 = arith.constant 0 : index
    %218 = vector.load %arg6[%c5, %c0_170] : memref<16x128xf32, #tpu.memory_space<vmem>>, vector<1x128xf32>
    %219 = vector.shape_cast %218 : vector<1x128xf32> to vector<128xf32>
    %220 = vector.shape_cast %219 : vector<128xf32> to vector<1x1x1x128xf32>
    %221 = vector.extract_strided_slice %176 {offsets = [0, 1, 1, 0], sizes = [2, 5, 5, 128], strides = [1, 1, 1, 1]} : vector<2x8x8x128xf32> to vector<2x5x5x128xf32>
    %222 = vector.broadcast %220 : vector<1x1x1x128xf32> to vector<2x5x5x128xf32>
    %223 = arith.mulf %221, %222 : vector<2x5x5x128xf32>
    %cst_171 = arith.constant dense<0.000000e+00> : vector<2x5x5xf32>
    %224 = vector.multi_reduction <add>, %223, %cst_171 [3] : vector<2x5x5x128xf32> to vector<2x5x5xf32>
    %225 = arith.addf %217, %224 : vector<2x5x5xf32>
    %c6 = arith.constant 6 : index
    %c0_172 = arith.constant 0 : index
    %226 = vector.load %arg6[%c6, %c0_172] : memref<16x128xf32, #tpu.memory_space<vmem>>, vector<1x128xf32>
    %227 = vector.shape_cast %226 : vector<1x128xf32> to vector<128xf32>
    %228 = vector.shape_cast %227 : vector<128xf32> to vector<1x1x1x128xf32>
    %229 = vector.extract_strided_slice %176 {offsets = [0, 1, 2, 0], sizes = [2, 5, 5, 128], strides = [1, 1, 1, 1]} : vector<2x8x8x128xf32> to vector<2x5x5x128xf32>
    %230 = vector.broadcast %228 : vector<1x1x1x128xf32> to vector<2x5x5x128xf32>
    %231 = arith.mulf %229, %230 : vector<2x5x5x128xf32>
    %cst_173 = arith.constant dense<0.000000e+00> : vector<2x5x5xf32>
    %232 = vector.multi_reduction <add>, %231, %cst_173 [3] : vector<2x5x5x128xf32> to vector<2x5x5xf32>
    %233 = arith.addf %225, %232 : vector<2x5x5xf32>
    %c7 = arith.constant 7 : index
    %c0_174 = arith.constant 0 : index
    %234 = vector.load %arg6[%c7, %c0_174] : memref<16x128xf32, #tpu.memory_space<vmem>>, vector<1x128xf32>
    %235 = vector.shape_cast %234 : vector<1x128xf32> to vector<128xf32>
    %236 = vector.shape_cast %235 : vector<128xf32> to vector<1x1x1x128xf32>
    %237 = vector.extract_strided_slice %176 {offsets = [0, 1, 3, 0], sizes = [2, 5, 5, 128], strides = [1, 1, 1, 1]} : vector<2x8x8x128xf32> to vector<2x5x5x128xf32>
    %238 = vector.broadcast %236 : vector<1x1x1x128xf32> to vector<2x5x5x128xf32>
    %239 = arith.mulf %237, %238 : vector<2x5x5x128xf32>
    %cst_175 = arith.constant dense<0.000000e+00> : vector<2x5x5xf32>
    %240 = vector.multi_reduction <add>, %239, %cst_175 [3] : vector<2x5x5x128xf32> to vector<2x5x5xf32>
    %241 = arith.addf %233, %240 : vector<2x5x5xf32>
    %c8 = arith.constant 8 : index
    %c0_176 = arith.constant 0 : index
    %242 = vector.load %arg6[%c8, %c0_176] : memref<16x128xf32, #tpu.memory_space<vmem>>, vector<1x128xf32>
    %243 = vector.shape_cast %242 : vector<1x128xf32> to vector<128xf32>
    %244 = vector.shape_cast %243 : vector<128xf32> to vector<1x1x1x128xf32>
    %245 = vector.extract_strided_slice %176 {offsets = [0, 2, 0, 0], sizes = [2, 5, 5, 128], strides = [1, 1, 1, 1]} : vector<2x8x8x128xf32> to vector<2x5x5x128xf32>
    %246 = vector.broadcast %244 : vector<1x1x1x128xf32> to vector<2x5x5x128xf32>
    %247 = arith.mulf %245, %246 : vector<2x5x5x128xf32>
    %cst_177 = arith.constant dense<0.000000e+00> : vector<2x5x5xf32>
    %248 = vector.multi_reduction <add>, %247, %cst_177 [3] : vector<2x5x5x128xf32> to vector<2x5x5xf32>
    %249 = arith.addf %241, %248 : vector<2x5x5xf32>
    %c9 = arith.constant 9 : index
    %c0_178 = arith.constant 0 : index
    %250 = vector.load %arg6[%c9, %c0_178] : memref<16x128xf32, #tpu.memory_space<vmem>>, vector<1x128xf32>
    %251 = vector.shape_cast %250 : vector<1x128xf32> to vector<128xf32>
    %252 = vector.shape_cast %251 : vector<128xf32> to vector<1x1x1x128xf32>
    %253 = vector.extract_strided_slice %176 {offsets = [0, 2, 1, 0], sizes = [2, 5, 5, 128], strides = [1, 1, 1, 1]} : vector<2x8x8x128xf32> to vector<2x5x5x128xf32>
    %254 = vector.broadcast %252 : vector<1x1x1x128xf32> to vector<2x5x5x128xf32>
    %255 = arith.mulf %253, %254 : vector<2x5x5x128xf32>
    %cst_179 = arith.constant dense<0.000000e+00> : vector<2x5x5xf32>
    %256 = vector.multi_reduction <add>, %255, %cst_179 [3] : vector<2x5x5x128xf32> to vector<2x5x5xf32>
    %257 = arith.addf %249, %256 : vector<2x5x5xf32>
    %c10 = arith.constant 10 : index
    %c0_180 = arith.constant 0 : index
    %258 = vector.load %arg6[%c10, %c0_180] : memref<16x128xf32, #tpu.memory_space<vmem>>, vector<1x128xf32>
    %259 = vector.shape_cast %258 : vector<1x128xf32> to vector<128xf32>
    %260 = vector.shape_cast %259 : vector<128xf32> to vector<1x1x1x128xf32>
    %261 = vector.extract_strided_slice %176 {offsets = [0, 2, 2, 0], sizes = [2, 5, 5, 128], strides = [1, 1, 1, 1]} : vector<2x8x8x128xf32> to vector<2x5x5x128xf32>
    %262 = vector.broadcast %260 : vector<1x1x1x128xf32> to vector<2x5x5x128xf32>
    %263 = arith.mulf %261, %262 : vector<2x5x5x128xf32>
    %cst_181 = arith.constant dense<0.000000e+00> : vector<2x5x5xf32>
    %264 = vector.multi_reduction <add>, %263, %cst_181 [3] : vector<2x5x5x128xf32> to vector<2x5x5xf32>
    %265 = arith.addf %257, %264 : vector<2x5x5xf32>
    %c11 = arith.constant 11 : index
    %c0_182 = arith.constant 0 : index
    %266 = vector.load %arg6[%c11, %c0_182] : memref<16x128xf32, #tpu.memory_space<vmem>>, vector<1x128xf32>
    %267 = vector.shape_cast %266 : vector<1x128xf32> to vector<128xf32>
    %268 = vector.shape_cast %267 : vector<128xf32> to vector<1x1x1x128xf32>
    %269 = vector.extract_strided_slice %176 {offsets = [0, 2, 3, 0], sizes = [2, 5, 5, 128], strides = [1, 1, 1, 1]} : vector<2x8x8x128xf32> to vector<2x5x5x128xf32>
    %270 = vector.broadcast %268 : vector<1x1x1x128xf32> to vector<2x5x5x128xf32>
    %271 = arith.mulf %269, %270 : vector<2x5x5x128xf32>
    %cst_183 = arith.constant dense<0.000000e+00> : vector<2x5x5xf32>
    %272 = vector.multi_reduction <add>, %271, %cst_183 [3] : vector<2x5x5x128xf32> to vector<2x5x5xf32>
    %273 = arith.addf %265, %272 : vector<2x5x5xf32>
    %c12 = arith.constant 12 : index
    %c0_184 = arith.constant 0 : index
    %274 = vector.load %arg6[%c12, %c0_184] : memref<16x128xf32, #tpu.memory_space<vmem>>, vector<1x128xf32>
    %275 = vector.shape_cast %274 : vector<1x128xf32> to vector<128xf32>
    %276 = vector.shape_cast %275 : vector<128xf32> to vector<1x1x1x128xf32>
    %277 = vector.extract_strided_slice %176 {offsets = [0, 3, 0, 0], sizes = [2, 5, 5, 128], strides = [1, 1, 1, 1]} : vector<2x8x8x128xf32> to vector<2x5x5x128xf32>
    %278 = vector.broadcast %276 : vector<1x1x1x128xf32> to vector<2x5x5x128xf32>
    %279 = arith.mulf %277, %278 : vector<2x5x5x128xf32>
    %cst_185 = arith.constant dense<0.000000e+00> : vector<2x5x5xf32>
    %280 = vector.multi_reduction <add>, %279, %cst_185 [3] : vector<2x5x5x128xf32> to vector<2x5x5xf32>
    %281 = arith.addf %273, %280 : vector<2x5x5xf32>
    %c13 = arith.constant 13 : index
    %c0_186 = arith.constant 0 : index
    %282 = vector.load %arg6[%c13, %c0_186] : memref<16x128xf32, #tpu.memory_space<vmem>>, vector<1x128xf32>
    %283 = vector.shape_cast %282 : vector<1x128xf32> to vector<128xf32>
    %284 = vector.shape_cast %283 : vector<128xf32> to vector<1x1x1x128xf32>
    %285 = vector.extract_strided_slice %176 {offsets = [0, 3, 1, 0], sizes = [2, 5, 5, 128], strides = [1, 1, 1, 1]} : vector<2x8x8x128xf32> to vector<2x5x5x128xf32>
    %286 = vector.broadcast %284 : vector<1x1x1x128xf32> to vector<2x5x5x128xf32>
    %287 = arith.mulf %285, %286 : vector<2x5x5x128xf32>
    %cst_187 = arith.constant dense<0.000000e+00> : vector<2x5x5xf32>
    %288 = vector.multi_reduction <add>, %287, %cst_187 [3] : vector<2x5x5x128xf32> to vector<2x5x5xf32>
    %289 = arith.addf %281, %288 : vector<2x5x5xf32>
    %c14 = arith.constant 14 : index
    %c0_188 = arith.constant 0 : index
    %290 = vector.load %arg6[%c14, %c0_188] : memref<16x128xf32, #tpu.memory_space<vmem>>, vector<1x128xf32>
    %291 = vector.shape_cast %290 : vector<1x128xf32> to vector<128xf32>
    %292 = vector.shape_cast %291 : vector<128xf32> to vector<1x1x1x128xf32>
    %293 = vector.extract_strided_slice %176 {offsets = [0, 3, 2, 0], sizes = [2, 5, 5, 128], strides = [1, 1, 1, 1]} : vector<2x8x8x128xf32> to vector<2x5x5x128xf32>
    %294 = vector.broadcast %292 : vector<1x1x1x128xf32> to vector<2x5x5x128xf32>
    %295 = arith.mulf %293, %294 : vector<2x5x5x128xf32>
    %cst_189 = arith.constant dense<0.000000e+00> : vector<2x5x5xf32>
    %296 = vector.multi_reduction <add>, %295, %cst_189 [3] : vector<2x5x5x128xf32> to vector<2x5x5xf32>
    %297 = arith.addf %289, %296 : vector<2x5x5xf32>
    %c15 = arith.constant 15 : index
    %c0_190 = arith.constant 0 : index
    %298 = vector.load %arg6[%c15, %c0_190] : memref<16x128xf32, #tpu.memory_space<vmem>>, vector<1x128xf32>
    %299 = vector.shape_cast %298 : vector<1x128xf32> to vector<128xf32>
    %300 = vector.shape_cast %299 : vector<128xf32> to vector<1x1x1x128xf32>
    %301 = vector.extract_strided_slice %176 {offsets = [0, 3, 3, 0], sizes = [2, 5, 5, 128], strides = [1, 1, 1, 1]} : vector<2x8x8x128xf32> to vector<2x5x5x128xf32>
    %302 = vector.broadcast %300 : vector<1x1x1x128xf32> to vector<2x5x5x128xf32>
    %303 = arith.mulf %301, %302 : vector<2x5x5x128xf32>
    %cst_191 = arith.constant dense<0.000000e+00> : vector<2x5x5xf32>
    %304 = vector.multi_reduction <add>, %303, %cst_191 [3] : vector<2x5x5x128xf32> to vector<2x5x5xf32>
    %305 = arith.addf %297, %304 : vector<2x5x5xf32>
    %c0_192 = arith.constant 0 : index
    %c0_193 = arith.constant 0 : index
    %306 = vector.load %arg7[%c0_192, %c0_193] : memref<1x1xf32, #tpu.memory_space<vmem>>, vector<1x1xf32>
    %307 = vector.shape_cast %306 : vector<1x1xf32> to vector<1x1x1xf32>
    %308 = vector.broadcast %307 : vector<1x1x1xf32> to vector<2x5x5xf32>
    %309 = arith.addf %305, %308 : vector<2x5x5xf32>
    %cst_194 = arith.constant 0.000000e+00 : f32
    %310 = vector.broadcast %cst_194 : f32 to vector<2x5x5xf32>
    %311 = arith.subf %310, %309 : vector<2x5x5xf32>
    %312 = math.exp %311 : vector<2x5x5xf32>
    %cst_195 = arith.constant 1.000000e+00 : f32
    %313 = vector.broadcast %cst_195 : f32 to vector<2x5x5xf32>
    %314 = arith.addf %313, %312 : vector<2x5x5xf32>
    %cst_196 = arith.constant 1.000000e+00 : f32
    %315 = vector.broadcast %cst_196 : f32 to vector<2x5x5xf32>
    %316 = arith.divf %315, %314 : vector<2x5x5xf32>
    %c0_197 = arith.constant 0 : index
    %c0_198 = arith.constant 0 : index
    %c0_199 = arith.constant 0 : index
    %317 = vector.load %arg8[%c0_197, %c0_198, %c0_199] : memref<2x5x5xf32, #tpu.memory_space<vmem>>, vector<2x5x5xf32>
    tpu.vector_store %arg8[%c0_197, %c0_198, %c0_199], %316 {strides = array<i32>} : memref<2x5x5xf32, #tpu.memory_space<vmem>>, vector<2x5x5xf32>,
    return
  }
}

</mosaic_0001>

<bundles_post_ra>
// kernel: discriminator_forward.1
= control target key start
LH: loop header
LB: loop body
LE: loop exit
PB: predicated region body
PF: predicated region fallthrough
CT: control target
= control target key end

     0   :  { %vm279_vm0 = vcmask 261120   ;;  %vm857_vm1 = vcmask 523264   ;;  %vm859_vm2 = vcmask 517120   ;;  %v7106_v28 = vmov 0.0   ;;  %s9288_s1 = inlined_call_operand.vmem [shape: bf16[32,64], index: 1, kind: input, shape index: {}]   ;;  %s9289_s0 = inlined_call_operand.vmem [shape: bf16[512,32], index: 0, kind: input, shape index: {}]   ;;  %s9290_s3 = inlined_call_operand.vmem [shape: bf16[1024,128], index: 3, kind: input, shape index: {}]   ;;  %s9291_s2 = inlined_call_operand.vmem [shape: f32[1,64], index: 2, kind: input, shape index: {}]   ;;  %s9292_s4 = inlined_call_operand.vmem [shape: f32[1,128], index: 4, kind: input, shape index: {}]   ;;  %s9293_s5 = inlined_call_operand.vmem [shape: f32[1,128], index: 5, kind: input, shape index: {}]   ;;  %s9294_s6 = inlined_call_operand.vmem [shape: f32[16,128], index: 6, kind: input, shape index: {}]   ;;  %s9295_s7 = inlined_call_operand.<no memory space> [shape: f32[1,1], index: 7, kind: input, shape index: {}]   ;;  %s9296_s8 = inlined_call_operand.vmem [shape: f32[2,5,5], index: 8, kind: output, shape index: {}]  }
   0x1   :  { %v6963_v0 = vld [vmem:[%s9288_s1] sm:$0xff]   ;;  %v6964_v1 = vld [vmem:[%s9288_s1 + $0x8] sm:$0xff]   ;;  %v6967_v4 = vld [vmem:[%s9289_s0 + $0x10] sm:$0xff]   ;;  %865 = vst.msk [vmem:[#allocation2 + $0x30] sm:$0xff] %vm857_vm1, %v7106_v28 }
   0x2   :  { %6267 = vmatprep.subr.bf16.mxu0 %v6963_v0  ;;  %v6965_v2 = vld [vmem:[%s9289_s0] sm:$0xff]   ;;  %v6966_v3 = vld [vmem:[%s9289_s0 + $0x8] sm:$0xff]   ;;  %v6968_v5 = vld [vmem:[%s9289_s0 + $0x18] sm:$0xff]   ;;  %866 = vst.msk [vmem:[#allocation2 + $0x38] sm:$0x3] %vm859_vm2, %v7106_v28 }
   0x3   :  { %6268 = vmatpush3.bf16.msra.mxu0 %v6963_v0  ;;  %6271 = vmatprep.mubr.msk.bf16.mxu0 %vm279_vm0, %v6965_v2  ;;  %v6969_v6 = vld [vmem:[%s9289_s0 + $0x20] sm:$0xff]   ;;  %v6970_v7 = vld [vmem:[%s9289_s0 + $0x28] sm:$0xff]   ;;  %v6971_v8 = vld [vmem:[%s9289_s0 + $0x30] sm:$0xff]   ;;  %861 = vst.msk [vmem:[#allocation2 + $0x10] sm:$0xff] %vm857_vm1, %v7106_v28 }
   0x4   :  { %6269 = vmatprep.subr.bf16.mxu0 %v6964_v1  ;;  %v6972_v9 = vld [vmem:[%s9289_s0 + $0x38] sm:$0xff]   ;;  %v6973_v10 = vld [vmem:[%s9289_s0 + $0x40] sm:$0xff]   ;;  %v6974_v11 = vld [vmem:[%s9289_s0 + $0x48] sm:$0xff]   ;;  %862 = vst.msk [vmem:[#allocation2 + $0x18] sm:$0x3] %vm859_vm2, %v7106_v28 }
   0x5   :  { %v6975_v12 = vld [vmem:[%s9289_s0 + $0x50] sm:$0xff]   ;;  %v6976_v13 = vld [vmem:[%s9289_s0 + $0x58] sm:$0xff]   ;;  %v6977_v14 = vld [vmem:[%s9289_s0 + $0x60] sm:$0xff]   ;;  %863 = vst.msk [vmem:[#allocation2 + $0x20] sm:$0xff] %vm857_vm1, %v7106_v28 }
   0x6   :  { %v6978_v15 = vld [vmem:[%s9289_s0 + $0x68] sm:$0xff]   ;;  %v6979_v16 = vld [vmem:[%s9289_s0 + $0x70] sm:$0xff]   ;;  %v6980_v17 = vld [vmem:[%s9289_s0 + $0x78] sm:$0xff]   ;;  %864 = vst.msk [vmem:[#allocation2 + $0x28] sm:$0x3] %vm859_vm2, %v7106_v28 }
   0x7   :  { %6270 = vmatpush3.bf16.msra.mxu0 %v6964_v1  ;;  %v6981_v18 = vld [vmem:[%s9289_s0 + $0x80] sm:$0xff]   ;;  %v6982_v19 = vld [vmem:[%s9289_s0 + $0x88] sm:$0xff]   ;;  %v6983_v20 = vld [vmem:[%s9289_s0 + $0x90] sm:$0xff]   ;;  %867 = vst.msk [vmem:[#allocation2 + $0x40] sm:$0xff] %vm857_vm1, %v7106_v28 }
   0x8   :  { %v6984_v21 = vld [vmem:[%s9289_s0 + $0x98] sm:$0xff]   ;;  %v6985_v22 = vld [vmem:[%s9289_s0 + $0xa0] sm:$0xff]   ;;  %v6986_v23 = vld [vmem:[%s9289_s0 + $0xa8] sm:$0xff]   ;;  %868 = vst.msk [vmem:[#allocation2 + $0x48] sm:$0x3] %vm859_vm2, %v7106_v28 }
   0x9   :  { %v6987_v24 = vld [vmem:[%s9289_s0 + $0xb0] sm:$0xff]   ;;  %v6988_v25 = vld [vmem:[%s9289_s0 + $0xb8] sm:$0xff]   ;;  %v7257_v26 = vld [vmem:[%s9289_s0 + $0xc0] sm:$0xff]   ;;  %869 = vst.msk [vmem:[#allocation2 + $0x50] sm:$0xff] %vm857_vm1, %v7106_v28 }
   0xa   :  { %6272 = vmatmul.mubr.msk.bf16.vlgmr.msra.gmra.mrb[0].mxu0 %vm279_vm0, %v6966_v3  ;;  %v7262_v27 = vld [vmem:[%s9290_s3 + $0x20] sm:$0xff]   ;;  %870 = vst.msk [vmem:[#allocation2 + $0x58] sm:$0x3] %vm859_vm2, %v7106_v28  ;;  %872 = vst.msk [vmem:[#allocation2 + $0x68] sm:$0x3] %vm859_vm2, %v7106_v28  ;;  %v6996_v29 = vld [vmem:[%s9290_s3 + $0x28] sm:$0xff]  }
   0xb   :  { %6275 = vmatprep.mubr.msk.bf16.mxu0 %vm279_vm0, %v6967_v4  ;;  %871 = vst.msk [vmem:[#allocation2 + $0x60] sm:$0xff] %vm857_vm1, %v7106_v28  ;;  %873 = vst.msk [vmem:[#allocation2 + $0x70] sm:$0xff] %vm857_vm1, %v7106_v28  ;;  %6335 = vmatprep.subr.bf16.mxu0 %v7262_v27  ;;  %v6990_v30 = vld [vmem:[%s9289_s0 + $0xc8] sm:$0xff]   ;;  %v6991_v31 = vld [vmem:[%s9289_s0 + $0xd0] sm:$0xff]  }
   0xc   :  { %874 = vst.msk [vmem:[#allocation2 + $0x78] sm:$0x3] %vm859_vm2, %v7106_v28  ;;  %876 = vst.msk [vmem:[#allocation2 + $0x88] sm:$0x3] %vm859_vm2, %v7106_v28  ;;  %6336 = vmatpush3.bf16.msra.mxu0 %v7262_v27  ;;  %v6999_v32 = vld [vmem:[%s9290_s3 + $0x30] sm:$0xff]   ;;  %v7000_v33 = vld [vmem:[%s9290_s3 + $0x38] sm:$0xff]  }
   0xd   :  { %875 = vst.msk [vmem:[#allocation2 + $0x80] sm:$0xff] %vm857_vm1, %v7106_v28  ;;  %877 = vst.msk [vmem:[#allocation2 + $0x90] sm:$0xff] %vm857_vm1, %v7106_v28  ;;  %6337 = vmatprep.subr.bf16.mxu0 %v6996_v29  ;;  %v6992_v34 = vld [vmem:[%s9289_s0 + $0xd8] sm:$0xff]   ;;  %v6993_v35 = vld [vmem:[%s9289_s0 + $0xe0] sm:$0xff]  }
   0xe   :  { %878 = vst.msk [vmem:[#allocation2 + $0x98] sm:$0x3] %vm859_vm2, %v7106_v28  ;;  %882 = vst.msk [vmem:[#allocation2 + $0xb8] sm:$0x3] %vm859_vm2, %v7106_v28  ;;  %v6994_v36 = vld [vmem:[%s9289_s0 + $0xe8] sm:$0xff]   ;;  %v7001_v37 = vld [vmem:[%s9290_s3 + $0xc0] sm:$0xff]  }
   0xf   :  { %881 = vst.msk [vmem:[#allocation2 + $0xb0] sm:$0xff] %vm857_vm1, %v7106_v28  ;;  %883 = vst.msk [vmem:[#allocation2 + $0xc0] sm:$0xff] %vm857_vm1, %v7106_v28  ;;  %v6997_v38 = vld [vmem:[%s9289_s0 + $0xf0] sm:$0xff]   ;;  %6479 = vmatprep.subr.bf16.mxu1 %v7001_v37  ;;  %v7002_v39 = vld [vmem:[%s9290_s3 + $0xc8] sm:$0xff]  }
  0x10   :  { %884 = vst.msk [vmem:[#allocation2 + $0xc8] sm:$0x3] %vm859_vm2, %v7106_v28  ;;  %886 = vst.msk [vmem:[#allocation2 + $0xd8] sm:$0x3] %vm859_vm2, %v7106_v28  ;;  %6338 = vmatpush3.bf16.msra.mxu0 %v6996_v29  ;;  %6480 = vmatpush3.bf16.msra.mxu1 %v7001_v37  ;;  %v6998_v40 = vld [vmem:[%s9289_s0 + $0xf8] sm:$0xff]   ;;  %v7003_v41 = vld [vmem:[%s9290_s3 + $0xd0] sm:$0xff]  }
  0x11   :  { %885 = vst.msk [vmem:[#allocation2 + $0xd0] sm:$0xff] %vm857_vm1, %v7106_v28  ;;  %887 = vst.msk [vmem:[#allocation2 + $0xe0] sm:$0xff] %vm857_vm1, %v7106_v28  ;;  %6339 = vmatprep.subr.bf16.mxu0 %v6999_v32  ;;  %6481 = vmatprep.subr.bf16.mxu1 %v7002_v39  ;;  %v7004_v42 = vld [vmem:[%s9290_s3 + $0xd8] sm:$0xff]   ;;  %v7609_v43 = vld [vmem:[%s9290_s3] sm:$0xff]  }
  0x12   :  { %6276 = vmatmul.mubr.msk.bf16.gmra.mrb[4].mxu0 %vm279_vm0, %v6968_v5  ;;  %888 = vst.msk [vmem:[#allocation2 + $0xe8] sm:$0x3] %vm859_vm2, %v7106_v28  ;;  %890 = vst.msk [vmem:[#allocation2 + $0xf8] sm:$0x3] %vm859_vm2, %v7106_v28  ;;  %v7615_v44 = vld [vmem:[%s9290_s3 + $0xe0] sm:$0xff]  }
  0x13   :  { %6279 = vmatprep.mubr.msk.bf16.mxu0 %vm279_vm0, %v6969_v6  ;;  %889 = vst.msk [vmem:[#allocation2 + $0xf0] sm:$0xff] %vm857_vm1, %v7106_v28  ;;  %891 = vst.msk [vmem:[#allocation2 + $0x100] sm:$0xff] %vm857_vm1, %v7106_v28  ;;  %v7621_v45 = vld [vmem:[%s9291_s2] ss:$0 sm:$0xff] }
  0x14   :  { %892 = vst.msk [vmem:[#allocation2 + $0x108] sm:$0x3] %vm859_vm2, %v7106_v28  ;;  %894 = vst.msk [vmem:[#allocation2 + $0x118] sm:$0x3] %vm859_vm2, %v7106_v28  ;;  %6340 = vmatpush3.bf16.msra.mxu0 %v6999_v32  ;;  %6482 = vmatpush3.bf16.msra.mxu1 %v7002_v39 }
  0x15   :  { %893 = vst.msk [vmem:[#allocation2 + $0x110] sm:$0xff] %vm857_vm1, %v7106_v28  ;;  %895 = vst.msk [vmem:[#allocation2 + $0x120] sm:$0xff] %vm857_vm1, %v7106_v28  ;;  %6341 = vmatprep.subr.bf16.mxu0 %v7000_v33  ;;  %6483 = vmatprep.subr.bf16.mxu1 %v7003_v41 }
  0x16   :  { %896 = vst.msk [vmem:[#allocation2 + $0x128] sm:$0x3] %vm859_vm2, %v7106_v28  ;;  %898 = vst.msk [vmem:[#allocation2 + $0x138] sm:$0x3] %vm859_vm2, %v7106_v28 }
  0x17   :  { %897 = vst.msk [vmem:[#allocation2 + $0x130] sm:$0xff] %vm857_vm1, %v7106_v28  ;;  %901 = vst.msk [vmem:[#allocation2 + $0x150] sm:$0xff] %vm857_vm1, %v7106_v28 }
  0x18   :  { %902 = vst.msk [vmem:[#allocation2 + $0x158] sm:$0x3] %vm859_vm2, %v7106_v28  ;;  %904 = vst.msk [vmem:[#allocation2 + $0x168] sm:$0x3] %vm859_vm2, %v7106_v28  ;;  %6342 = vmatpush3.bf16.msra.mxu0 %v7000_v33  ;;  %6484 = vmatpush3.bf16.msra.mxu1 %v7003_v41 }
  0x19   :  { %903 = vst.msk [vmem:[#allocation2 + $0x160] sm:$0xff] %vm857_vm1, %v7106_v28  ;;  %905 = vst.msk [vmem:[#allocation2 + $0x170] sm:$0xff] %vm857_vm1, %v7106_v28  ;;  %6485 = vmatprep.subr.bf16.mxu1 %v7004_v42  ;;  %6359 = vmatprep.subr.bf16.mxu0 %v7609_v43 }
  0x1a   :  { %6280 = vmatmul.mubr.msk.bf16.gmra.mrb[8].mxu0 %vm279_vm0, %v6970_v7  ;;  %906 = vst.msk [vmem:[#allocation2 + $0x178] sm:$0x3] %vm859_vm2, %v7106_v28  ;;  %908 = vst.msk [vmem:[#allocation2 + $0x188] sm:$0x3] %vm859_vm2, %v7106_v28 }
  0x1b   :  { %6283 = vmatprep.mubr.msk.bf16.mxu0 %vm279_vm0, %v6971_v8  ;;  %907 = vst.msk [vmem:[#allocation2 + $0x180] sm:$0xff] %vm857_vm1, %v7106_v28  ;;  %909 = vst.msk [vmem:[#allocation2 + $0x190] sm:$0xff] %vm857_vm1, %v7106_v28 }
  0x1c   :  { %910 = vst.msk [vmem:[#allocation2 + $0x198] sm:$0x3] %vm859_vm2, %v7106_v28  ;;  %912 = vst.msk [vmem:[#allocation2 + $0x1a8] sm:$0x3] %vm859_vm2, %v7106_v28  ;;  %6486 = vmatpush3.bf16.msra.mxu1 %v7004_v42 }
  0x1d   :  { %911 = vst.msk [vmem:[#allocation2 + $0x1a0] sm:$0xff] %vm857_vm1, %v7106_v28  ;;  %913 = vst.msk [vmem:[#allocation2 + $0x1b0] sm:$0xff] %vm857_vm1, %v7106_v28  ;;  %6503 = vmatprep.subr.bf16.mxu1 %v7615_v44 }
  0x1e   :  { %914 = vst.msk [vmem:[#allocation2 + $0x1b8] sm:$0x3] %vm859_vm2, %v7106_v28  ;;  %916 = vst.msk [vmem:[#allocation2 + $0x1c8] sm:$0x3] %vm859_vm2, %v7106_v28 }
  0x1f   :  { %915 = vst.msk [vmem:[#allocation2 + $0x1c0] sm:$0xff] %vm857_vm1, %v7106_v28  ;;  %917 = vst.msk [vmem:[#allocation2 + $0x1d0] sm:$0xff] %vm857_vm1, %v7106_v28 }
  0x20   :  { %918 = vst.msk [vmem:[#allocation2 + $0x1d8] sm:$0x3] %vm859_vm2, %v7106_v28  ;;  %922 = vst.msk [vmem:[#allocation2 + $0x1f8] sm:$0x3] %vm859_vm2, %v7106_v28 }
  0x21   :  { %921 = vst.msk [vmem:[#allocation2 + $0x1f0] sm:$0xff] %vm857_vm1, %v7106_v28  ;;  %923 = vst.msk [vmem:[#allocation2 + $0x200] sm:$0xff] %vm857_vm1, %v7106_v28 }
  0x22   :  { %6284 = vmatmul.mubr.msk.bf16.gmra.mrb[12].mxu0 %vm279_vm0, %v6972_v9  ;;  %924 = vst.msk [vmem:[#allocation2 + $0x208] sm:$0x3] %vm859_vm2, %v7106_v28  ;;  %926 = vst.msk [vmem:[#allocation2 + $0x218] sm:$0x3] %vm859_vm2, %v7106_v28 }
  0x23   :  { %6287 = vmatprep.mubr.msk.bf16.mxu0 %vm279_vm0, %v6973_v10  ;;  %925 = vst.msk [vmem:[#allocation2 + $0x210] sm:$0xff] %vm857_vm1, %v7106_v28  ;;  %927 = vst.msk [vmem:[#allocation2 + $0x220] sm:$0xff] %vm857_vm1, %v7106_v28 }
  0x24   :  { %928 = vst.msk [vmem:[#allocation2 + $0x228] sm:$0x3] %vm859_vm2, %v7106_v28  ;;  %930 = vst.msk [vmem:[#allocation2 + $0x238] sm:$0x3] %vm859_vm2, %v7106_v28 }
  0x25   :  { %929 = vst.msk [vmem:[#allocation2 + $0x230] sm:$0xff] %vm857_vm1, %v7106_v28  ;;  %931 = vst.msk [vmem:[#allocation2 + $0x240] sm:$0xff] %vm857_vm1, %v7106_v28 }
  0x26   :  { %932 = vst.msk [vmem:[#allocation2 + $0x248] sm:$0x3] %vm859_vm2, %v7106_v28  ;;  %934 = vst.msk [vmem:[#allocation2 + $0x258] sm:$0x3] %vm859_vm2, %v7106_v28 }
  0x27   :  { %933 = vst.msk [vmem:[#allocation2 + $0x250] sm:$0xff] %vm857_vm1, %v7106_v28  ;;  %935 = vst.msk [vmem:[#allocation2 + $0x260] sm:$0xff] %vm857_vm1, %v7106_v28 }
  0x28   :  { %936 = vst.msk [vmem:[#allocation2 + $0x268] sm:$0x3] %vm859_vm2, %v7106_v28  ;;  %938 = vst.msk [vmem:[#allocation2 + $0x278] sm:$0x3] %vm859_vm2, %v7106_v28 }
  0x29   :  { %937 = vst.msk [vmem:[#allocation2 + $0x270] sm:$0xff] %vm857_vm1, %v7106_v28  ;;  %939 = vst.msk [vmem:[#allocation2 + $0x280] sm:$0xff] %vm857_vm1, %v7106_v28 }
  0x2a   :  { %6288 = vmatmul.mubr.msk.bf16.gmra.mrb[16].mxu0 %vm279_vm0, %v6974_v11  ;;  %940 = vst.msk [vmem:[#allocation2 + $0x288] sm:$0x3] %vm859_vm2, %v7106_v28  ;;  %942 = vst.msk [vmem:[#allocation2 + $0x298] sm:$0x3] %vm859_vm2, %v7106_v28 }
  0x2b   :  { %6291 = vmatprep.mubr.msk.bf16.mxu0 %vm279_vm0, %v6975_v12  ;;  %941 = vst.msk [vmem:[#allocation2 + $0x290] sm:$0xff] %vm857_vm1, %v7106_v28  ;;  %943 = vst.msk [vmem:[#allocation2 + $0x2a0] sm:$0xff] %vm857_vm1, %v7106_v28 }
  0x2c   :  { %944 = vst.msk [vmem:[#allocation2 + $0x2a8] sm:$0x3] %vm859_vm2, %v7106_v28  ;;  %946 = vst.msk [vmem:[#allocation2 + $0x2b8] sm:$0x3] %vm859_vm2, %v7106_v28 }
  0x2d   :  { %945 = vst.msk [vmem:[#allocation2 + $0x2b0] sm:$0xff] %vm857_vm1, %v7106_v28  ;;  %947 = vst.msk [vmem:[#allocation2 + $0x2c0] sm:$0xff] %vm857_vm1, %v7106_v28 }
  0x2e   :  { %948 = vst.msk [vmem:[#allocation2 + $0x2c8] sm:$0x3] %vm859_vm2, %v7106_v28  ;;  %950 = vst.msk [vmem:[#allocation2 + $0x2d8] sm:$0x3] %vm859_vm2, %v7106_v28 }
  0x2f   :  { %949 = vst.msk [vmem:[#allocation2 + $0x2d0] sm:$0xff] %vm857_vm1, %v7106_v28  ;;  %951 = vst.msk [vmem:[#allocation2 + $0x2e0] sm:$0xff] %vm857_vm1, %v7106_v28 }
  0x30   :  { %952 = vst.msk [vmem:[#allocation2 + $0x2e8] sm:$0x3] %vm859_vm2, %v7106_v28  ;;  %954 = vst.msk [vmem:[#allocation2 + $0x2f8] sm:$0x3] %vm859_vm2, %v7106_v28 }
  0x31   :  { %953 = vst.msk [vmem:[#allocation2 + $0x2f0] sm:$0xff] %vm857_vm1, %v7106_v28  ;;  %955 = vst.msk [vmem:[#allocation2 + $0x300] sm:$0xff] %vm857_vm1, %v7106_v28 }
  0x32   :  { %6292 = vmatmul.mubr.msk.bf16.gmra.mrb[20].mxu0 %vm279_vm0, %v6976_v13  ;;  %956 = vst.msk [vmem:[#allocation2 + $0x308] sm:$0x3] %vm859_vm2, %v7106_v28  ;;  %960 = vst.msk [vmem:[#allocation2 + $0x328] sm:$0x3] %vm859_vm2, %v7106_v28 }
  0x33   :  { %6295 = vmatprep.mubr.msk.bf16.mxu0 %vm279_vm0, %v6977_v14  ;;  %959 = vst.msk [vmem:[#allocation2 + $0x320] sm:$0xff] %vm857_vm1, %v7106_v28  ;;  %961 = vst.msk [vmem:[#allocation2 + $0x330] sm:$0xff] %vm857_vm1, %v7106_v28 }
  0x34   :  { %962 = vst.msk [vmem:[#allocation2 + $0x338] sm:$0x3] %vm859_vm2, %v7106_v28  ;;  %964 = vst.msk [vmem:[#allocation2 + $0x348] sm:$0x3] %vm859_vm2, %v7106_v28 }
  0x35   :  { %963 = vst.msk [vmem:[#allocation2 + $0x340] sm:$0xff] %vm857_vm1, %v7106_v28  ;;  %965 = vst.msk [vmem:[#allocation2 + $0x350] sm:$0xff] %vm857_vm1, %v7106_v28 }
  0x36   :  { %966 = vst.msk [vmem:[#allocation2 + $0x358] sm:$0x3] %vm859_vm2, %v7106_v28  ;;  %968 = vst.msk [vmem:[#allocation2 + $0x368] sm:$0x3] %vm859_vm2, %v7106_v28 }
  0x37   :  { %967 = vst.msk [vmem:[#allocation2 + $0x360] sm:$0xff] %vm857_vm1, %v7106_v28  ;;  %969 = vst.msk [vmem:[#allocation2 + $0x370] sm:$0xff] %vm857_vm1, %v7106_v28 }
  0x38   :  { %970 = vst.msk [vmem:[#allocation2 + $0x378] sm:$0x3] %vm859_vm2, %v7106_v28  ;;  %972 = vst.msk [vmem:[#allocation2 + $0x388] sm:$0x3] %vm859_vm2, %v7106_v28 }
  0x39   :  { %971 = vst.msk [vmem:[#allocation2 + $0x380] sm:$0xff] %vm857_vm1, %v7106_v28  ;;  %973 = vst.msk [vmem:[#allocation2 + $0x390] sm:$0xff] %vm857_vm1, %v7106_v28 }
  0x3a   :  { %6296 = vmatmul.mubr.msk.bf16.gmra.mrb[24].mxu0 %vm279_vm0, %v6978_v15  ;;  %974 = vst.msk [vmem:[#allocation2 + $0x398] sm:$0x3] %vm859_vm2, %v7106_v28  ;;  %976 = vst.msk [vmem:[#allocation2 + $0x3a8] sm:$0x3] %vm859_vm2, %v7106_v28 }
  0x3b   :  { %6299 = vmatprep.mubr.msk.bf16.mxu0 %vm279_vm0, %v6979_v16  ;;  %975 = vst.msk [vmem:[#allocation2 + $0x3a0] sm:$0xff] %vm857_vm1, %v7106_v28  ;;  %979 = vst.msk [vmem:[#allocation2 + $0x3c0] sm:$0xff] %vm857_vm1, %v7106_v28 }
  0x3c   :  { %980 = vst.msk [vmem:[#allocation2 + $0x3c8] sm:$0x3] %vm859_vm2, %v7106_v28  ;;  %982 = vst.msk [vmem:[#allocation2 + $0x3d8] sm:$0x3] %vm859_vm2, %v7106_v28 }
  0x3d   :  { %981 = vst.msk [vmem:[#allocation2 + $0x3d0] sm:$0xff] %vm857_vm1, %v7106_v28  ;;  %983 = vst.msk [vmem:[#allocation2 + $0x3e0] sm:$0xff] %vm857_vm1, %v7106_v28 }
  0x3e   :  { %984 = vst.msk [vmem:[#allocation2 + $0x3e8] sm:$0x3] %vm859_vm2, %v7106_v28  ;;  %986 = vst.msk [vmem:[#allocation2 + $0x3f8] sm:$0x3] %vm859_vm2, %v7106_v28 }
  0x3f   :  { %985 = vst.msk [vmem:[#allocation2 + $0x3f0] sm:$0xff] %vm857_vm1, %v7106_v28  ;;  %987 = vst.msk [vmem:[#allocation2 + $0x400] sm:$0xff] %vm857_vm1, %v7106_v28 }
  0x40   :  { %988 = vst.msk [vmem:[#allocation2 + $0x408] sm:$0x3] %vm859_vm2, %v7106_v28  ;;  %990 = vst.msk [vmem:[#allocation2 + $0x418] sm:$0x3] %vm859_vm2, %v7106_v28 }
  0x41   :  { %989 = vst.msk [vmem:[#allocation2 + $0x410] sm:$0xff] %vm857_vm1, %v7106_v28  ;;  %991 = vst.msk [vmem:[#allocation2 + $0x420] sm:$0xff] %vm857_vm1, %v7106_v28 }
  0x42   :  { %6300 = vmatmul.mubr.msk.bf16.gmra.mrb[28].mxu0 %vm279_vm0, %v6980_v17  ;;  %992 = vst.msk [vmem:[#allocation2 + $0x428] sm:$0x3] %vm859_vm2, %v7106_v28  ;;  %994 = vst.msk [vmem:[#allocation2 + $0x438] sm:$0x3] %vm859_vm2, %v7106_v28 }
  0x43   :  { %6303 = vmatprep.mubr.msk.bf16.mxu0 %vm279_vm0, %v6981_v18  ;;  %993 = vst.msk [vmem:[#allocation2 + $0x430] sm:$0xff] %vm857_vm1, %v7106_v28  ;;  %995 = vst.msk [vmem:[#allocation2 + $0x440] sm:$0xff] %vm857_vm1, %v7106_v28 }
  0x44   :  { %996 = vst.msk [vmem:[#allocation2 + $0x448] sm:$0x3] %vm859_vm2, %v7106_v28  ;;  %1000 = vst.msk [vmem:[#allocation2 + $0x468] sm:$0x3] %vm859_vm2, %v7106_v28 }
  0x45   :  { %999 = vst.msk [vmem:[#allocation2 + $0x460] sm:$0xff] %vm857_vm1, %v7106_v28  ;;  %1001 = vst.msk [vmem:[#allocation2 + $0x470] sm:$0xff] %vm857_vm1, %v7106_v28 }
  0x46   :  { %1002 = vst.msk [vmem:[#allocation2 + $0x478] sm:$0x3] %vm859_vm2, %v7106_v28  ;;  %1004 = vst.msk [vmem:[#allocation2 + $0x488] sm:$0x3] %vm859_vm2, %v7106_v28 }
  0x47   :  { %1003 = vst.msk [vmem:[#allocation2 + $0x480] sm:$0xff] %vm857_vm1, %v7106_v28  ;;  %1005 = vst.msk [vmem:[#allocation2 + $0x490] sm:$0xff] %vm857_vm1, %v7106_v28 }
  0x48   :  { %1006 = vst.msk [vmem:[#allocation2 + $0x498] sm:$0x3] %vm859_vm2, %v7106_v28  ;;  %1008 = vst.msk [vmem:[#allocation2 + $0x4a8] sm:$0x3] %vm859_vm2, %v7106_v28 }
  0x49   :  { %1007 = vst.msk [vmem:[#allocation2 + $0x4a0] sm:$0xff] %vm857_vm1, %v7106_v28  ;;  %1009 = vst.msk [vmem:[#allocation2 + $0x4b0] sm:$0xff] %vm857_vm1, %v7106_v28 }
  0x4a   :  { %6304 = vmatmul.mubr.msk.bf16.gmra.mrb[32].mxu0 %vm279_vm0, %v6982_v19  ;;  %1010 = vst.msk [vmem:[#allocation2 + $0x4b8] sm:$0x3] %vm859_vm2, %v7106_v28  ;;  %1012 = vst.msk [vmem:[#allocation2 + $0x4c8] sm:$0x3] %vm859_vm2, %v7106_v28 }
  0x4b   :  { %6307 = vmatprep.mubr.msk.bf16.mxu0 %vm279_vm0, %v6983_v20  ;;  %1011 = vst.msk [vmem:[#allocation2 + $0x4c0] sm:$0xff] %vm857_vm1, %v7106_v28  ;;  %1013 = vst.msk [vmem:[#allocation2 + $0x4d0] sm:$0xff] %vm857_vm1, %v7106_v28 }
  0x4c   :  { %1014 = vst.msk [vmem:[#allocation2 + $0x4d8] sm:$0x3] %vm859_vm2, %v7106_v28  ;;  %1016 = vst.msk [vmem:[#allocation2 + $0x4e8] sm:$0x3] %vm859_vm2, %v7106_v28 }
  0x4d   :  { %1015 = vst.msk [vmem:[#allocation2 + $0x4e0] sm:$0xff] %vm857_vm1, %v7106_v28 }
  0x52   :  { %6308 = vmatmul.mubr.msk.bf16.gmra.mrb[36].mxu0 %vm279_vm0, %v6984_v21 }
  0x53   :  { %6311 = vmatprep.mubr.msk.bf16.mxu0 %vm279_vm0, %v6985_v22 }
  0x5a   :  { %6312 = vmatmul.mubr.msk.bf16.gmra.mrb[40].mxu0 %vm279_vm0, %v6986_v23 }
  0x5b   :  { %6315 = vmatprep.mubr.msk.bf16.mxu0 %vm279_vm0, %v6987_v24 }
  0x62   :  { %6316 = vmatmul.mubr.msk.bf16.gmra.mrb[44].mxu0 %vm279_vm0, %v6988_v25  ;;  %v7006_v25 = vld [vmem:[%s9290_s3 + $0x8] sm:$0xff]  }
  0x63   :  { %6319 = vmatprep.mubr.msk.bf16.mxu0 %vm279_vm0, %v7257_v26 }
  0x6a   :  { %6320 = vmatmul.mubr.msk.bf16.gmra.mrb[48].mxu0 %vm279_vm0, %v6990_v30 }
  0x6b   :  { %6323 = vmatprep.mubr.msk.bf16.mxu0 %vm279_vm0, %v6991_v31 }
  0x72   :  { %6324 = vmatmul.mubr.msk.bf16.gmra.mrb[52].mxu0 %vm279_vm0, %v6992_v34 }
  0x73   :  { %6327 = vmatprep.mubr.msk.bf16.mxu0 %vm279_vm0, %v6993_v35  ;;  %v7008_v35 = vld [vmem:[%s9290_s3 + $0x10] sm:$0xff]  }
  0x7a   :  { %6328 = vmatmul.mubr.msk.bf16.gmra.mrb[56].mxu0 %vm279_vm0, %v6994_v36 }
  0x7b   :  { %6331 = vmatprep.mubr.msk.bf16.mxu0 %vm279_vm0, %v6997_v38 }
  0x82   :  { %6332 = vmatmul.mubr.msk.bf16.gmra.mrb[60].mxu0 %vm279_vm0, %v6998_v40 }
  0xdd   :  { %v6273_v46 = vpop.f32.mrb[0].mxu0 }
  0xde   :  { %v419_v47 = vadd.f32 %v6273_v46, %v7621_v45  ;;  %v410_v48 = vpop.f32.mrb[1].mxu0 }
  0xdf   :  { %v411_v49 = vadd.f32 %v7621_v45, %v410_v48  ;;  %v6274_v50 = vpop.f32.mrb[2].mxu0 }
  0xe0   :  { %vm667_vm3 = vcmp.gt.f32.partialorder %v419_v47, 0.0  ;;  %v731_v51 = vmul.f32 0.2, %v419_v47  ;;  %v422_v52 = vadd.f32 %v6274_v50, %v7621_v45  ;;  %v413_v53 = vpop.f32.mrb[3].mxu0 }
  0xe1   :  { %vm665_vm4 = vcmp.gt.f32.partialorder %v411_v49, 0.0  ;;  %v729_v54 = vmul.f32 0.2, %v411_v49  ;;  %v414_v55 = vadd.f32 %v7621_v45, %v413_v53 }
  0xe2   :  { %v795_v56 = vsel %vm667_vm3, %v419_v47, %v731_v51  ;;  %vm668_vm5 = vcmp.gt.f32.partialorder %v422_v52, 0.0  ;;  %v732_v57 = vmul.f32 0.2, %v422_v52  ;;  %v7009_v51 = vld [vmem:[%s9290_s3 + $0x18] sm:$0xff]  }
  0xe3   :  { %1022 = vst.msk [vmem:[#allocation2 + $0x31] sm:$0xff] %vm857_vm1, %v795_v56  ;;  %v793_v58 = vsel %vm665_vm4, %v411_v49, %v729_v54  ;;  %vm666_vm6 = vcmp.gt.f32.partialorder %v414_v55, 0.0  ;;  %v730_v59 = vmul.f32 0.2, %v414_v55 }
  0xe4   :  { %1020 = vst.msk [vmem:[#allocation2 + $0x11] sm:$0xff] %vm857_vm1, %v793_v58  ;;  %v796_v60 = vsel %vm668_vm5, %v422_v52, %v732_v57 }
  0xe5   :  { %1023 = vst.msk [vmem:[#allocation2 + $0x41] sm:$0xff] %vm857_vm1, %v796_v60  ;;  %v794_v61 = vsel %vm666_vm6, %v414_v55, %v730_v59  ;;  %v6277_v62 = vpop.f32.mrb[4].mxu0 }
  0xe6   :  { %1021 = vst.msk [vmem:[#allocation2 + $0x21] sm:$0xff] %vm857_vm1, %v794_v61  ;;  %v435_v63 = vadd.f32 %v6277_v62, %v7621_v45  ;;  %v426_v0 = vpop.f32.mrb[5].mxu0  ;;  %v7669_v61 = vld [vmem:[%s9290_s3 + $0x40] sm:$0xff]  }
  0xe7   :  { %v427_v1 = vadd.f32 %v7621_v45, %v426_v0  ;;  %v6278_v2 = vpop.f32.mrb[6].mxu0 }
  0xe8   :  { %vm671_vm7 = vcmp.gt.f32.partialorder %v435_v63, 0.0  ;;  %v735_v3 = vmul.f32 0.2, %v435_v63  ;;  %v438_v4 = vadd.f32 %v6278_v2, %v7621_v45  ;;  %v429_v5 = vpop.f32.mrb[7].mxu0 }
  0xe9   :  { %vm669_vm8 = vcmp.gt.f32.partialorder %v427_v1, 0.0  ;;  %v733_v6 = vmul.f32 0.2, %v427_v1  ;;  %v430_v7 = vadd.f32 %v7621_v45, %v429_v5 }
  0xea   :  { %v799_v8 = vsel %vm671_vm7, %v435_v63, %v735_v3  ;;  %vm672_vm9 = vcmp.gt.f32.partialorder %v438_v4, 0.0  ;;  %v736_v9 = vmul.f32 0.2, %v438_v4  ;;  %v1121_v21 = vld [vmem:[#allocation2 + $0x32] sm:$0xff] }
  0xeb   :  { %1026 = vst.msk [vmem:[#allocation2 + $0x71] sm:$0xff] %vm857_vm1, %v799_v8  ;;  %v797_v10 = vsel %vm669_vm8, %v427_v1, %v733_v6  ;;  %vm670_vm10 = vcmp.gt.f32.partialorder %v430_v7, 0.0  ;;  %v734_v11 = vmul.f32 0.2, %v430_v7  ;;  %v1119_v16 = vld [vmem:[#allocation2 + $0x12] sm:$0xff] }
  0xec   :  { %1024 = vst.msk [vmem:[#allocation2 + $0x51] sm:$0xff] %vm857_vm1, %v797_v10  ;;  %v800_v12 = vsel %vm672_vm9, %v438_v4, %v736_v9  ;;  %v1122_v13 = vld [vmem:[#allocation2 + $0x42] sm:$0xff] }
  0xed   :  { %1027 = vst.msk [vmem:[#allocation2 + $0x81] sm:$0xff] %vm857_vm1, %v800_v12  ;;  %v798_v14 = vsel %vm670_vm10, %v430_v7, %v734_v11  ;;  %v6281_v15 = vpop.f32.mrb[8].mxu0  ;;  %v1120_v17 = vld [vmem:[#allocation2 + $0x22] sm:$0xff]  ;;  %v1136_v24 = vpack.c.bf16 %v1122_v13, %v1121_v21 }
  0xee   :  { %1025 = vst.msk [vmem:[#allocation2 + $0x61] sm:$0xff] %vm857_vm1, %v798_v14  ;;  %v451_v18 = vadd.f32 %v6281_v15, %v7621_v45  ;;  %v442_v19 = vpop.f32.mrb[9].mxu0  ;;  %v1135_v20 = vpack.c.bf16 %v1120_v17, %v1119_v16 }
  0xef   :  { %v443_v22 = vadd.f32 %v7621_v45, %v442_v19  ;;  %v6282_v23 = vpop.f32.mrb[10].mxu0 }
  0xf0   :  { %vm675_vm11 = vcmp.gt.f32.partialorder %v451_v18, 0.0  ;;  %v739_v26 = vmul.f32 0.2, %v451_v18  ;;  %v454_v27 = vadd.f32 %v6282_v23, %v7621_v45  ;;  %v445_v28 = vpop.f32.mrb[11].mxu0  ;;  %6343 = vmatprep.mubr.msk.bf16.mxu0 %vm857_vm1, %v1135_v20 }
  0xf1   :  { %vm673_vm12 = vcmp.gt.f32.partialorder %v443_v22, 0.0  ;;  %v737_v29 = vmul.f32 0.2, %v443_v22  ;;  %v446_v30 = vadd.f32 %v7621_v45, %v445_v28  ;;  %6344 = vmatmul.mubr.msk.bf16.vlgmr.msra.gmra.mrb[64].mxu0 %vm857_vm1, %v1136_v24  ;;  %v7010_v24 = vld [vmem:[%s9290_s3 + $0xe8] sm:$0xff]  }
  0xf2   :  { %v803_v31 = vsel %vm675_vm11, %v451_v18, %v739_v26  ;;  %vm676_vm13 = vcmp.gt.f32.partialorder %v454_v27, 0.0  ;;  %v740_v32 = vmul.f32 0.2, %v454_v27  ;;  %6360 = vmatpush3.bf16.msra.mxu0 %v7609_v43  ;;  %v1125_v47 = vld [vmem:[#allocation2 + $0x72] sm:$0xff] }
  0xf3   :  { %1039 = vst.msk [vmem:[#allocation2 + $0x171] sm:$0xff] %vm857_vm1, %v803_v31  ;;  %v801_v33 = vsel %vm673_vm12, %v443_v22, %v737_v29  ;;  %vm674_vm14 = vcmp.gt.f32.partialorder %v446_v30, 0.0  ;;  %v738_v34 = vmul.f32 0.2, %v446_v30  ;;  %6361 = vmatprep.subr.bf16.mxu0 %v7006_v25  ;;  %v1123_v40 = vld [vmem:[#allocation2 + $0x52] sm:$0xff] }
  0xf4   :  { %1037 = vst.msk [vmem:[#allocation2 + $0x151] sm:$0xff] %vm857_vm1, %v801_v33  ;;  %v804_v36 = vsel %vm676_vm13, %v454_v27, %v740_v32  ;;  %v1126_v37 = vld [vmem:[#allocation2 + $0x82] sm:$0xff] }
  0xf5   :  { %1040 = vst.msk [vmem:[#allocation2 + $0x181] sm:$0xff] %vm857_vm1, %v804_v36  ;;  %v802_v38 = vsel %vm674_vm14, %v446_v30, %v738_v34  ;;  %v6285_v39 = vpop.f32.mrb[12].mxu0  ;;  %v1124_v41 = vld [vmem:[#allocation2 + $0x62] sm:$0xff]  ;;  %v1138_v50 = vpack.c.bf16 %v1126_v37, %v1125_v47 }
  0xf6   :  { %1038 = vst.msk [vmem:[#allocation2 + $0x161] sm:$0xff] %vm857_vm1, %v802_v38  ;;  %v467_v42 = vadd.f32 %v6285_v39, %v7621_v45  ;;  %v458_v43 = vpop.f32.mrb[13].mxu0  ;;  %v1137_v46 = vpack.c.bf16 %v1124_v41, %v1123_v40  ;;  %6362 = vmatpush3.bf16.msra.mxu0 %v7006_v25 }
  0xf7   :  { %v459_v48 = vadd.f32 %v7621_v45, %v458_v43  ;;  %v6286_v49 = vpop.f32.mrb[14].mxu0  ;;  %6363 = vmatprep.subr.bf16.mxu0 %v7008_v35  ;;  %v7011_v43 = vld [vmem:[%s9290_s3 + $0xf0] sm:$0xff]  }
  0xf8   :  { %vm679_vm15 = vcmp.gt.f32.partialorder %v467_v42, 0.0  ;;  %v743_v52 = vmul.f32 0.2, %v467_v42  ;;  %v470_v53 = vadd.f32 %v6286_v49, %v7621_v45  ;;  %v461_v54 = vpop.f32.mrb[15].mxu0  ;;  %6347 = vmatprep.mubr.msk.bf16.mxu0 %vm857_vm1, %v1137_v46 }
  0xf9   :  { %vm677_vm0 = vcmp.gt.f32.partialorder %v459_v48, 0.0  ;;  %v741_v55 = vmul.f32 0.2, %v459_v48  ;;  %v462_v56 = vadd.f32 %v7621_v45, %v461_v54  ;;  %6348 = vmatmul.mubr.msk.bf16.gmra.mrb[68].mxu0 %vm857_vm1, %v1138_v50 }
  0xfa   :  { %v807_v57 = vsel %vm679_vm15, %v467_v42, %v743_v52  ;;  %vm680_vm2 = vcmp.gt.f32.partialorder %v470_v53, 0.0  ;;  %v744_v58 = vmul.f32 0.2, %v470_v53  ;;  %6364 = vmatpush3.bf16.msra.mxu0 %v7008_v35  ;;  %v7672_v63 = vld [vmem:[#allocation2 + $0x171] sm:$0xff] }
  0xfb   :  { %1043 = vst.msk [vmem:[#allocation2 + $0x1b1] sm:$0xff] %vm857_vm1, %v807_v57  ;;  %v805_v59 = vsel %vm677_vm0, %v459_v48, %v741_v55  ;;  %vm678_vm3 = vcmp.gt.f32.partialorder %v462_v56, 0.0  ;;  %v742_v60 = vmul.f32 0.2, %v462_v56  ;;  %6365 = vmatprep.subr.bf16.mxu0 %v7009_v51  ;;  %v2216_v4 = vld [vmem:[#allocation2 + $0x170] sm:$0xff]  ;;  %v7012_v55 = vld [vmem:[%s9290_s3 + $0xf8] sm:$0xff]  }
  0xfc   :  { %1041 = vst.msk [vmem:[#allocation2 + $0x191] sm:$0xff] %vm857_vm1, %v805_v59  ;;  %v808_v62 = vsel %vm680_vm2, %v470_v53, %v744_v58  ;;  %v7674_v0 = vld [vmem:[#allocation2 + $0x181] sm:$0xff]  ;;  %v2222_v48 = vld [vmem:[#allocation2 + $0x1d0] sm:$0xff] }
  0xfd   :  { %1044 = vst.msk [vmem:[#allocation2 + $0x1c1] sm:$0xff] %vm857_vm1, %v808_v62  ;;  %v806_v1 = vsel %vm678_vm3, %v462_v56, %v742_v60  ;;  %v6289_v2 = vpop.f32.mrb[16].mxu0  ;;  %v2215_v3 = vld [vmem:[#allocation2 + $0x160] sm:$0xff]  ;;  %v2038_v5 = vpack.c.bf16 %v7674_v0, %v7672_v63 }
  0xfe   :  { %1042 = vst.msk [vmem:[#allocation2 + $0x1a1] sm:$0xff] %vm857_vm1, %v806_v1  ;;  %v483_v6 = vadd.f32 %v6289_v2, %v7621_v45  ;;  %v474_v7 = vpop.f32.mrb[17].mxu0  ;;  %v2231_v8 = vpack.c.bf16 %v2216_v4, %v2215_v3  ;;  %6366 = vmatpush3.bf16.msra.mxu0 %v7009_v51  ;;  %v2217_v20 = vld [vmem:[#allocation2 + $0x180] sm:$0xff] }
  0xff   :  { %v475_v9 = vadd.f32 %v7621_v45, %v474_v7  ;;  %v6290_v10 = vpop.f32.mrb[18].mxu0  ;;  %6383 = vmatprep.subr.bf16.mxu0 %v7669_v61  ;;  %v7729_v4 = vld [vmem:[%s9290_s3 + $0x100] sm:$0xff]  }
 0x100   :  { %vm683_vm4 = vcmp.gt.f32.partialorder %v483_v6, 0.0  ;;  %v747_v11 = vmul.f32 0.2, %v483_v6  ;;  %v486_v12 = vadd.f32 %v6290_v10, %v7621_v45  ;;  %v477_v13 = vpop.f32.mrb[19].mxu0  ;;  %6487 = vmatprep.mubr.msk.bf16.mxu1 %vm857_vm1, %v2231_v8 }
 0x101   :  { %vm681_vm5 = vcmp.gt.f32.partialorder %v475_v9, 0.0  ;;  %v745_v14 = vmul.f32 0.2, %v475_v9  ;;  %v478_v15 = vadd.f32 %v7621_v45, %v477_v13 }
 0x102   :  { %v811_v16 = vsel %vm683_vm4, %v483_v6, %v747_v11  ;;  %vm684_vm6 = vcmp.gt.f32.partialorder %v486_v12, 0.0  ;;  %v748_v17 = vmul.f32 0.2, %v486_v12  ;;  %v7691_v25 = vld [vmem:[#allocation2 + $0x1b1] sm:$0xff] }
 0x103   :  { %1056 = vst.msk [vmem:[#allocation2 + $0x2b1] sm:$0xff] %vm857_vm1, %v811_v16  ;;  %v809_v18 = vsel %vm681_vm5, %v475_v9, %v745_v14  ;;  %vm682_vm7 = vcmp.gt.f32.partialorder %v478_v15, 0.0  ;;  %v746_v19 = vmul.f32 0.2, %v478_v15  ;;  %v2218_v21 = vld [vmem:[#allocation2 + $0x190] sm:$0xff] }
 0x104   :  { %1054 = vst.msk [vmem:[#allocation2 + $0x291] sm:$0xff] %vm857_vm1, %v809_v18  ;;  %v812_v22 = vsel %vm684_vm6, %v486_v12, %v748_v17  ;;  %v2232_v23 = vpack.c.bf16 %v2218_v21, %v2217_v20  ;;  %v7693_v26 = vld [vmem:[#allocation2 + $0x1c1] sm:$0xff]  ;;  %v2220_v30 = vld [vmem:[#allocation2 + $0x1b0] sm:$0xff] }
 0x105   :  { %1057 = vst.msk [vmem:[#allocation2 + $0x2c1] sm:$0xff] %vm857_vm1, %v812_v22  ;;  %v810_v27 = vsel %vm682_vm7, %v478_v15, %v746_v19  ;;  %v6293_v28 = vpop.f32.mrb[20].mxu0  ;;  %v2219_v29 = vld [vmem:[#allocation2 + $0x1a0] sm:$0xff]  ;;  %v7703_v36 = vld [vmem:[#allocation2 + $0x191] sm:$0xff] }
 0x106   :  { %v7696_v31 = vld [vmem:[#allocation2 + $0x1a1] sm:$0xff]  ;;  %1055 = vst.msk [vmem:[#allocation2 + $0x2a1] sm:$0xff] %vm857_vm1, %v810_v27  ;;  %v499_v33 = vadd.f32 %v6293_v28, %v7621_v45  ;;  %v490_v34 = vpop.f32.mrb[21].mxu0  ;;  %6488 = vmatmul.mubr.msk.bf16.vlgmr.msra.gmra.mrb[0].mxu1 %vm857_vm1, %v2232_v23  ;;  %v2233_v35 = vpack.c.bf16 %v2220_v30, %v2219_v29 }
 0x107   :  { %v491_v37 = vadd.f32 %v7621_v45, %v490_v34  ;;  %v6294_v38 = vpop.f32.mrb[22].mxu0  ;;  %6504 = vmatpush3.bf16.msra.mxu1 %v7615_v44  ;;  %v2221_v44 = vld [vmem:[#allocation2 + $0x1c0] sm:$0xff] }
 0x108   :  { %vm687_vm8 = vcmp.gt.f32.partialorder %v499_v33, 0.0  ;;  %v751_v40 = vmul.f32 0.2, %v499_v33  ;;  %v502_v41 = vadd.f32 %v6294_v38, %v7621_v45  ;;  %v493_v42 = vpop.f32.mrb[23].mxu0  ;;  %6491 = vmatprep.mubr.msk.bf16.mxu1 %vm857_vm1, %v2233_v35  ;;  %6505 = vmatprep.subr.bf16.mxu1 %v7010_v24  ;;  %v2234_v54 = vpack.c.bf16 %v2222_v48, %v2221_v44 }
 0x109   :  { %vm685_vm9 = vcmp.gt.f32.partialorder %v491_v37, 0.0  ;;  %v749_v46 = vmul.f32 0.2, %v491_v37  ;;  %v494_v47 = vadd.f32 %v7621_v45, %v493_v42 }
 0x10a   :  { %v815_v49 = vsel %vm687_vm8, %v499_v33, %v751_v40  ;;  %vm688_vm10 = vcmp.gt.f32.partialorder %v502_v41, 0.0  ;;  %v752_v50 = vmul.f32 0.2, %v502_v41 }
 0x10b   :  { %1060 = vst.msk [vmem:[#allocation2 + $0x2f1] sm:$0xff] %vm857_vm1, %v815_v49  ;;  %v813_v51 = vsel %vm685_vm9, %v491_v37, %v749_v46  ;;  %vm686_vm11 = vcmp.gt.f32.partialorder %v494_v47, 0.0  ;;  %v750_v52 = vmul.f32 0.2, %v494_v47  ;;  %6506 = vmatpush3.bf16.msra.mxu1 %v7010_v24 }
 0x10c   :  { %1058 = vst.msk [vmem:[#allocation2 + $0x2d1] sm:$0xff] %vm857_vm1, %v813_v51  ;;  %v816_v53 = vsel %vm688_vm10, %v502_v41, %v752_v50  ;;  %6507 = vmatprep.subr.bf16.mxu1 %v7011_v43 }
 0x10d   :  { %1061 = vst.msk [vmem:[#allocation2 + $0x301] sm:$0xff] %vm857_vm1, %v816_v53  ;;  %v814_v56 = vsel %vm686_vm11, %v494_v47, %v750_v52  ;;  %v6297_v57 = vpop.f32.mrb[24].mxu0 }
 0x10e   :  { %1059 = vst.msk [vmem:[#allocation2 + $0x2e1] sm:$0xff] %vm857_vm1, %v814_v56  ;;  %v515_v58 = vadd.f32 %v6297_v57, %v7621_v45  ;;  %v506_v59 = vpop.f32.mrb[25].mxu0  ;;  %6492 = vmatmul.mubr.msk.bf16.gmra.mrb[4].mxu1 %vm857_vm1, %v2234_v54 }
 0x10f   :  { %v507_v60 = vadd.f32 %v7621_v45, %v506_v59  ;;  %v6298_v62 = vpop.f32.mrb[26].mxu0  ;;  %6508 = vmatpush3.bf16.msra.mxu1 %v7011_v43 }
 0x110   :  { %vm691_vm12 = vcmp.gt.f32.partialorder %v515_v58, 0.0  ;;  %v755_v1 = vmul.f32 0.2, %v515_v58  ;;  %v518_v2 = vadd.f32 %v6298_v62, %v7621_v45  ;;  %v509_v3 = vpop.f32.mrb[27].mxu0  ;;  %6509 = vmatprep.subr.bf16.mxu1 %v7012_v55 }
 0x111   :  { %vm689_vm13 = vcmp.gt.f32.partialorder %v507_v60, 0.0  ;;  %v753_v6 = vmul.f32 0.2, %v507_v60  ;;  %v510_v7 = vadd.f32 %v7621_v45, %v509_v3 }
 0x112   :  { %v819_v8 = vsel %vm691_vm12, %v515_v58, %v755_v1  ;;  %vm692_vm14 = vcmp.gt.f32.partialorder %v518_v2, 0.0  ;;  %v756_v9 = vmul.f32 0.2, %v518_v2 }
 0x113   :  { %1073 = vst.msk [vmem:[#allocation2 + $0x3f1] sm:$0xff] %vm857_vm1, %v819_v8  ;;  %v817_v10 = vsel %vm689_vm13, %v507_v60, %v753_v6  ;;  %vm690_vm15 = vcmp.gt.f32.partialorder %v510_v7, 0.0  ;;  %v754_v11 = vmul.f32 0.2, %v510_v7  ;;  %6510 = vmatpush3.bf16.msra.mxu1 %v7012_v55 }
 0x114   :  { %1071 = vst.msk [vmem:[#allocation2 + $0x3d1] sm:$0xff] %vm857_vm1, %v817_v10  ;;  %v820_v12 = vsel %vm692_vm14, %v518_v2, %v756_v9  ;;  %6527 = vmatprep.subr.bf16.mxu1 %v7729_v4 }
 0x115   :  { %1074 = vst.msk [vmem:[#allocation2 + $0x401] sm:$0xff] %vm857_vm1, %v820_v12  ;;  %v818_v13 = vsel %vm690_vm15, %v510_v7, %v754_v11  ;;  %v6301_v14 = vpop.f32.mrb[28].mxu0 }
 0x116   :  { %1072 = vst.msk [vmem:[#allocation2 + $0x3e1] sm:$0xff] %vm857_vm1, %v818_v13  ;;  %v531_v15 = vadd.f32 %v6301_v14, %v7621_v45  ;;  %v522_v16 = vpop.f32.mrb[29].mxu0 }
 0x117   :  { %v523_v17 = vadd.f32 %v7621_v45, %v522_v16  ;;  %v6302_v18 = vpop.f32.mrb[30].mxu0 }
 0x118   :  { %vm695_vm0 = vcmp.gt.f32.partialorder %v531_v15, 0.0  ;;  %v759_v19 = vmul.f32 0.2, %v531_v15  ;;  %v534_v20 = vadd.f32 %v6302_v18, %v7621_v45  ;;  %v525_v21 = vpop.f32.mrb[31].mxu0 }
 0x119   :  { %vm693_vm2 = vcmp.gt.f32.partialorder %v523_v17, 0.0  ;;  %v757_v22 = vmul.f32 0.2, %v523_v17  ;;  %v526_v23 = vadd.f32 %v7621_v45, %v525_v21 }
 0x11a   :  { %v823_v24 = vsel %vm695_vm0, %v531_v15, %v759_v19  ;;  %vm696_vm3 = vcmp.gt.f32.partialorder %v534_v20, 0.0  ;;  %v760_v27 = vmul.f32 0.2, %v534_v20 }
 0x11b   :  { %1077 = vst.msk [vmem:[#allocation2 + $0x431] sm:$0xff] %vm857_vm1, %v823_v24  ;;  %v821_v28 = vsel %vm693_vm2, %v523_v17, %v757_v22  ;;  %vm694_vm4 = vcmp.gt.f32.partialorder %v526_v23, 0.0  ;;  %v758_v29 = vmul.f32 0.2, %v526_v23 }
 0x11c   :  { %1075 = vst.msk [vmem:[#allocation2 + $0x411] sm:$0xff] %vm857_vm1, %v821_v28  ;;  %v824_v30 = vsel %vm696_vm3, %v534_v20, %v760_v27 }
 0x11d   :  { %1078 = vst.msk [vmem:[#allocation2 + $0x441] sm:$0xff] %vm857_vm1, %v824_v30  ;;  %v822_v33 = vsel %vm694_vm4, %v526_v23, %v758_v29  ;;  %v6305_v34 = vpop.f32.mrb[32].mxu0 }
 0x11e   :  { %1076 = vst.msk [vmem:[#allocation2 + $0x421] sm:$0xff] %vm857_vm1, %v822_v33  ;;  %v547_v35 = vadd.f32 %v6305_v34, %v7621_v45  ;;  %v538_v37 = vpop.f32.mrb[33].mxu0 }
 0x11f   :  { %v539_v38 = vadd.f32 %v7621_v45, %v538_v37  ;;  %v6306_v40 = vpop.f32.mrb[34].mxu0 }
 0x120   :  { %vm699_vm5 = vcmp.gt.f32.partialorder %v547_v35, 0.0  ;;  %v763_v41 = vmul.f32 0.2, %v547_v35  ;;  %v550_v42 = vadd.f32 %v6306_v40, %v7621_v45  ;;  %v541_v43 = vpop.f32.mrb[35].mxu0 }
 0x121   :  { %vm697_vm6 = vcmp.gt.f32.partialorder %v539_v38, 0.0  ;;  %v761_v46 = vmul.f32 0.2, %v539_v38  ;;  %v542_v47 = vadd.f32 %v7621_v45, %v541_v43 }
 0x122   :  { %v827_v44 = vsel %vm699_vm5, %v547_v35, %v763_v41  ;;  %vm700_vm7 = vcmp.gt.f32.partialorder %v550_v42, 0.0  ;;  %v764_v48 = vmul.f32 0.2, %v550_v42 }
 0x123   :  { %1030 = vst.msk [vmem:[#allocation2 + $0xd1] sm:$0xff] %vm857_vm1, %v827_v44  ;;  %v825_v49 = vsel %vm697_vm6, %v539_v38, %v761_v46  ;;  %vm698_vm8 = vcmp.gt.f32.partialorder %v542_v47, 0.0  ;;  %v762_v50 = vmul.f32 0.2, %v542_v47  ;;  %v7789_v46 = vld [vmem:[#allocation2 + $0x21] sm:$0xff] }
 0x124   :  { %1028 = vst.msk [vmem:[#allocation2 + $0xb1] sm:$0xff] %vm857_vm1, %v825_v49  ;;  %v828_v51 = vsel %vm700_vm7, %v550_v42, %v764_v48 }
 0x125   :  { %1031 = vst.msk [vmem:[#allocation2 + $0xe1] sm:$0xff] %vm857_vm1, %v828_v51  ;;  %v826_v52 = vsel %vm698_vm8, %v542_v47, %v762_v50  ;;  %v6309_v53 = vpop.f32.mrb[36].mxu0 }
 0x126   :  { %1029 = vst.msk [vmem:[#allocation2 + $0xc1] sm:$0xff] %vm857_vm1, %v826_v52  ;;  %v563_v54 = vadd.f32 %v6309_v53, %v7621_v45  ;;  %v554_v55 = vpop.f32.mrb[37].mxu0  ;;  %v1087_v53 = vld [vmem:[#allocation2 + $0x11] sm:$0xff] }
 0x127   :  { %v555_v56 = vadd.f32 %v7621_v45, %v554_v55  ;;  %v6310_v57 = vpop.f32.mrb[38].mxu0 }
 0x128   :  { %vm703_vm9 = vcmp.gt.f32.partialorder %v563_v54, 0.0  ;;  %v767_v58 = vmul.f32 0.2, %v563_v54  ;;  %v566_v59 = vadd.f32 %v6310_v57, %v7621_v45  ;;  %v557_v60 = vpop.f32.mrb[39].mxu0 }
 0x129   :  { %vm701_vm10 = vcmp.gt.f32.partialorder %v555_v56, 0.0  ;;  %v765_v62 = vmul.f32 0.2, %v555_v56  ;;  %v558_v1 = vadd.f32 %v7621_v45, %v557_v60 }
 0x12a   :  { %v831_v2 = vsel %vm703_vm9, %v563_v54, %v767_v58  ;;  %vm704_vm11 = vcmp.gt.f32.partialorder %v566_v59, 0.0  ;;  %v768_v3 = vmul.f32 0.2, %v566_v59  ;;  %v7767_v17 = vld [vmem:[#allocation2 + $0xd2] sm:$0xff]  ;;  %v1103_v58 = vpack.c.bf16 %v7789_v46, %v1087_v53 }
 0x12b   :  { %1034 = vst.msk [vmem:[#allocation2 + $0x111] sm:$0xff] %vm857_vm1, %v831_v2  ;;  %v829_v6 = vsel %vm701_vm10, %v555_v56, %v765_v62  ;;  %vm702_vm12 = vcmp.gt.f32.partialorder %v558_v1, 0.0  ;;  %v766_v7 = vmul.f32 0.2, %v558_v1  ;;  %v1127_v12 = vld [vmem:[#allocation2 + $0xb2] sm:$0xff] }
 0x12c   :  { %1032 = vst.msk [vmem:[#allocation2 + $0xf1] sm:$0xff] %vm857_vm1, %v829_v6  ;;  %v832_v8 = vsel %vm704_vm11, %v566_v59, %v768_v3  ;;  %v7759_v9 = vld [vmem:[#allocation2 + $0xe2] sm:$0xff] }
 0x12d   :  { %1035 = vst.msk [vmem:[#allocation2 + $0x121] sm:$0xff] %vm857_vm1, %v832_v8  ;;  %v830_v10 = vsel %vm702_vm12, %v558_v1, %v766_v7  ;;  %v6313_v11 = vpop.f32.mrb[40].mxu0  ;;  %v7762_v13 = vld [vmem:[#allocation2 + $0xc2] sm:$0xff]  ;;  %v1140_v20 = vpack.c.bf16 %v7759_v9, %v7767_v17 }
 0x12e   :  { %1033 = vst.msk [vmem:[#allocation2 + $0x101] sm:$0xff] %vm857_vm1, %v830_v10  ;;  %v579_v14 = vadd.f32 %v6313_v11, %v7621_v45  ;;  %v570_v15 = vpop.f32.mrb[41].mxu0  ;;  %v1139_v16 = vpack.c.bf16 %v7762_v13, %v1127_v12  ;;  %v1655_v21 = vpack.c.bf16 %v7767_v17, %v7762_v13  ;;  %v7811_v7 = vld [vmem:[#allocation2 + $0x41] sm:$0xff]  ;;  %v8134_v17 = vld [vmem:[#allocation2 + $0x2d2] sm:$0xff] }
 0x12f   :  { %v571_v18 = vadd.f32 %v7621_v45, %v570_v15  ;;  %v6314_v19 = vpop.f32.mrb[42].mxu0  ;;  %v8128_v13 = vld [vmem:[#allocation2 + $0x2a2] sm:$0xff] }
 0x130   :  { %vm707_vm13 = vcmp.gt.f32.partialorder %v579_v14, 0.0  ;;  %v771_v22 = vmul.f32 0.2, %v579_v14  ;;  %v582_v23 = vadd.f32 %v6314_v19, %v7621_v45  ;;  %v573_v24 = vpop.f32.mrb[43].mxu0  ;;  %6351 = vmatprep.mubr.msk.bf16.mxu0 %vm857_vm1, %v1139_v16  ;;  %v7823_v16 = vld [vmem:[#allocation2 + $0x61] sm:$0xff] }
 0x131   :  { %vm705_vm14 = vcmp.gt.f32.partialorder %v571_v18, 0.0  ;;  %v769_v27 = vmul.f32 0.2, %v571_v18  ;;  %v574_v28 = vadd.f32 %v7621_v45, %v573_v24  ;;  %6352 = vmatmul.mubr.msk.bf16.gmra.mrb[72].mxu0 %vm857_vm1, %v1140_v20 }
 0x132   :  { %v835_v29 = vsel %vm707_vm13, %v579_v14, %v771_v22  ;;  %vm708_vm15 = vcmp.gt.f32.partialorder %v582_v23, 0.0  ;;  %v772_v30 = vmul.f32 0.2, %v582_v23  ;;  %v7795_v49 = vld [vmem:[#allocation2 + $0x112] sm:$0xff] }
 0x133   :  { %1047 = vst.msk [vmem:[#allocation2 + $0x211] sm:$0xff] %vm857_vm1, %v835_v29  ;;  %v833_v33 = vsel %vm705_vm14, %v571_v18, %v769_v27  ;;  %vm706_vm0 = vcmp.gt.f32.partialorder %v574_v28, 0.0  ;;  %v770_v34 = vmul.f32 0.2, %v574_v28  ;;  %v7779_v35 = vld [vmem:[#allocation2 + $0xf2] sm:$0xff] }
 0x134   :  { %1045 = vst.msk [vmem:[#allocation2 + $0x1f1] sm:$0xff] %vm857_vm1, %v833_v33  ;;  %v836_v37 = vsel %vm708_vm15, %v582_v23, %v772_v30  ;;  %v7782_v38 = vld [vmem:[#allocation2 + $0x122] sm:$0xff]  ;;  %v1656_v40 = vpack.c.bf16 %v7779_v35, %v7759_v9  ;;  %v7832_v23 = vld [vmem:[#allocation2 + $0x31] sm:$0xff] }
 0x135   :  { %1048 = vst.msk [vmem:[#allocation2 + $0x221] sm:$0xff] %vm857_vm1, %v836_v37  ;;  %v834_v41 = vsel %vm706_vm0, %v574_v28, %v770_v34  ;;  %v6317_v42 = vpop.f32.mrb[44].mxu0  ;;  %v7787_v43 = vld [vmem:[#allocation2 + $0x102] sm:$0xff]  ;;  %v1142_v52 = vpack.c.bf16 %v7782_v38, %v7795_v49  ;;  %v1104_v28 = vpack.c.bf16 %v7811_v7, %v7832_v23  ;;  %v7837_v29 = vld [vmem:[#allocation2 + $0x51] sm:$0xff] }
 0x136   :  { %1046 = vst.msk [vmem:[#allocation2 + $0x201] sm:$0xff] %vm857_vm1, %v834_v41  ;;  %v595_v47 = vadd.f32 %v6317_v42, %v7621_v45  ;;  %v586_v44 = vpop.f32.mrb[45].mxu0  ;;  %v1141_v48 = vpack.c.bf16 %v7787_v43, %v7779_v35  ;;  %v1657_v54 = vpack.c.bf16 %v7795_v49, %v7787_v43  ;;  %v7014_v30 = vld [vmem:[%s9290_s3 + $0x48] sm:$0xff]   ;;  %v1105_v37 = vpack.c.bf16 %v7823_v16, %v7837_v29  ;;  %v1828_v49 = vld [vmem:[#allocation2 + $0x150] sm:$0xff] }
 0x137   :  { %v587_v50 = vadd.f32 %v7621_v45, %v586_v44  ;;  %v6318_v51 = vpop.f32.mrb[46].mxu0  ;;  %v7034_v9 = vld [vmem:[%s9290_s3 + $0x148] sm:$0xff]  }
 0x138   :  { %vm711_vm2 = vcmp.gt.f32.partialorder %v595_v47, 0.0  ;;  %v775_v55 = vmul.f32 0.2, %v595_v47  ;;  %v598_v56 = vadd.f32 %v6318_v51, %v7621_v45  ;;  %v589_v57 = vpop.f32.mrb[47].mxu0  ;;  %6355 = vmatprep.mubr.msk.bf16.mxu0 %vm857_vm1, %v1141_v48 }
 0x139   :  { %vm709_vm3 = vcmp.gt.f32.partialorder %v587_v50, 0.0  ;;  %v773_v59 = vmul.f32 0.2, %v587_v50  ;;  %v590_v60 = vadd.f32 %v7621_v45, %v589_v57  ;;  %6356 = vmatmul.mubr.msk.bf16.gmra.mrb[76].mxu0 %vm857_vm1, %v1142_v52 }
 0x13a   :  { %v839_v62 = vsel %vm711_vm2, %v595_v47, %v775_v55  ;;  %vm712_vm4 = vcmp.gt.f32.partialorder %v598_v56, 0.0  ;;  %v776_v1 = vmul.f32 0.2, %v598_v56  ;;  %6367 = vmatprep.mubr.msk.bf16.mxu0 %vm857_vm1, %v1103_v58  ;;  %v7809_v6 = vld [vmem:[#allocation2 + $0x210] sm:$0xff] }
 0x13b   :  { %1051 = vst.msk [vmem:[#allocation2 + $0x251] sm:$0xff] %vm857_vm1, %v839_v62  ;;  %v837_v2 = vsel %vm709_vm3, %v587_v50, %v773_v59  ;;  %vm710_vm5 = vcmp.gt.f32.partialorder %v590_v60, 0.0  ;;  %v774_v3 = vmul.f32 0.2, %v590_v60  ;;  %v7816_v11 = vld [vmem:[#allocation2 + $0x211] sm:$0xff] }
 0x13c   :  { %1049 = vst.msk [vmem:[#allocation2 + $0x231] sm:$0xff] %vm857_vm1, %v837_v2  ;;  %v840_v8 = vsel %vm712_vm4, %v598_v56, %v776_v1  ;;  %v7814_v10 = vld [vmem:[#allocation2 + $0x220] sm:$0xff]  ;;  %v7016_v50 = vld [vmem:[%s9290_s3 + $0x50] sm:$0xff]  }
 0x13d   :  { %v7818_v12 = vld [vmem:[#allocation2 + $0x221] sm:$0xff]  ;;  %1052 = vst.msk [vmem:[#allocation2 + $0x261] sm:$0xff] %vm857_vm1, %v840_v8  ;;  %v838_v14 = vsel %vm710_vm5, %v590_v60, %v774_v3  ;;  %v6321_v18 = vpop.f32.mrb[48].mxu0  ;;  %v1849_v19 = vpack.c.bf16 %v7814_v10, %v7809_v6  ;;  %v7856_v55 = vld [vmem:[#allocation2 + $0x71] sm:$0xff] }
 0x13e   :  { %v7821_v15 = vld [vmem:[#allocation2 + $0x200] sm:$0xff]  ;;  %1050 = vst.msk [vmem:[#allocation2 + $0x241] sm:$0xff] %vm857_vm1, %v838_v14  ;;  %v611_v24 = vadd.f32 %v6321_v18, %v7621_v45  ;;  %v602_v27 = vpop.f32.mrb[49].mxu0 }
 0x13f   :  { %v2235_v22 = vpack.c.bf16 %v7809_v6, %v7821_v15  ;;  %v603_v33 = vadd.f32 %v7621_v45, %v602_v27  ;;  %v6322_v34 = vpop.f32.mrb[50].mxu0  ;;  %v7858_v56 = vld [vmem:[#allocation2 + $0x81] sm:$0xff]  ;;  %v2021_v6 = vld [vmem:[#allocation2 + $0x151] sm:$0xff] }
 0x140   :  { %vm715_vm6 = vcmp.gt.f32.partialorder %v611_v24, 0.0  ;;  %v779_v41 = vmul.f32 0.2, %v611_v24  ;;  %v614_v42 = vadd.f32 %v6322_v34, %v7621_v45  ;;  %v605_v47 = vpop.f32.mrb[51].mxu0  ;;  %v7872_v3 = vld [vmem:[#allocation2 + $0xc1] sm:$0xff]  ;;  %v1106_v27 = vpack.c.bf16 %v7858_v56, %v7856_v55 }
 0x141   :  { %6495 = vmatprep.mubr.msk.bf16.mxu1 %vm857_vm1, %v2235_v22  ;;  %6368 = vmatmul.mubr.msk.bf16.vlgmr.msra.gmra.mrb[64].mxu0 %vm857_vm1, %v1104_v28  ;;  %vm713_vm7 = vcmp.gt.f32.partialorder %v603_v33, 0.0  ;;  %v777_v44 = vmul.f32 0.2, %v603_v33  ;;  %v606_v48 = vadd.f32 %v7621_v45, %v605_v47 }
 0x142   :  { %6371 = vmatprep.mubr.msk.bf16.mxu0 %vm857_vm1, %v1105_v37  ;;  %6384 = vmatpush3.bf16.msra.mxu0 %v7669_v61  ;;  %v843_v51 = vsel %vm715_vm6, %v611_v24, %v779_v41  ;;  %vm716_vm8 = vcmp.gt.f32.partialorder %v614_v42, 0.0  ;;  %v780_v52 = vmul.f32 0.2, %v614_v42  ;;  %v7863_v59 = vld [vmem:[#allocation2 + $0x250] sm:$0xff] }
 0x143   :  { %v7854_v53 = vld [vmem:[#allocation2 + $0x230] sm:$0xff]  ;;  %6385 = vmatprep.subr.bf16.mxu0 %v7014_v30  ;;  %1064 = vst.msk [vmem:[#allocation2 + $0x351] sm:$0xff] %vm857_vm1, %v843_v51  ;;  %v841_v57 = vsel %vm713_vm7, %v603_v33, %v777_v44  ;;  %vm714_vm9 = vcmp.gt.f32.partialorder %v606_v48, 0.0  ;;  %v778_v58 = vmul.f32 0.2, %v606_v48 }
 0x144   :  { %v2236_v61 = vpack.c.bf16 %v7854_v53, %v7814_v10  ;;  %v7865_v60 = vld [vmem:[#allocation2 + $0x260] sm:$0xff]  ;;  %1062 = vst.msk [vmem:[#allocation2 + $0x331] sm:$0xff] %vm857_vm1, %v841_v57  ;;  %v844_v62 = vsel %vm716_vm8, %v614_v42, %v780_v52  ;;  %v7884_v28 = vld [vmem:[#allocation2 + $0x231] sm:$0xff]  ;;  %vm4351_vm8 = vcmask 1044480  }
 0x145   :  { %v7868_v1 = vld [vmem:[#allocation2 + $0x261] sm:$0xff]  ;;  %1065 = vst.msk [vmem:[#allocation2 + $0x361] sm:$0xff] %vm857_vm1, %v844_v62  ;;  %v842_v14 = vsel %vm714_vm9, %v606_v48, %v778_v58  ;;  %v6325_v18 = vpop.f32.mrb[52].mxu0  ;;  %v1851_v22 = vpack.c.bf16 %v7865_v60, %v7863_v59  ;;  %v7886_v33 = vld [vmem:[#allocation2 + $0x251] sm:$0xff] }
 0x146   :  { %v7870_v2 = vld [vmem:[#allocation2 + $0x240] sm:$0xff]  ;;  %6496 = vmatmul.mubr.msk.bf16.gmra.mrb[8].mxu1 %vm857_vm1, %v2236_v61  ;;  %6386 = vmatpush3.bf16.msra.mxu0 %v7014_v30  ;;  %1063 = vst.msk [vmem:[#allocation2 + $0x341] sm:$0xff] %vm857_vm1, %v842_v14  ;;  %v627_v34 = vadd.f32 %v6325_v18, %v7621_v45  ;;  %v618_v37 = vpop.f32.mrb[53].mxu0  ;;  %v1095_v41 = vld [vmem:[#allocation2 + $0xb1] sm:$0xff] }
 0x147   :  { %v7874_v8 = vld [vmem:[#allocation2 + $0x241] sm:$0xff]  ;;  %v2237_v24 = vpack.c.bf16 %v7863_v59, %v7870_v2  ;;  %6387 = vmatprep.subr.bf16.mxu0 %v7016_v50  ;;  %v7017_v42 = vld [vmem:[%s9290_s3 + $0x58] sm:$0xff]   ;;  %v619_v47 = vadd.f32 %v7621_v45, %v618_v37  ;;  %v6326_v44 = vpop.f32.mrb[54].mxu0  ;;  %v1850_v30 = vpack.c.bf16 %v7870_v2, %v7854_v53  ;;  %v1107_v52 = vpack.c.bf16 %v7872_v3, %v1095_v41  ;;  %v2230_v62 = vld [vmem:[#allocation2 + $0x270] sm:$0xff] }
 0x148   :  { %vm719_vm10 = vcmp.gt.f32.partialorder %v627_v34, 0.0  ;;  %v783_v57 = vmul.f32 0.2, %v627_v34  ;;  %v630_v58 = vadd.f32 %v6326_v44, %v7621_v45  ;;  %v621_v61 = vpop.f32.mrb[55].mxu0  ;;  %v7906_v37 = vld [vmem:[#allocation2 + $0x161] sm:$0xff] }
 0x149   :  { %6499 = vmatprep.mubr.msk.bf16.mxu1 %vm857_vm1, %v2237_v24  ;;  %6372 = vmatmul.mubr.msk.bf16.gmra.mrb[68].mxu0 %vm857_vm1, %v1106_v27  ;;  %vm717_vm11 = vcmp.gt.f32.partialorder %v619_v47, 0.0  ;;  %v781_v14 = vmul.f32 0.2, %v619_v47  ;;  %v622_v18 = vadd.f32 %v7621_v45, %v621_v61  ;;  %v7021_v27 = vld [vmem:[%s9290_s3 + $0x60] sm:$0xff]   ;;  %v2238_v45 = vpack.c.bf16 %v2230_v62, %v7865_v60  ;;  %v7928_v62 = vld [vmem:[#allocation2 + $0xf1] sm:$0xff] }
 0x14a   :  { %6375 = vmatprep.mubr.msk.bf16.mxu0 %vm857_vm1, %v1107_v52  ;;  %6388 = vmatpush3.bf16.msra.mxu0 %v7016_v50  ;;  %v847_v24 = vsel %vm719_vm10, %v627_v34, %v783_v57  ;;  %vm720_vm12 = vcmp.gt.f32.partialorder %v630_v58, 0.0  ;;  %v784_v41 = vmul.f32 0.2, %v630_v58  ;;  %v7913_v61 = vld [vmem:[#allocation2 + $0xe1] sm:$0xff]  ;;  %v2424_v34 = vpack.c.bf16 %v7672_v63, %v7906_v37  ;;  %v7922_v57 = vld [vmem:[#allocation2 + $0xd1] sm:$0xff] }
 0x14b   :  { %6389 = vmatprep.subr.bf16.mxu0 %v7017_v42  ;;  %1068 = vst.msk [vmem:[#allocation2 + $0x391] sm:$0xff] %vm857_vm1, %v847_v24  ;;  %v845_v44 = vsel %vm717_vm11, %v619_v47, %v781_v14  ;;  %vm718_vm13 = vcmp.gt.f32.partialorder %v622_v18, 0.0  ;;  %v782_v51 = vmul.f32 0.2, %v622_v18  ;;  %v7918_v52 = vld [vmem:[#allocation2 + $0x101] sm:$0xff]  ;;  %v2426_v24 = vpack.c.bf16 %v7691_v25, %v7696_v31  ;;  %v2029_v63 = vld [vmem:[#allocation2 + $0x1f1] sm:$0xff] }
 0x14c   :  { %1066 = vst.msk [vmem:[#allocation2 + $0x371] sm:$0xff] %vm857_vm1, %v845_v44  ;;  %v848_v50 = vsel %vm720_vm12, %v630_v58, %v784_v41  ;;  %v1108_v58 = vpack.c.bf16 %v7913_v61, %v7922_v57  ;;  %v1109_v14 = vpack.c.bf16 %v7918_v52, %v7928_v62  ;;  %v7944_v41 = vld [vmem:[#allocation2 + $0x111] sm:$0xff]  ;;  %v2037_v10 = vpack.c.bf16 %v7906_v37, %v2021_v6  ;;  %v2995_v53 = vld [vmem:[#allocation2 + $0x301] sm:$0xff] }
 0x14d   :  { %1069 = vst.msk [vmem:[#allocation2 + $0x3a1] sm:$0xff] %vm857_vm1, %v848_v50  ;;  %v846_v47 = vsel %vm718_vm13, %v622_v18, %v782_v51  ;;  %v7936_v51 = vld [vmem:[#allocation2 + $0x121] sm:$0xff]  ;;  %v7019_v50 = vld [vmem:[%s9290_s3 + $0x110] sm:$0xff]   ;;  %v9297_v60 = vpack.c.bf16 %v7696_v31, %v7703_v36 }
 0x14e   :  { %6500 = vmatmul.mubr.msk.bf16.gmra.mrb[12].mxu1 %vm857_vm1, %v2238_v45  ;;  %6390 = vmatpush3.bf16.msra.mxu0 %v7017_v42  ;;  %1067 = vst.msk [vmem:[#allocation2 + $0x381] sm:$0xff] %vm857_vm1, %v846_v47  ;;  %v2425_v42 = vpack.c.bf16 %v7703_v36, %v7674_v0  ;;  %v7018_v18 = vld [vmem:[%s9290_s3 + $0x108] sm:$0xff]   ;;  %v1110_v44 = vpack.c.bf16 %v7936_v51, %v7944_v41  ;;  %v7045_v59 = vld [vmem:[%s9290_s3 + $0x180] sm:$0xff]  }
 0x14f   :  { %6511 = vmatprep.mubr.msk.bf16.mxu1 %vm857_vm1, %v2424_v34  ;;  %6407 = vmatprep.subr.bf16.mxu0 %v7021_v27  ;;  %v1458_v45 = vpack.c.bf16 %v7832_v23, %v7789_v46  ;;  %v2415_v34 = vld [vmem:[#allocation2 + $0x1d1] sm:$0xff]  ;;  %v7957_v47 = vld [vmem:[#allocation2 + $0x201] sm:$0xff] }
 0x150   :  { %v7020_v46 = vld [vmem:[%s9290_s3 + $0x118] sm:$0xff]   ;;  %v2428_v23 = vpack.c.bf16 %v7816_v11, %v7957_v47  ;;  %v2041_v0 = vpack.c.bf16 %v7957_v47, %v2029_v63  ;;  %v9299_v47 = vpack.c.bf16 %v7818_v12, %v7816_v11  ;;  %v7047_v11 = vld [vmem:[%s9290_s3 + $0x190] sm:$0xff]   ;;  %v8381_v6 = vld [vmem:[#allocation2 + $0x3e1] sm:$0xff] }
 0x151   :  { %6376 = vmatmul.mubr.msk.bf16.gmra.mrb[72].mxu0 %vm857_vm1, %v1108_v58  ;;  %v1459_v58 = vpack.c.bf16 %v7837_v29, %v7811_v7  ;;  %v7024_v7 = vld [vmem:[%s9290_s3 + $0x70] sm:$0xff]  }
 0x152   :  { %6379 = vmatprep.mubr.msk.bf16.mxu0 %vm857_vm1, %v1109_v14  ;;  %v7022_v14 = vld [vmem:[%s9290_s3 + $0x68] sm:$0xff]   ;;  %v1449_v29 = vld [vmem:[#allocation2 + $0x91] sm:$0xff] }
 0x153   :  { %v8201_v39 = vld [vmem:[#allocation2 + $0x392] sm:$0xff] }
 0x154   :  { %v3003_v31 = vld [vmem:[#allocation2 + $0x3a1] sm:$0xff]  ;;  %v8403_v63 = vld [vmem:[#allocation2 + $0x431] sm:$0xff] }
 0x155   :  { %v8199_v32 = vld [vmem:[#allocation2 + $0x382] sm:$0xff] }
 0x156   :  { %6512 = vmatmul.mubr.msk.bf16.vlgmr.msra.gmra.mrb[0].mxu1 %vm857_vm1, %v2425_v42  ;;  %v1460_v42 = vpack.c.bf16 %v7856_v55, %v7823_v16  ;;  %v2429_v16 = vpack.c.bf16 %v7884_v28, %v7818_v12  ;;  %v2430_v55 = vpack.c.bf16 %v7886_v33, %v7874_v8  ;;  %v9301_v12 = vpack.c.bf16 %v7868_v1, %v7886_v33 }
 0x157   :  { %6528 = vmatpush3.bf16.msra.mxu1 %v7729_v4  ;;  %6515 = vmatprep.mubr.msk.bf16.mxu1 %vm857_vm1, %v2426_v24  ;;  %v2427_v4 = vpack.c.bf16 %v2415_v34, %v7693_v26  ;;  %v7025_v24 = vld [vmem:[%s9290_s3 + $0x78] sm:$0xff]  }
 0x158   :  { %6529 = vmatprep.subr.bf16.mxu1 %v7018_v18 }
 0x159   :  { %6380 = vmatmul.mubr.msk.bf16.gmra.mrb[76].mxu0 %vm857_vm1, %v1110_v44  ;;  %v6329_v44 = vpop.f32.mrb[56].mxu0 }
 0x15a   :  { %6391 = vmatprep.mubr.msk.bf16.mxu0 %vm857_vm1, %v1458_v45  ;;  %v1462_v45 = vpack.c.bf16 %v7922_v57, %v7872_v3 }
 0x15b   :  { %6530 = vmatpush3.bf16.msra.mxu1 %v7018_v18  ;;  %v7977_v18 = vld [vmem:[%s9290_s3 + $0x120] sm:$0xff]  }
 0x15c   :  { %6531 = vmatprep.subr.bf16.mxu1 %v7019_v50 }
 0x15e   :  { %6516 = vmatmul.mubr.msk.bf16.gmra.mrb[4].mxu1 %vm857_vm1, %v2427_v4  ;;  %v634_v4 = vpop.f32.mrb[57].mxu0 }
 0x15f   :  { %6519 = vmatprep.mubr.msk.bf16.mxu1 %vm857_vm1, %v2428_v23  ;;  %6532 = vmatpush3.bf16.msra.mxu1 %v7019_v50  ;;  %v8000_v50 = vld [vmem:[%s9291_s2] ss:$0 sm:$0xff]  ;;  %v6330_v23 = vpop.f32.mrb[58].mxu0 }
 0x160   :  { %6533 = vmatprep.subr.bf16.mxu1 %v7020_v46  ;;  %v643_v34 = vadd.f32 %v8000_v50, %v6329_v44  ;;  %v646_v57 = vadd.f32 %v8000_v50, %v6330_v23 }
 0x161   :  { %6392 = vmatmul.mubr.msk.bf16.vlgmr.msra.gmra.mrb[64].mxu0 %vm857_vm1, %v1459_v58  ;;  %v2602_v58 = vld [vmem:[#allocation2 + $0x281] sm:$0xff] }
 0x162   :  { %6395 = vmatprep.mubr.msk.bf16.mxu0 %vm857_vm1, %v1460_v42  ;;  %6408 = vmatpush3.bf16.msra.mxu0 %v7021_v27  ;;  %v1461_v27 = vpack.c.bf16 %v1449_v29, %v7858_v56  ;;  %v2423_v56 = vld [vmem:[#allocation2 + $0x271] sm:$0xff]  ;;  %vm723_vm14 = vcmp.gt.f32.partialorder %v643_v34, 0.0  ;;  %v787_v3 = vmul.f32 0.2, %v643_v34  ;;  %v8012_v42 = vld [vmem:[%s9290_s3 + $0x80] sm:$0xff]   ;;  %vm724_vm0 = vcmp.gt.f32.partialorder %v646_v57, 0.0 }
 0x163   :  { %6534 = vmatpush3.bf16.msra.mxu1 %v7020_v46  ;;  %6409 = vmatprep.subr.bf16.mxu0 %v7022_v14  ;;  %v635_v46 = vadd.f32 %v8000_v50, %v634_v4  ;;  %v2431_v29 = vpack.c.bf16 %v2423_v56, %v7868_v1  ;;  %v637_v4 = vpop.f32.mrb[59].mxu0  ;;  %v1463_v56 = vpack.c.bf16 %v7928_v62, %v7913_v61  ;;  %v8033_v62 = vld [vmem:[#allocation2 + $0x2d1] sm:$0xff]  ;;  %v7049_v1 = vld [vmem:[%s9290_s3 + $0x1a0] sm:$0xff]  }
 0x164   :  { %6551 = vmatprep.subr.bf16.mxu1 %v7977_v18  ;;  %v6333_v23 = vpop.f32.mrb[60].mxu0 }
 0x165   :  { %vm721_vm15 = vcmp.gt.f32.partialorder %v635_v46, 0.0 }
 0x166   :  { %6520 = vmatmul.mubr.msk.bf16.gmra.mrb[8].mxu1 %vm857_vm1, %v2429_v16  ;;  %6410 = vmatpush3.bf16.msra.mxu0 %v7022_v14  ;;  %v8006_v14 = vld [vmem:[#allocation2 + $0x291] sm:$0xff]  ;;  %v785_v16 = vmul.f32 0.2, %v635_v46 }
 0x167   :  { %6523 = vmatprep.mubr.msk.bf16.mxu1 %vm857_vm1, %v2430_v55  ;;  %6411 = vmatprep.subr.bf16.mxu0 %v7024_v7  ;;  %v851_v55 = vsel %vm723_vm14, %v643_v34, %v787_v3  ;;  %v2618_v44 = vpack.c.bf16 %v8006_v14, %v2602_v58  ;;  %v638_v34 = vadd.f32 %v8000_v50, %v637_v4  ;;  %v650_v58 = vpop.f32.mrb[61].mxu0  ;;  %v8029_v3 = vld [vmem:[#allocation2 + $0x2a1] sm:$0xff] }
 0x168   :  { %1081 = vst.msk [vmem:[#allocation2 + $0x491] sm:$0xff] %vm857_vm1, %v851_v55  ;;  %v651_v61 = vadd.f32 %v8000_v50, %v650_v58  ;;  %v6334_v58 = vpop.f32.mrb[62].mxu0 }
 0x169   :  { %6396 = vmatmul.mubr.msk.bf16.gmra.mrb[68].mxu0 %vm857_vm1, %v1461_v27  ;;  %v788_v27 = vmul.f32 0.2, %v646_v57  ;;  %vm722_vm2 = vcmp.gt.f32.partialorder %v638_v34, 0.0 }
 0x16a   :  { %6399 = vmatprep.mubr.msk.bf16.mxu0 %vm857_vm1, %v1462_v45  ;;  %6412 = vmatpush3.bf16.msra.mxu0 %v7024_v7  ;;  %v849_v7 = vsel %vm721_vm15, %v635_v46, %v785_v16  ;;  %v1464_v46 = vpack.c.bf16 %v7944_v41, %v7918_v52  ;;  %vm725_vm4 = vcmp.gt.f32.partialorder %v651_v61, 0.0  ;;  %v789_v41 = vmul.f32 0.2, %v651_v61 }
 0x16b   :  { %6413 = vmatprep.subr.bf16.mxu0 %v7025_v24  ;;  %1079 = vst.msk [vmem:[#allocation2 + $0x471] sm:$0xff] %vm857_vm1, %v849_v7  ;;  %v852_v45 = vsel %vm724_vm0, %v646_v57, %v788_v27  ;;  %v786_v57 = vmul.f32 0.2, %v638_v34  ;;  %v8039_v27 = vld [vmem:[#allocation2 + $0x2c1] sm:$0xff] }
 0x16c   :  { %1082 = vst.msk [vmem:[#allocation2 + $0x4a1] sm:$0xff] %vm857_vm1, %v852_v45  ;;  %v7026_v7 = vld [vmem:[%s9290_s3 + $0x128] sm:$0xff]   ;;  %v2620_v4 = vpack.c.bf16 %v8033_v62, %v8039_v27 }
 0x16d   :  { %v850_v52 = vsel %vm722_vm2, %v638_v34, %v786_v57  ;;  %v853_v34 = vsel %vm725_vm4, %v651_v61, %v789_v41  ;;  %v2610_v57 = vld [vmem:[#allocation2 + $0x321] sm:$0xff]  ;;  %v7027_v61 = vld [vmem:[%s9290_s3 + $0x130] sm:$0xff]   ;;  %v653_v41 = vpop.f32.mrb[63].mxu0  ;;  %vm4407_vm2 = vcmask 1045505   ;;  %vm4579_vm4 = vcmask 1047555  }
 0x16e   :  { %6524 = vmatmul.mubr.msk.bf16.gmra.mrb[12].mxu1 %vm857_vm1, %v2431_v29  ;;  %6414 = vmatpush3.bf16.msra.mxu0 %v7025_v24  ;;  %v659_v24 = vadd.f32 %v8000_v50, %v6333_v23  ;;  %v8035_v29 = vld [vmem:[#allocation2 + $0x2b1] sm:$0xff]  ;;  %1080 = vst.msk [vmem:[#allocation2 + $0x481] sm:$0xff] %vm857_vm1, %v850_v52  ;;  %1083 = vst.msk [vmem:[#allocation2 + $0x4b1] sm:$0xff] %vm857_vm1, %v853_v34  ;;  %v662_v52 = vadd.f32 %v8000_v50, %v6334_v58 }
 0x16f   :  { %6535 = vmatprep.mubr.msk.bf16.mxu1 %vm857_vm1, %v2618_v44  ;;  %6431 = vmatprep.subr.bf16.mxu0 %v8012_v42  ;;  %v2619_v55 = vpack.c.bf16 %v8035_v29, %v8029_v3  ;;  %v1457_v44 = vld [vmem:[#allocation2 + $0x131] sm:$0xff] }
 0x170   :  { %vm727_vm3 = vcmp.gt.f32.partialorder %v659_v24, 0.0  ;;  %v791_v16 = vmul.f32 0.2, %v659_v24  ;;  %v1465_v23 = vpack.c.bf16 %v1457_v44, %v7936_v51  ;;  %v654_v51 = vadd.f32 %v8000_v50, %v653_v41  ;;  %v8064_v44 = vld [vmem:[#allocation2 + $0x2f1] sm:$0xff]  ;;  %v7030_v41 = vld [vmem:[%s9290_s3 + $0x88] sm:$0xff]  }
 0x171   :  { %6400 = vmatmul.mubr.msk.bf16.gmra.mrb[72].mxu0 %vm857_vm1, %v1463_v56  ;;  %v1635_v56 = vld [vmem:[#allocation2 + $0x22] sm:$0xff]  ;;  %vm728_vm5 = vcmp.gt.f32.partialorder %v662_v52, 0.0  ;;  %v1638_v34 = vld [vmem:[#allocation2 + $0x52] sm:$0xff]  ;;  %v3007_v2 = vpack.c.bf16 %v2995_v53, %v8064_v44 }
 0x172   :  { %6403 = vmatprep.mubr.msk.bf16.mxu0 %vm857_vm1, %v1464_v46  ;;  %v855_v45 = vsel %vm727_vm3, %v659_v24, %v791_v16  ;;  %v1636_v46 = vld [vmem:[#allocation2 + $0x32] sm:$0xff]  ;;  %vm726_vm6 = vcmp.gt.f32.partialorder %v654_v51, 0.0  ;;  %vm4493_vm3 = vcmask 1046530  }
 0x173   :  { %1085 = vst.msk [vmem:[#allocation2 + $0x4d1] sm:$0xff] %vm857_vm1, %v855_v45  ;;  %v1651_v24 = vpack.c.bf16 %v1636_v46, %v1635_v56  ;;  %v8053_v16 = vld [vmem:[#allocation2 + $0x331] sm:$0xff]  ;;  %v1639_v46 = vld [vmem:[#allocation2 + $0x62] sm:$0xff] }
 0x174   :  { %v2622_v45 = vpack.c.bf16 %v8053_v16, %v2610_v57  ;;  %v7028_v50 = vld [vmem:[%s9290_s3 + $0x138] sm:$0xff]  }
 0x175   :  { %v1640_v57 = vld [vmem:[#allocation2 + $0x72] sm:$0xff] }
 0x176   :  { %6536 = vmatmul.mubr.msk.bf16.vlgmr.msra.gmra.mrb[0].mxu1 %vm857_vm1, %v2619_v55  ;;  %v792_v55 = vmul.f32 0.2, %v662_v52  ;;  %v1653_v48 = vpack.c.bf16 %v1640_v57, %v1639_v46  ;;  %v8106_v46 = vld [vmem:[#allocation2 + $0x381] sm:$0xff] }
 0x177   :  { %6552 = vmatpush3.bf16.msra.mxu1 %v7977_v18  ;;  %6539 = vmatprep.mubr.msk.bf16.mxu1 %vm857_vm1, %v2620_v4  ;;  %v8060_v18 = vld [vmem:[#allocation2 + $0x2e1] sm:$0xff]  ;;  %v790_v4 = vmul.f32 0.2, %v654_v51 }
 0x178   :  { %6553 = vmatprep.subr.bf16.mxu1 %v7026_v7  ;;  %v2621_v56 = vpack.c.bf16 %v8064_v44, %v8060_v18  ;;  %v7037_v57 = vld [vmem:[%s9290_s3 + $0xa0] sm:$0xff]  }
 0x179   :  { %6404 = vmatmul.mubr.msk.bf16.gmra.mrb[76].mxu0 %vm857_vm1, %v1465_v23  ;;  %v856_v23 = vsel %vm728_vm5, %v662_v52, %v792_v55  ;;  %v854_v58 = vsel %vm726_vm6, %v654_v51, %v790_v4  ;;  %v7031_v52 = vld [vmem:[%s9290_s3 + $0x140] sm:$0xff]   ;;  %v8085_v55 = vld [vmem:[#allocation2 + $0x351] sm:$0xff] }
 0x17a   :  { %6415 = vmatprep.mubr.msk.bf16.mxu0 %vm857_vm1, %v1651_v24  ;;  %1086 = vst.msk [vmem:[#allocation2 + $0x4e1] sm:$0xff] %vm857_vm1, %v856_v23  ;;  %1084 = vst.msk [vmem:[#allocation2 + $0x4c1] sm:$0xff] %vm857_vm1, %v854_v58  ;;  %v8083_v51 = vld [vmem:[#allocation2 + $0x341] sm:$0xff]  ;;  %v7032_v4 = vld [vmem:[%s9290_s3 + $0x90] sm:$0xff]  }
 0x17b   :  { %6554 = vmatpush3.bf16.msra.mxu1 %v7026_v7  ;;  %v1637_v7 = vld [vmem:[#allocation2 + $0x42] sm:$0xff]  ;;  %v1642_v23 = vld [vmem:[#allocation2 + $0x92] sm:$0xff]  ;;  %v3008_v37 = vpack.c.bf16 %v8083_v51, %v8053_v16 }
 0x17c   :  { %6555 = vmatprep.subr.bf16.mxu1 %v7027_v61  ;;  %v1652_v24 = vpack.c.bf16 %v1638_v34, %v1637_v7  ;;  %v1641_v34 = vld [vmem:[#allocation2 + $0x82] sm:$0xff]  ;;  %v8108_v58 = vld [vmem:[#allocation2 + $0x391] sm:$0xff] }
 0x17d   :  { %v2795_v7 = vld [vmem:[#allocation2 + $0x282] sm:$0xff]  ;;  %v3011_v36 = vpack.c.bf16 %v3003_v31, %v8108_v58  ;;  %v7048_v16 = vld [vmem:[%s9290_s3 + $0x198] sm:$0xff]  }
 0x17e   :  { %6540 = vmatmul.mubr.msk.bf16.gmra.mrb[4].mxu1 %vm857_vm1, %v2621_v56  ;;  %v2623_v56 = vpack.c.bf16 %v8085_v55, %v8083_v51  ;;  %v3196_v51 = vld [vmem:[#allocation2 + $0x3a2] sm:$0xff] }
 0x17f   :  { %6543 = vmatprep.mubr.msk.bf16.mxu1 %vm857_vm1, %v2622_v45  ;;  %6556 = vmatpush3.bf16.msra.mxu1 %v7027_v61  ;;  %v8088_v45 = vld [vmem:[#allocation2 + $0x361] sm:$0xff]  ;;  %v8090_v61 = vld [vmem:[#allocation2 + $0x371] sm:$0xff] }
 0x180   :  { %6557 = vmatprep.subr.bf16.mxu1 %v7028_v50 }
 0x181   :  { %6416 = vmatmul.mubr.msk.bf16.vlgmr.msra.gmra.mrb[64].mxu0 %vm857_vm1, %v1652_v24  ;;  %v8114_v24 = vld [vmem:[#allocation2 + $0x292] sm:$0xff] }
 0x182   :  { %6419 = vmatprep.mubr.msk.bf16.mxu0 %vm857_vm1, %v1653_v48  ;;  %6432 = vmatpush3.bf16.msra.mxu0 %v8012_v42  ;;  %v2624_v48 = vpack.c.bf16 %v8090_v61, %v8088_v45  ;;  %v1654_v42 = vpack.c.bf16 %v1642_v23, %v1641_v34  ;;  %v8140_v34 = vld [vmem:[#allocation2 + $0x2c2] sm:$0xff]  ;;  %v1650_v23 = vld [vmem:[#allocation2 + $0x132] sm:$0xff] }
 0x183   :  { %6558 = vmatpush3.bf16.msra.mxu1 %v7028_v50  ;;  %6433 = vmatprep.subr.bf16.mxu0 %v7030_v41  ;;  %v7033_v50 = vld [vmem:[%s9290_s3 + $0x98] sm:$0xff]   ;;  %v2813_v35 = vpack.c.bf16 %v8134_v17, %v8140_v34  ;;  %v1658_v43 = vpack.c.bf16 %v1650_v23, %v7782_v38  ;;  %v1833_v23 = vld [vmem:[#allocation2 + $0x1a0] sm:$0xff] }
 0x184   :  { %6575 = vmatprep.subr.bf16.mxu1 %v7031_v52 }
 0x186   :  { %6544 = vmatmul.mubr.msk.bf16.gmra.mrb[8].mxu1 %vm857_vm1, %v2623_v56  ;;  %6434 = vmatpush3.bf16.msra.mxu0 %v7030_v41  ;;  %v2625_v41 = vpack.c.bf16 %v8108_v58, %v8106_v46  ;;  %v2811_v56 = vpack.c.bf16 %v8114_v24, %v2795_v7  ;;  %v8157_v7 = vld [vmem:[#allocation2 + $0x332] sm:$0xff]  ;;  %v8319_v58 = vld [vmem:[#allocation2 + $0x3e0] sm:$0xff] }
 0x187   :  { %6547 = vmatprep.mubr.msk.bf16.mxu1 %vm857_vm1, %v2624_v48  ;;  %6435 = vmatprep.subr.bf16.mxu0 %v7032_v4  ;;  %v7035_v48 = vld [vmem:[%s9290_s3 + $0x150] sm:$0xff]  }
 0x189   :  { %6420 = vmatmul.mubr.msk.bf16.gmra.mrb[68].mxu0 %vm857_vm1, %v1654_v42  ;;  %v8154_v42 = vld [vmem:[#allocation2 + $0x2e2] sm:$0xff] }
 0x18a   :  { %6423 = vmatprep.mubr.msk.bf16.mxu0 %vm857_vm1, %v1655_v21  ;;  %6436 = vmatpush3.bf16.msra.mxu0 %v7032_v4  ;;  %v8136_v21 = vld [vmem:[#allocation2 + $0x2b2] sm:$0xff] }
 0x18b   :  { %6437 = vmatprep.subr.bf16.mxu0 %v7033_v50  ;;  %v2812_v4 = vpack.c.bf16 %v8136_v21, %v8128_v13 }
 0x18e   :  { %6548 = vmatmul.mubr.msk.bf16.gmra.mrb[12].mxu1 %vm857_vm1, %v2625_v41  ;;  %6438 = vmatpush3.bf16.msra.mxu0 %v7033_v50  ;;  %v2803_v50 = vld [vmem:[#allocation2 + $0x322] sm:$0xff] }
 0x18f   :  { %6559 = vmatprep.mubr.msk.bf16.mxu1 %vm857_vm1, %v2811_v56  ;;  %6455 = vmatprep.subr.bf16.mxu0 %v7037_v57  ;;  %v1831_v41 = vld [vmem:[#allocation2 + $0x180] sm:$0xff]  ;;  %v7036_v56 = vld [vmem:[%s9290_s3 + $0x158] sm:$0xff]  }
 0x191   :  { %6424 = vmatmul.mubr.msk.bf16.gmra.mrb[72].mxu0 %vm857_vm1, %v1656_v40  ;;  %v1829_v40 = vld [vmem:[#allocation2 + $0x160] sm:$0xff] }
 0x192   :  { %6427 = vmatprep.mubr.msk.bf16.mxu0 %vm857_vm1, %v1657_v54  ;;  %v1844_v54 = vpack.c.bf16 %v1829_v40, %v1828_v49 }
 0x196   :  { %6560 = vmatmul.mubr.msk.bf16.vlgmr.msra.gmra.mrb[0].mxu1 %vm857_vm1, %v2812_v4  ;;  %v2815_v4 = vpack.c.bf16 %v8157_v7, %v2803_v50  ;;  %v8176_v50 = vld [vmem:[#allocation2 + $0x342] sm:$0xff] }
 0x197   :  { %6576 = vmatpush3.bf16.msra.mxu1 %v7031_v52  ;;  %6563 = vmatprep.mubr.msk.bf16.mxu1 %vm857_vm1, %v2813_v35  ;;  %v8159_v52 = vld [vmem:[#allocation2 + $0x2f2] sm:$0xff] }
 0x198   :  { %6577 = vmatprep.subr.bf16.mxu1 %v7034_v9  ;;  %v2814_v38 = vpack.c.bf16 %v8159_v52, %v8154_v42  ;;  %v1830_v35 = vld [vmem:[#allocation2 + $0x170] sm:$0xff] }
 0x199   :  { %6428 = vmatmul.mubr.msk.bf16.gmra.mrb[76].mxu0 %vm857_vm1, %v1658_v43  ;;  %v1845_v40 = vpack.c.bf16 %v1831_v41, %v1830_v35  ;;  %v1832_v43 = vld [vmem:[#allocation2 + $0x190] sm:$0xff]  ;;  %v8181_v41 = vld [vmem:[#allocation2 + $0x362] sm:$0xff] }
 0x19a   :  { %6439 = vmatprep.mubr.msk.bf16.mxu0 %vm857_vm1, %v1844_v54  ;;  %v1846_v49 = vpack.c.bf16 %v1833_v23, %v1832_v43  ;;  %v7039_v54 = vld [vmem:[%s9290_s3 + $0x160] sm:$0xff]   ;;  %v1834_v43 = vld [vmem:[#allocation2 + $0x1b0] sm:$0xff] }
 0x19b   :  { %6578 = vmatpush3.bf16.msra.mxu1 %v7034_v9  ;;  %v7038_v9 = vld [vmem:[%s9290_s3 + $0xa8] sm:$0xff]   ;;  %v1835_v35 = vld [vmem:[#allocation2 + $0x1c0] sm:$0xff] }
 0x19c   :  { %6579 = vmatprep.subr.bf16.mxu1 %v7035_v48 }
 0x19e   :  { %6564 = vmatmul.mubr.msk.bf16.gmra.mrb[4].mxu1 %vm857_vm1, %v2814_v38  ;;  %v8178_v38 = vld [vmem:[#allocation2 + $0x352] sm:$0xff] }
 0x19f   :  { %6567 = vmatprep.mubr.msk.bf16.mxu1 %vm857_vm1, %v2815_v4  ;;  %6580 = vmatpush3.bf16.msra.mxu1 %v7035_v48  ;;  %v8183_v48 = vld [vmem:[#allocation2 + $0x372] sm:$0xff]  ;;  %v2816_v23 = vpack.c.bf16 %v8178_v38, %v8176_v50  ;;  %v3202_v33 = vpack.c.bf16 %v8181_v41, %v8178_v38 }
 0x1a0   :  { %6581 = vmatprep.subr.bf16.mxu1 %v7036_v56  ;;  %v7040_v4 = vld [vmem:[%s9290_s3 + $0xb0] sm:$0xff]   ;;  %v3203_v44 = vpack.c.bf16 %v8199_v32, %v8183_v48 }
 0x1a1   :  { %6440 = vmatmul.mubr.msk.bf16.vlgmr.msra.gmra.mrb[64].mxu0 %vm857_vm1, %v1845_v40  ;;  %v2817_v40 = vpack.c.bf16 %v8183_v48, %v8181_v41  ;;  %v7052_v41 = vld [vmem:[%s9290_s3 + $0x1b8] sm:$0xff]   ;;  %v7053_v48 = vld [vmem:[%s9290_s3 + $0x1c0] sm:$0xff]  }
 0x1a2   :  { %6443 = vmatprep.mubr.msk.bf16.mxu0 %vm857_vm1, %v1846_v49  ;;  %6456 = vmatpush3.bf16.msra.mxu0 %v7037_v57  ;;  %v1847_v57 = vpack.c.bf16 %v1835_v35, %v1834_v43  ;;  %v7041_v49 = vld [vmem:[%s9290_s3 + $0xb8] sm:$0xff]   ;;  %v8358_v35 = vld [vmem:[#allocation2 + $0x490] sm:$0xff] }
 0x1a3   :  { %6582 = vmatpush3.bf16.msra.mxu1 %v7036_v56  ;;  %6457 = vmatprep.subr.bf16.mxu0 %v7038_v9  ;;  %v1836_v56 = vld [vmem:[#allocation2 + $0x1f0] sm:$0xff] }
 0x1a4   :  { %6599 = vmatprep.subr.bf16.mxu1 %v7039_v54  ;;  %v1848_v20 = vpack.c.bf16 %v7821_v15, %v1836_v56  ;;  %v3005_v15 = vpack.c.bf16 %v8039_v27, %v8035_v29  ;;  %v7046_v29 = vld [vmem:[%s9290_s3 + $0x188] sm:$0xff]   ;;  %v3199_v27 = vpack.c.bf16 %v8154_v42, %v8134_v17  ;;  %v8327_v17 = vld [vmem:[#allocation2 + $0x400] sm:$0xff]  ;;  %v8336_v42 = vld [vmem:[#allocation2 + $0x470] sm:$0xff] }
 0x1a5   :  { %v8362_v43 = vld [vmem:[#allocation2 + $0x4b0] sm:$0xff] }
 0x1a6   :  { %6568 = vmatmul.mubr.msk.bf16.gmra.mrb[8].mxu1 %vm857_vm1, %v2816_v23  ;;  %6458 = vmatpush3.bf16.msra.mxu0 %v7038_v9  ;;  %v2818_v9 = vpack.c.bf16 %v8201_v39, %v8199_v32  ;;  %v3004_v23 = vpack.c.bf16 %v8029_v3, %v8006_v14  ;;  %v3006_v14 = vpack.c.bf16 %v8060_v18, %v8033_v62  ;;  %v8323_v32 = vld [vmem:[#allocation2 + $0x3f0] sm:$0xff] }
 0x1a7   :  { %6571 = vmatprep.mubr.msk.bf16.mxu1 %vm857_vm1, %v2817_v40  ;;  %6459 = vmatprep.subr.bf16.mxu0 %v7040_v4  ;;  %v3010_v3 = vpack.c.bf16 %v8106_v46, %v8090_v61  ;;  %v3197_v62 = vpack.c.bf16 %v8128_v13, %v8114_v24  ;;  %v3201_v18 = vpack.c.bf16 %v8176_v50, %v8157_v7  ;;  %v8321_v24 = vld [vmem:[#allocation2 + $0x410] sm:$0xff]  ;;  %v8360_v40 = vld [vmem:[#allocation2 + $0x4a0] sm:$0xff] }
 0x1a8   :  { %v3204_v61 = vpack.c.bf16 %v3196_v51, %v8201_v39  ;;  %v3392_v13 = vpack.c.bf16 %v8323_v32, %v8319_v58  ;;  %v7050_v39 = vld [vmem:[%s9290_s3 + $0x1a8] sm:$0xff]   ;;  %v7051_v7 = vld [vmem:[%s9290_s3 + $0x1b0] sm:$0xff]   ;;  %v3397_v56 = vpack.c.bf16 %v8362_v43, %v8360_v40 }
 0x1a9   :  { %6444 = vmatmul.mubr.msk.bf16.gmra.mrb[68].mxu0 %vm857_vm1, %v1847_v57 }
 0x1aa   :  { %6447 = vmatprep.mubr.msk.bf16.mxu0 %vm857_vm1, %v1848_v20  ;;  %6460 = vmatpush3.bf16.msra.mxu0 %v7040_v4  ;;  %v7042_v20 = vld [vmem:[%s9290_s3 + $0x168] sm:$0xff]   ;;  %v8356_v4 = vld [vmem:[#allocation2 + $0x480] sm:$0xff] }
 0x1ab   :  { %6461 = vmatprep.subr.bf16.mxu0 %v7041_v49  ;;  %v3396_v57 = vpack.c.bf16 %v8358_v35, %v8356_v4 }
 0x1ae   :  { %6572 = vmatmul.mubr.msk.bf16.gmra.mrb[12].mxu1 %vm857_vm1, %v2818_v9  ;;  %6462 = vmatpush3.bf16.msra.mxu0 %v7041_v49  ;;  %v8370_v49 = vld [vmem:[#allocation2 + $0x4c0] sm:$0xff]  ;;  %v8372_v9 = vld [vmem:[#allocation2 + $0x4d0] sm:$0xff] }
 0x1af   :  { %6583 = vmatprep.mubr.msk.bf16.mxu1 %vm857_vm1, %v3004_v23  ;;  %v3568_v23 = vld [vmem:[#allocation2 + $0x3c1] sm:$0xff] }
 0x1b1   :  { %6448 = vmatmul.mubr.msk.bf16.gmra.mrb[72].mxu0 %vm857_vm1, %v1849_v19  ;;  %v7043_v19 = vld [vmem:[%s9290_s3 + $0x170] sm:$0xff]  }
 0x1b2   :  { %6451 = vmatprep.mubr.msk.bf16.mxu0 %vm857_vm1, %v1850_v30  ;;  %v7044_v30 = vld [vmem:[%s9290_s3 + $0x178] sm:$0xff]  }
 0x1b6   :  { %6584 = vmatmul.mubr.msk.bf16.vlgmr.msra.gmra.mrb[0].mxu1 %vm857_vm1, %v3005_v15  ;;  %v8374_v15 = vld [vmem:[#allocation2 + $0x3d1] sm:$0xff] }
 0x1b7   :  { %6600 = vmatpush3.bf16.msra.mxu1 %v7039_v54  ;;  %6587 = vmatprep.mubr.msk.bf16.mxu1 %vm857_vm1, %v3006_v14  ;;  %v8343_v54 = vld [vmem:[#allocation2 + $0x430] sm:$0xff]  ;;  %v3584_v14 = vpack.c.bf16 %v8374_v15, %v3568_v23 }
 0x1b8   :  { %6601 = vmatprep.subr.bf16.mxu1 %v7042_v20 }
 0x1b9   :  { %6452 = vmatmul.mubr.msk.bf16.gmra.mrb[76].mxu0 %vm857_vm1, %v1851_v22  ;;  %v3009_v22 = vpack.c.bf16 %v8088_v45, %v8085_v55  ;;  %v3375_v55 = vld [vmem:[#allocation2 + $0x3c0] sm:$0xff]  ;;  %v8313_v45 = vld [vmem:[#allocation2 + $0x3d0] sm:$0xff] }
 0x1ba   :  { %6463 = vmatprep.mubr.msk.bf16.mxu0 %vm857_vm1, %v2037_v10  ;;  %v3391_v46 = vpack.c.bf16 %v8313_v45, %v3375_v55  ;;  %v8383_v10 = vld [vmem:[#allocation2 + $0x411] sm:$0xff] }
 0x1bb   :  { %6602 = vmatpush3.bf16.msra.mxu1 %v7042_v20  ;;  %v3398_v20 = vpack.c.bf16 %v8372_v9, %v8370_v49  ;;  %v7060_v55 = vld [vmem:[%s9290_s3 + $0x1f8] sm:$0xff]  }
 0x1bc   :  { %6603 = vmatprep.subr.bf16.mxu1 %v7043_v19 }
 0x1be   :  { %6588 = vmatmul.mubr.msk.bf16.gmra.mrb[4].mxu1 %vm857_vm1, %v3007_v2  ;;  %v8389_v2 = vld [vmem:[#allocation2 + $0x401] sm:$0xff] }
 0x1bf   :  { %6591 = vmatprep.mubr.msk.bf16.mxu1 %vm857_vm1, %v3008_v37  ;;  %6604 = vmatpush3.bf16.msra.mxu1 %v7043_v19  ;;  %v8385_v19 = vld [vmem:[#allocation2 + $0x3f1] sm:$0xff]  ;;  %v3586_v37 = vpack.c.bf16 %v8383_v10, %v8389_v2 }
 0x1c0   :  { %6605 = vmatprep.subr.bf16.mxu1 %v7044_v30  ;;  %v3585_v53 = vpack.c.bf16 %v8385_v19, %v8381_v6 }
 0x1c1   :  { %6464 = vmatmul.mubr.msk.bf16.vlgmr.msra.gmra.mrb[64].mxu0 %vm857_vm1, %v2038_v5  ;;  %v9298_v5 = vpack.c.bf16 %v7693_v26, %v7691_v25  ;;  %v9300_v25 = vpack.c.bf16 %v7874_v8, %v7884_v28  ;;  %v3198_v26 = vpack.c.bf16 %v8140_v34, %v8136_v21  ;;  %v3188_v8 = vld [vmem:[#allocation2 + $0x302] sm:$0xff]  ;;  %v3393_v21 = vpack.c.bf16 %v8321_v24, %v8327_v17 }
 0x1c2   :  { %6467 = vmatprep.mubr.msk.bf16.mxu0 %vm857_vm1, %v9297_v60  ;;  %v3200_v28 = vpack.c.bf16 %v3188_v8, %v8159_v52  ;;  %v3383_v34 = vld [vmem:[#allocation2 + $0x460] sm:$0xff] }
 0x1c3   :  { %6606 = vmatpush3.bf16.msra.mxu1 %v7044_v30  ;;  %v8341_v52 = vld [vmem:[#allocation2 + $0x420] sm:$0xff]  ;;  %v3395_v50 = vpack.c.bf16 %v8336_v42, %v3383_v34  ;;  %v7054_v30 = vld [vmem:[%s9290_s3 + $0x1c8] sm:$0xff]  }
 0x1c4   :  { %6623 = vmatprep.subr.bf16.mxu1 %v7045_v59  ;;  %v3394_v38 = vpack.c.bf16 %v8343_v54, %v8341_v52  ;;  %v3574_v60 = vld [vmem:[#allocation2 + $0x421] sm:$0xff] }
 0x1c6   :  { %6592 = vmatmul.mubr.msk.bf16.gmra.mrb[8].mxu1 %vm857_vm1, %v3009_v22  ;;  %v3576_v22 = vld [vmem:[#allocation2 + $0x461] sm:$0xff] }
 0x1c7   :  { %6595 = vmatprep.mubr.msk.bf16.mxu1 %vm857_vm1, %v3010_v3  ;;  %v8401_v3 = vld [vmem:[#allocation2 + $0x471] sm:$0xff] }
 0x1c8   :  { %v3588_v31 = vpack.c.bf16 %v8401_v3, %v3576_v22 }
 0x1c9   :  { %6468 = vmatmul.mubr.msk.bf16.gmra.mrb[68].mxu0 %vm857_vm1, %v9298_v5  ;;  %v7056_v5 = vld [vmem:[%s9290_s3 + $0x1d8] sm:$0xff]  }
 0x1ca   :  { %6471 = vmatprep.mubr.msk.bf16.mxu0 %vm857_vm1, %v2041_v0  ;;  %v3587_v0 = vpack.c.bf16 %v8403_v63, %v3574_v60 }
 0x1ce   :  { %6596 = vmatmul.mubr.msk.bf16.gmra.mrb[12].mxu1 %vm857_vm1, %v3011_v36  ;;  %v7057_v36 = vld [vmem:[%s9290_s3 + $0x1e0] sm:$0xff]  }
 0x1cf   :  { %6607 = vmatprep.mubr.msk.bf16.mxu1 %vm857_vm1, %v3197_v62  ;;  %v3578_v62 = vld [vmem:[#allocation2 + $0x481] sm:$0xff] }
 0x1d0   :  { %v3974_v34 = vpack.c.bf16 %v3578_v62, %v8401_v3 }
 0x1d1   :  { %6472 = vmatmul.mubr.msk.bf16.gmra.mrb[72].mxu0 %vm857_vm1, %v9299_v47  ;;  %v3579_v47 = vld [vmem:[#allocation2 + $0x491] sm:$0xff] }
 0x1d2   :  { %6475 = vmatprep.mubr.msk.bf16.mxu0 %vm857_vm1, %v9300_v25  ;;  %v3580_v25 = vld [vmem:[#allocation2 + $0x4a1] sm:$0xff] }
 0x1d6   :  { %6608 = vmatmul.mubr.msk.bf16.vlgmr.msra.gmra.mrb[0].mxu1 %vm857_vm1, %v3198_v26  ;;  %v3581_v26 = vld [vmem:[#allocation2 + $0x4b1] sm:$0xff] }
 0x1d7   :  { %6624 = vmatpush3.bf16.msra.mxu1 %v7045_v59  ;;  %6611 = vmatprep.mubr.msk.bf16.mxu1 %vm857_vm1, %v3199_v27  ;;  %v7055_v59 = vld [vmem:[%s9290_s3 + $0x1d0] sm:$0xff]   ;;  %v3590_v27 = vpack.c.bf16 %v3581_v26, %v3580_v25 }
 0x1d8   :  { %6625 = vmatprep.subr.bf16.mxu1 %v7046_v29 }
 0x1d9   :  { %6476 = vmatmul.mubr.msk.bf16.gmra.mrb[76].mxu0 %vm857_vm1, %v9301_v12  ;;  %v3583_v12 = vld [vmem:[#allocation2 + $0x4d1] sm:$0xff] }
 0x1db   :  { %6626 = vmatpush3.bf16.msra.mxu1 %v7046_v29  ;;  %v3589_v29 = vpack.c.bf16 %v3579_v47, %v3578_v62 }
 0x1dc   :  { %6627 = vmatprep.subr.bf16.mxu1 %v7047_v11 }
 0x1de   :  { %6612 = vmatmul.mubr.msk.bf16.gmra.mrb[4].mxu1 %vm857_vm1, %v3200_v28  ;;  %v3777_v28 = vpack.c.bf16 %v8319_v58, %v8313_v45  ;;  %v3781_v45 = vpack.c.bf16 %v8356_v4, %v8336_v42  ;;  %v3776_v58 = vld [vmem:[#allocation2 + $0x4e0] sm:$0xff]  ;;  %v3975_v42 = vpack.c.bf16 %v3580_v25, %v3579_v47 }
 0x1df   :  { %6615 = vmatprep.mubr.msk.bf16.mxu1 %vm857_vm1, %v3201_v18  ;;  %6628 = vmatpush3.bf16.msra.mxu1 %v7047_v11  ;;  %v3582_v11 = vld [vmem:[#allocation2 + $0x4c1] sm:$0xff] }
 0x1e0   :  { %6629 = vmatprep.subr.bf16.mxu1 %v7048_v16  ;;  %v3591_v8 = vpack.c.bf16 %v3583_v12, %v3582_v11  ;;  %v7058_v18 = vld [vmem:[%s9290_s3 + $0x1e8] sm:$0xff]  }
 0x1e3   :  { %6630 = vmatpush3.bf16.msra.mxu1 %v7048_v16  ;;  %v3778_v16 = vpack.c.bf16 %v8327_v17, %v8323_v32  ;;  %v3970_v32 = vpack.c.bf16 %v8381_v6, %v8374_v15  ;;  %v3972_v17 = vpack.c.bf16 %v3574_v60, %v8383_v10 }
 0x1e4   :  { %6647 = vmatprep.subr.bf16.mxu1 %v7049_v1 }
 0x1e6   :  { %6616 = vmatmul.mubr.msk.bf16.gmra.mrb[8].mxu1 %vm857_vm1, %v3202_v33  ;;  %v7059_v33 = vld [vmem:[%s9290_s3 + $0x1f0] sm:$0xff]  }
 0x1e7   :  { %6619 = vmatprep.mubr.msk.bf16.mxu1 %vm857_vm1, %v3203_v44  ;;  %v3768_v44 = vld [vmem:[#allocation2 + $0x440] sm:$0xff] }
 0x1e8   :  { %v3780_v51 = vpack.c.bf16 %v3768_v44, %v8343_v54 }
 0x1ee   :  { %6620 = vmatmul.mubr.msk.bf16.gmra.mrb[12].mxu1 %vm857_vm1, %v3204_v61  ;;  %v3782_v61 = vpack.c.bf16 %v8360_v40, %v8358_v35 }
 0x1ef   :  { %6631 = vmatprep.mubr.msk.bf16.mxu1 %vm857_vm1, %v3391_v46  ;;  %v3783_v46 = vpack.c.bf16 %v8370_v49, %v8362_v43 }
 0x1f6   :  { %6632 = vmatmul.mubr.msk.bf16.vlgmr.msra.gmra.mrb[0].mxu1 %vm857_vm1, %v3392_v13  ;;  %v3971_v13 = vpack.c.bf16 %v8389_v2, %v8385_v19 }
 0x1f7   :  { %6648 = vmatpush3.bf16.msra.mxu1 %v7049_v1  ;;  %6635 = vmatprep.mubr.msk.bf16.mxu1 %vm857_vm1, %v3393_v21  ;;  %v3779_v1 = vpack.c.bf16 %v8341_v52, %v8321_v24  ;;  %v3784_v24 = vpack.c.bf16 %v3776_v58, %v8372_v9  ;;  %v3969_v52 = vld [vmem:[#allocation2 + $0x4e1] sm:$0xff] }
 0x1f8   :  { %6649 = vmatprep.subr.bf16.mxu1 %v7050_v39  ;;  %v3977_v54 = vpack.c.bf16 %v3969_v52, %v3583_v12 }
 0x1fb   :  { %6650 = vmatpush3.bf16.msra.mxu1 %v7050_v39  ;;  %v3961_v39 = vld [vmem:[#allocation2 + $0x441] sm:$0xff] }
 0x1fc   :  { %6651 = vmatprep.subr.bf16.mxu1 %v7051_v7  ;;  %v3973_v21 = vpack.c.bf16 %v3961_v39, %v8403_v63 }
 0x1fe   :  { %6636 = vmatmul.mubr.msk.bf16.gmra.mrb[4].mxu1 %vm857_vm1, %v3394_v38 }
 0x1ff   :  { %6639 = vmatprep.mubr.msk.bf16.mxu1 %vm857_vm1, %v3395_v50  ;;  %6652 = vmatpush3.bf16.msra.mxu1 %v7051_v7  ;;  %v3976_v7 = vpack.c.bf16 %v3582_v11, %v3581_v26 }
 0x200   :  { %6653 = vmatprep.subr.bf16.mxu1 %v7052_v41 }
 0x203   :  { %6654 = vmatpush3.bf16.msra.mxu1 %v7052_v41 }
 0x204   :  { %6671 = vmatprep.subr.bf16.mxu1 %v7053_v48 }
 0x206   :  { %6640 = vmatmul.mubr.msk.bf16.gmra.mrb[8].mxu1 %vm857_vm1, %v3396_v57 }
 0x207   :  { %6643 = vmatprep.mubr.msk.bf16.mxu1 %vm857_vm1, %v3397_v56 }
 0x20e   :  { %6644 = vmatmul.mubr.msk.bf16.gmra.mrb[12].mxu1 %vm857_vm1, %v3398_v20 }
 0x20f   :  { %6655 = vmatprep.mubr.msk.bf16.mxu1 %vm857_vm1, %v3584_v14 }
 0x216   :  { %6656 = vmatmul.mubr.msk.bf16.vlgmr.msra.gmra.mrb[0].mxu1 %vm857_vm1, %v3585_v53 }
 0x217   :  { %6672 = vmatpush3.bf16.msra.mxu1 %v7053_v48  ;;  %6659 = vmatprep.mubr.msk.bf16.mxu1 %vm857_vm1, %v3586_v37 }
 0x218   :  { %6673 = vmatprep.subr.bf16.mxu1 %v7054_v30 }
 0x21b   :  { %6674 = vmatpush3.bf16.msra.mxu1 %v7054_v30 }
 0x21c   :  { %6675 = vmatprep.subr.bf16.mxu1 %v7055_v59 }
 0x21e   :  { %6660 = vmatmul.mubr.msk.bf16.gmra.mrb[4].mxu1 %vm857_vm1, %v3587_v0 }
 0x21f   :  { %6663 = vmatprep.mubr.msk.bf16.mxu1 %vm857_vm1, %v3588_v31  ;;  %6676 = vmatpush3.bf16.msra.mxu1 %v7055_v59 }
 0x220   :  { %6677 = vmatprep.subr.bf16.mxu1 %v7056_v5 }
 0x223   :  { %6678 = vmatpush3.bf16.msra.mxu1 %v7056_v5 }
 0x224   :  { %6695 = vmatprep.subr.bf16.mxu1 %v7057_v36 }
 0x226   :  { %6664 = vmatmul.mubr.msk.bf16.gmra.mrb[8].mxu1 %vm857_vm1, %v3589_v29 }
 0x227   :  { %6667 = vmatprep.mubr.msk.bf16.mxu1 %vm857_vm1, %v3590_v27 }
 0x22e   :  { %6668 = vmatmul.mubr.msk.bf16.gmra.mrb[12].mxu1 %vm857_vm1, %v3591_v8 }
 0x22f   :  { %6679 = vmatprep.mubr.msk.bf16.mxu1 %vm857_vm1, %v3777_v28 }
 0x236   :  { %6680 = vmatmul.mubr.msk.bf16.vlgmr.msra.gmra.mrb[0].mxu1 %vm857_vm1, %v3778_v16 }
 0x237   :  { %6696 = vmatpush3.bf16.msra.mxu1 %v7057_v36  ;;  %6683 = vmatprep.mubr.msk.bf16.mxu1 %vm857_vm1, %v3779_v1 }
 0x238   :  { %6697 = vmatprep.subr.bf16.mxu1 %v7058_v18 }
 0x23b   :  { %6698 = vmatpush3.bf16.msra.mxu1 %v7058_v18 }
 0x23c   :  { %6699 = vmatprep.subr.bf16.mxu1 %v7059_v33 }
 0x23e   :  { %6684 = vmatmul.mubr.msk.bf16.gmra.mrb[4].mxu1 %vm857_vm1, %v3780_v51 }
 0x23f   :  { %6687 = vmatprep.mubr.msk.bf16.mxu1 %vm857_vm1, %v3781_v45  ;;  %6700 = vmatpush3.bf16.msra.mxu1 %v7059_v33 }
 0x240   :  { %6701 = vmatprep.subr.bf16.mxu1 %v7060_v55 }
 0x243   :  { %6702 = vmatpush3.bf16.msra.mxu1 %v7060_v55 }
 0x246   :  { %6688 = vmatmul.mubr.msk.bf16.gmra.mrb[8].mxu1 %vm857_vm1, %v3782_v61 }
 0x247   :  { %6691 = vmatprep.mubr.msk.bf16.mxu1 %vm857_vm1, %v3783_v46 }
 0x24e   :  { %6692 = vmatmul.mubr.msk.bf16.gmra.mrb[12].mxu1 %vm857_vm1, %v3784_v24 }
 0x24f   :  { %6703 = vmatprep.mubr.msk.bf16.mxu1 %vm857_vm1, %v3970_v32 }
 0x256   :  { %6704 = vmatmul.mubr.msk.bf16.vlgmr.msra.gmra.mrb[0].mxu1 %vm857_vm1, %v3971_v13 }
 0x257   :  { %6707 = vmatprep.mubr.msk.bf16.mxu1 %vm857_vm1, %v3972_v17 }
 0x25e   :  { %6708 = vmatmul.mubr.msk.bf16.gmra.mrb[4].mxu1 %vm857_vm1, %v3973_v21 }
 0x25f   :  { %6711 = vmatprep.mubr.msk.bf16.mxu1 %vm857_vm1, %v3974_v34 }
 0x266   :  { %6712 = vmatmul.mubr.msk.bf16.gmra.mrb[8].mxu1 %vm857_vm1, %v3975_v42 }
 0x267   :  { %6715 = vmatprep.mubr.msk.bf16.mxu1 %vm857_vm1, %v3976_v7 }
 0x26e   :  { %6716 = vmatmul.mubr.msk.bf16.gmra.mrb[12].mxu1 %vm857_vm1, %v3977_v54 }
 0x294   :  { %v6465_v50 = vpop.f32.mrb[64].mxu0 }
 0x295   :  { %v2135_v38 = vpop.f32.mrb[65].mxu0 }
 0x296   :  { %v6466_v41 = vpop.f32.mrb[66].mxu0 }
 0x297   :  { %v2138_v48 = vpop.f32.mrb[67].mxu0 }
 0x29c   :  { %v6469_v4 = vpop.f32.mrb[68].mxu0 }
 0x29d   :  { %v2151_v35 = vpop.f32.mrb[69].mxu0 }
 0x29e   :  { %v6470_v40 = vpop.f32.mrb[70].mxu0 }
 0x29f   :  { %v2154_v43 = vpop.f32.mrb[71].mxu0 }
 0x2a4   :  { %v6473_v57 = vpop.f32.mrb[72].mxu0 }
 0x2a5   :  { %v2167_v56 = vpop.f32.mrb[73].mxu0 }
 0x2a6   :  { %v6474_v49 = vpop.f32.mrb[74].mxu0 }
 0x2a7   :  { %v2170_v9 = vpop.f32.mrb[75].mxu0 }
 0x2ac   :  { %v6477_v23 = vpop.f32.mrb[76].mxu0 }
 0x2ad   :  { %v2183_v15 = vpop.f32.mrb[77].mxu0 }
 0x2ae   :  { %v6478_v20 = vpop.f32.mrb[78].mxu0 }
 0x2af   :  { %v2186_v14 = vpop.f32.mrb[79].mxu0 }
 0x329   :  { %v6705_v6 = vpop.f32.mrb[0].mxu1 }
 0x32a   :  { %v6719_v10 = vadd.f32 %v6705_v6, %v6465_v50  ;;  %v4068_v19 = vpop.f32.mrb[1].mxu1 }
 0x32b   :  { %v6720_v53 = vadd.f32 %v4068_v19, %v2135_v38  ;;  %v6706_v2 = vpop.f32.mrb[2].mxu1 }
 0x32c   :  { %v6721_v30 = vadd.f32 %v6706_v2, %v6466_v41  ;;  %v4071_v37 = vpop.f32.mrb[3].mxu1 }
 0x32d   :  { %v6722_v59 = vadd.f32 %v4071_v37, %v2138_v48 }
 0x32f   :  { %v4147_v60 = vadd.f32 %v6722_v59, %v6720_v53 }
 0x331   :  { %v4148_v22 = vadd.f32 %v6719_v10, %v4147_v60  ;;  %v6709_v3 = vpop.f32.mrb[4].mxu1 }
 0x332   :  { %v6723_v63 = vadd.f32 %v6709_v3, %v6469_v4  ;;  %v4084_v0 = vpop.f32.mrb[5].mxu1 }
 0x333   :  { %v6724_v5 = vadd.f32 %v4084_v0, %v2151_v35  ;;  %v4149_v31 = vadd.f32 %v6721_v30, %v4148_v22  ;;  %v6710_v36 = vpop.f32.mrb[6].mxu1 }
 0x334   :  { %v6725_v62 = vadd.f32 %v6710_v36, %v6470_v40  ;;  %v4087_v47 = vpop.f32.mrb[7].mxu1 }
 0x335   :  { %v4150_v25 = vadd.f32 %v6724_v5, %v4149_v31  ;;  %v6726_v26 = vadd.f32 %v4087_v47, %v2154_v43 }
 0x337   :  { %v4151_v29 = vadd.f32 %v6726_v26, %v4150_v25 }
 0x339   :  { %v4152_v27 = vadd.f32 %v6723_v63, %v4151_v29  ;;  %v6713_v11 = vpop.f32.mrb[8].mxu1 }
 0x33a   :  { %v6727_v12 = vadd.f32 %v6713_v11, %v6473_v57  ;;  %v4100_v8 = vpop.f32.mrb[9].mxu1 }
 0x33b   :  { %v6728_v28 = vadd.f32 %v4100_v8, %v2167_v56  ;;  %v4153_v16 = vadd.f32 %v6725_v62, %v4152_v27  ;;  %v6714_v18 = vpop.f32.mrb[10].mxu1 }
 0x33c   :  { %v6729_v1 = vadd.f32 %v6714_v18, %v6474_v49  ;;  %v4103_v33 = vpop.f32.mrb[11].mxu1 }
 0x33d   :  { %v4154_v44 = vadd.f32 %v6728_v28, %v4153_v16  ;;  %v6730_v51 = vadd.f32 %v4103_v33, %v2170_v9 }
 0x33f   :  { %v4155_v55 = vadd.f32 %v6730_v51, %v4154_v44 }
 0x341   :  { %v4156_v45 = vadd.f32 %v6727_v12, %v4155_v55  ;;  %v6717_v61 = vpop.f32.mrb[12].mxu1 }
 0x342   :  { %v6731_v46 = vadd.f32 %v6717_v61, %v6477_v23  ;;  %v4116_v58 = vpop.f32.mrb[13].mxu1 }
 0x343   :  { %v6732_v24 = vadd.f32 %v4116_v58, %v2183_v15  ;;  %v4157_v32 = vadd.f32 %v6729_v1, %v4156_v45  ;;  %v6718_v13 = vpop.f32.mrb[14].mxu1 }
 0x344   :  { %v6733_v17 = vadd.f32 %v6718_v13, %v6478_v20  ;;  %v4119_v39 = vpop.f32.mrb[15].mxu1 }
 0x345   :  { %v4158_v21 = vadd.f32 %v6732_v24, %v4157_v32  ;;  %v6734_v34 = vadd.f32 %v4119_v39, %v2186_v14 }
 0x347   :  { %v4159_v42 = vadd.f32 %v6734_v34, %v4158_v21 }
 0x349   :  { %v4160_v7 = vadd.f32 %v6731_v46, %v4159_v42 }
 0x34b   :  { %v4161_v52 = vadd.f32 %v6733_v17, %v4160_v7 }
 0x34d   :  { %v4162_v54 = vrot.slane %v4161_v52, 4 }
 0x34f   :  { %v4163_v50 = vadd.f32 %v4162_v54, %v4161_v52 }
 0x351   :  { %v4164_v38 = vrot.slane %v4163_v50, 2 }
 0x353   :  { %v4165_v41 = vadd.f32 %v4164_v38, %v4163_v50  ;;  %v8515_v50 = vld [vmem:[%s9292_s4] ss:$0 sm:$0xff] }
 0x355   :  { %v4166_v48 = vrot.slane %v4165_v41, 1 }
 0x357   :  { %v4167_v4 = vadd.f32 %v4166_v48, %v4165_v41  ;;  %v8522_v48 = vld [vmem:[%s9293_s5] ss:$0 sm:$0xff] }
 0x359   :  { %v4169_v35 = vmul.f32 0.0078125, %v4167_v4 }
 0x35b   :  { %v8464_v40 = vsub.f32 %v6720_v53, %v4169_v35  ;;  %v8466_v43 = vsub.f32 %v6722_v59, %v4169_v35  ;;  %v4172_v57 = vsub.f32 %v6719_v10, %v4169_v35  ;;  %v4173_v56 = vsub.f32 %v6721_v30, %v4169_v35 }
 0x35c   :  { %v4174_v49 = vsub.f32 %v6724_v5, %v4169_v35  ;;  %v8468_v9 = vsub.f32 %v6726_v26, %v4169_v35  ;;  %v8470_v23 = vsub.f32 %v6723_v63, %v4169_v35  ;;  %v8472_v15 = vsub.f32 %v6725_v62, %v4169_v35 }
 0x35d   :  { %v8474_v20 = vsub.f32 %v6728_v28, %v4169_v35  ;;  %v8476_v14 = vsub.f32 %v6730_v51, %v4169_v35  ;;  %v4180_v6 = vsub.f32 %v6727_v12, %v4169_v35  ;;  %v8478_v19 = vsub.f32 %v6729_v1, %v4169_v35 }
 0x35e   :  { %v4182_v53 = vsub.f32 %v6732_v24, %v4169_v35  ;;  %v8480_v2 = vsub.f32 %v6734_v34, %v4169_v35  ;;  %v8482_v37 = vsub.f32 %v6731_v46, %v4169_v35  ;;  %v8484_v10 = vsub.f32 %v6733_v17, %v4169_v35 }
 0x35f   :  { %v4186_v30 = vmul.f32 %v8464_v40, %v8464_v40  ;;  %v4187_v59 = vmul.f32 %v8466_v43, %v8466_v43  ;;  %v4188_v60 = vmul.f32 %v4172_v57, %v4172_v57  ;;  %v4189_v3 = vmul.f32 %v4173_v56, %v4173_v56 }
 0x360   :  { %v4190_v0 = vmul.f32 %v4174_v49, %v4174_v49  ;;  %v4191_v31 = vmul.f32 %v8468_v9, %v8468_v9  ;;  %v4192_v62 = vmul.f32 %v8470_v23, %v8470_v23  ;;  %v4193_v25 = vmul.f32 %v8472_v15, %v8472_v15 }
 0x361   :  { %v4202_v22 = vadd.f32 %v4187_v59, %v4186_v30  ;;  %v4194_v29 = vmul.f32 %v8474_v20, %v8474_v20  ;;  %v4195_v11 = vmul.f32 %v8476_v14, %v8476_v14  ;;  %v4196_v8 = vmul.f32 %v4180_v6, %v4180_v6 }
 0x362   :  { %v4197_v16 = vmul.f32 %v8478_v19, %v8478_v19  ;;  %v4198_v1 = vmul.f32 %v4182_v53, %v4182_v53  ;;  %v4199_v44 = vmul.f32 %v8480_v2, %v8480_v2  ;;  %v4200_v55 = vmul.f32 %v8482_v37, %v8482_v37 }
 0x363   :  { %v4203_v63 = vadd.f32 %v4202_v22, %v4188_v60  ;;  %v4201_v61 = vmul.f32 %v8484_v10, %v8484_v10 }
 0x365   :  { %v4204_v5 = vadd.f32 %v4203_v63, %v4189_v3 }
 0x367   :  { %v4205_v36 = vadd.f32 %v4204_v5, %v4190_v0 }
 0x369   :  { %v4206_v47 = vadd.f32 %v4205_v36, %v4191_v31 }
 0x36b   :  { %v4207_v26 = vadd.f32 %v4206_v47, %v4192_v62 }
 0x36d   :  { %v4208_v27 = vadd.f32 %v4207_v26, %v4193_v25 }
 0x36f   :  { %v4209_v12 = vadd.f32 %v4208_v27, %v4194_v29 }
 0x371   :  { %v4210_v28 = vadd.f32 %v4209_v12, %v4195_v11 }
 0x373   :  { %v4211_v18 = vadd.f32 %v4210_v28, %v4196_v8 }
 0x375   :  { %v4212_v33 = vadd.f32 %v4211_v18, %v4197_v16 }
 0x377   :  { %v4213_v51 = vadd.f32 %v4212_v33, %v4198_v1 }
 0x379   :  { %v4214_v45 = vadd.f32 %v4213_v51, %v4199_v44 }
 0x37b   :  { %v4215_v46 = vadd.f32 %v4214_v45, %v4200_v55 }
 0x37d   :  { %v4216_v58 = vadd.f32 %v4215_v46, %v4201_v61 }
 0x37f   :  { %v4217_v24 = vrot.slane %v4216_v58, 4 }
 0x381   :  { %v4218_v32 = vadd.f32 %v4217_v24, %v4216_v58 }
 0x383   :  { %v4219_v13 = vrot.slane %v4218_v32, 2 }
 0x385   :  { %v4220_v17 = vadd.f32 %v4219_v13, %v4218_v32 }
 0x387   :  { %v4221_v39 = vrot.slane %v4220_v17, 1 }
 0x389   :  { %v4222_v21 = vadd.f32 %v4221_v39, %v4220_v17 }
 0x38b   :  { %v4223_v34 = vmul.f32 0.0078125, %v4222_v21 }
 0x38d   :  { %v4224_v42 = vadd.f32 1e-05, %v4223_v34 }
 0x38f   :  { %7061 = vrsqrt.f32 %v4224_v42 }
 0x399   :  { %v8508_v7 = vpop.eup %7061 }
 0x39a   :  { %v4228_v52 = vmul.f32 %v8508_v7, %v4172_v57  ;;  %v4229_v54 = vmul.f32 %v8508_v7, %v4173_v56  ;;  %v4230_v4 = vmul.f32 %v8508_v7, %v4174_v49  ;;  %v4236_v57 = vmul.f32 %v8508_v7, %v4180_v6 }
 0x39b   :  { %v4238_v30 = vmul.f32 %v8508_v7, %v4182_v53  ;;  %v4226_v22 = vmul.f32 %v8508_v7, %v8464_v40  ;;  %v4235_v3 = vmul.f32 %v8508_v7, %v8476_v14  ;;  %v4237_v49 = vmul.f32 %v8508_v7, %v8478_v19  ;;  %v8541_v53 = vld [vmem:[%s9294_s6] ss:$0 sm:$0xff] }
 0x39c   :  { %v4251_v38 = vmul.f32 %v8515_v50, %v4228_v52  ;;  %v4252_v41 = vmul.f32 %v8515_v50, %v4229_v54  ;;  %v4253_v59 = vmul.f32 %v8515_v50, %v4230_v4  ;;  %v4259_v63 = vmul.f32 %v8515_v50, %v4236_v57 }
 0x39d   :  { %v4261_v6 = vmul.f32 %v8515_v50, %v4238_v30  ;;  %v4249_v14 = vmul.f32 %v8515_v50, %v4226_v22  ;;  %v4227_v19 = vmul.f32 %v8508_v7, %v8466_v43  ;;  %v4234_v36 = vmul.f32 %v8508_v7, %v8474_v20 }
 0x39e   :  { %v4275_v35 = vadd.f32 %v8522_v48, %v4252_v41  ;;  %v4274_v56 = vadd.f32 %v8522_v48, %v4251_v38  ;;  %v4276_v40 = vadd.f32 %v8522_v48, %v4253_v59  ;;  %v4258_v62 = vmul.f32 %v8515_v50, %v4235_v3  ;;  %v6025_v3 = vld [vmem:[%s9294_s6 + $0x1] ss:$0 sm:$0xff] }
 0x39f   :  { %v4282_v47 = vadd.f32 %v8522_v48, %v4259_v63  ;;  %v4272_v26 = vadd.f32 %v8522_v48, %v4249_v14  ;;  %v4260_v29 = vmul.f32 %v8515_v50, %v4237_v49  ;;  %v4284_v27 = vadd.f32 %v8522_v48, %v4261_v6 }
 0x3a0   :  { %v4307_v60 = vmul.f32 0.2, %v4275_v35  ;;  %vm4291_vm1 = vcmp.gt.f32.partialorder %v4275_v35, 0.0  ;;  %vm4290_vm7 = vcmp.gt.f32.partialorder %v4274_v56, 0.0  ;;  %v4306_v0 = vmul.f32 0.2, %v4274_v56 }
 0x3a1   :  { %v4250_v11 = vmul.f32 %v8515_v50, %v4227_v19  ;;  %v4257_v43 = vmul.f32 %v8515_v50, %v4234_v36  ;;  %vm4288_vm9 = vcmp.gt.f32.partialorder %v4272_v26, 0.0  ;;  %v4304_v20 = vmul.f32 0.2, %v4272_v26 }
 0x3a2   :  { %v8545_v5 = vsel %vm4291_vm1, %v4275_v35, %v4307_v60  ;;  %v8547_v31 = vsel %vm4290_vm7, %v4274_v56, %v4306_v0  ;;  %vm4292_vm10 = vcmp.gt.f32.partialorder %v4276_v40, 0.0  ;;  %v4308_v28 = vmul.f32 0.2, %v4276_v40 }
 0x3a3   :  { %v4343_v25 = vmul.f32 %v8541_v53, %v8547_v31  ;;  %v4344_v8 = vmul.f32 %v8541_v53, %v8545_v5  ;;  %v4273_v16 = vadd.f32 %v8522_v48, %v4250_v11  ;;  %v4280_v18 = vadd.f32 %v8522_v48, %v4257_v43 }
 0x3a4   :  { %vm4298_vm11 = vcmp.gt.f32.partialorder %v4282_v47, 0.0  ;;  %v4314_v1 = vmul.f32 0.2, %v4282_v47  ;;  %v8567_v33 = vsel %vm4288_vm9, %v4272_v26, %v4304_v20  ;;  %v4281_v44 = vadd.f32 %v8522_v48, %v4258_v62 }
 0x3a5   :  { %v4358_v12 = vsel %vm4351_vm8, %v4343_v25, 0.0  ;;  %v4341_v51 = vmul.f32 %v8541_v53, %v8567_v33  ;;  %vm4289_vm12 = vcmp.gt.f32.partialorder %v4273_v16, 0.0  ;;  %v4305_v55 = vmul.f32 0.2, %v4273_v16 }
 0x3a6   :  { %4359 = vadd.xlane.f32.xlu1 %v4358_v12  ;;  %vm4296_vm13 = vcmp.gt.f32.partialorder %v4280_v18, 0.0  ;;  %v4283_v45 = vadd.f32 %v8522_v48, %v4260_v29  ;;  %v4361_v61 = vsel %vm4351_vm8, %v4344_v8, 0.0  ;;  %v4312_v46 = vmul.f32 0.2, %v4280_v18 }
 0x3a7   :  { %v4316_v58 = vmul.f32 0.2, %v4284_v27  ;;  %v8575_v24 = vsel %vm4292_vm10, %v4276_v40, %v4308_v28  ;;  %v4352_v32 = vsel %vm4351_vm8, %v4341_v51, 0.0  ;;  %v8578_v13 = vsel %vm4289_vm12, %v4273_v16, %v4305_v55  ;;  %v6026_v28 = vld [vmem:[%s9294_s6 + $0x2] ss:$0 sm:$0xff] }
 0x3a8   :  { %v8581_v17 = vsel %vm4298_vm11, %v4282_v47, %v4314_v1  ;;  %4353 = vadd.xlane.f32.xlu0 %v4352_v32  ;;  %v4342_v39 = vmul.f32 %v8541_v53, %v8578_v13  ;;  %v8585_v21 = vsel %vm4296_vm13, %v4280_v18, %v4312_v46  ;;  %v4313_v34 = vmul.f32 0.2, %v4281_v44 }
 0x3a9   :  { %vm4300_vm14 = vcmp.gt.f32.partialorder %v4284_v27, 0.0  ;;  %v4346_v42 = vmul.f32 %v8541_v53, %v8585_v21  ;;  %vm4297_vm15 = vcmp.gt.f32.partialorder %v4281_v44, 0.0  ;;  %v4345_v38 = vmul.f32 %v8541_v53, %v8575_v24 }
 0x3aa   :  { %4362 = vadd.xlane.f32.xlu1 %v4361_v61  ;;  %v4355_v52 = vsel %vm4351_vm8, %v4342_v39, 0.0  ;;  %v4348_v41 = vmul.f32 %v8541_v53, %v8581_v17  ;;  %v4315_v4 = vmul.f32 0.2, %v4283_v45  ;;  %v8595_v35 = vsel %vm4300_vm14, %v4284_v27, %v4316_v58 }
 0x3ab   :  { %v4367_v54 = vsel %vm4351_vm8, %v4346_v42, 0.0  ;;  %v8597_v57 = vsel %vm4297_vm15, %v4281_v44, %v4313_v34  ;;  %vm4299_vm0 = vcmp.gt.f32.partialorder %v4283_v45, 0.0  ;;  %v4364_v56 = vsel %vm4351_vm8, %v4345_v38, 0.0 }
 0x3ac   :  { %4356 = vadd.xlane.f32.xlu0 %v4355_v52  ;;  %v4373_v30 = vsel %vm4351_vm8, %v4348_v41, 0.0  ;;  %v4347_v59 = vmul.f32 %v8541_v53, %v8597_v57  ;;  %v4350_v60 = vmul.f32 %v8541_v53, %v8595_v35  ;;  %v8605_v22 = vsel %vm4299_vm0, %v4283_v45, %v4315_v4 }
 0x3ad   :  { %v4349_v6 = vmul.f32 %v8541_v53, %v8605_v22  ;;  %v4398_v0 = vmul.f32 %v6025_v3, %v8578_v13  ;;  %v4397_v19 = vmul.f32 %v6025_v3, %v8567_v33  ;;  %v4400_v36 = vmul.f32 %v6025_v3, %v8545_v5 }
 0x3ae   :  { %4368 = vadd.xlane.f32.xlu1 %v4367_v54  ;;  %v4370_v63 = vsel %vm4351_vm8, %v4347_v59, 0.0  ;;  %v4379_v49 = vsel %vm4351_vm8, %v4350_v60, 0.0  ;;  %v4399_v53 = vmul.f32 %v6025_v3, %v8547_v31  ;;  %v4402_v25 = vmul.f32 %v6025_v3, %v8585_v21 }
 0x3af   :  { %v4376_v40 = vsel %vm4351_vm8, %v4349_v6, 0.0  ;;  %v4411_v14 = vsel %vm4407_vm2, %v4398_v0, 0.0  ;;  %v4408_v62 = vsel %vm4407_vm2, %v4397_v19, 0.0  ;;  %v4417_v47 = vsel %vm4407_vm2, %v4400_v36, 0.0 }
 0x3b0   :  { %4365 = vadd.xlane.f32.xlu0 %v4364_v56  ;;  %v4414_v26 = vsel %vm4407_vm2, %v4399_v53, 0.0  ;;  %v4423_v29 = vsel %vm4407_vm2, %v4402_v25, 0.0  ;;  %v4401_v27 = vmul.f32 %v6025_v3, %v8575_v24  ;;  %v4404_v11 = vmul.f32 %v6025_v3, %v8581_v17 }
 0x3b1   :  { %v4403_v20 = vmul.f32 %v6025_v3, %v8597_v57  ;;  %v4406_v8 = vmul.f32 %v6025_v3, %v8595_v35  ;;  %v4405_v1 = vmul.f32 %v6025_v3, %v8605_v22  ;;  %v4484_v44 = vmul.f32 %v6026_v28, %v8578_v13 }
 0x3b2   :  { %4374 = vadd.xlane.f32.xlu1 %v4373_v30  ;;  %v4420_v43 = vsel %vm4407_vm2, %v4401_v27, 0.0  ;;  %v4429_v12 = vsel %vm4407_vm2, %v4404_v11, 0.0  ;;  %v4483_v45 = vmul.f32 %v6026_v28, %v8567_v33  ;;  %v4486_v61 = vmul.f32 %v6026_v28, %v8545_v5  ;;  %v6027_v30 = vld [vmem:[%s9294_s6 + $0x3] ss:$0 sm:$0xff] }
 0x3b3   :  { %v4426_v16 = vsel %vm4407_vm2, %v4403_v20, 0.0  ;;  %v4435_v18 = vsel %vm4407_vm2, %v4406_v8, 0.0  ;;  %v4432_v51 = vsel %vm4407_vm2, %v4405_v1, 0.0  ;;  %v4497_v55 = vsel %vm4493_vm3, %v4484_v44, 0.0 }
 0x3b4   :  { %4371 = vadd.xlane.f32.xlu0 %v4370_v63  ;;  %v4494_v46 = vsel %vm4493_vm3, %v4483_v45, 0.0  ;;  %v4503_v58 = vsel %vm4493_vm3, %v4486_v61, 0.0  ;;  %v4485_v32 = vmul.f32 %v6026_v28, %v8547_v31  ;;  %v4488_v39 = vmul.f32 %v6026_v28, %v8585_v21 }
 0x3b5   :  { %v4487_v52 = vmul.f32 %v6026_v28, %v8575_v24  ;;  %v4490_v54 = vmul.f32 %v6026_v28, %v8581_v17  ;;  %v4489_v4 = vmul.f32 %v6026_v28, %v8597_v57  ;;  %v4492_v56 = vmul.f32 %v6026_v28, %v8595_v35 }
 0x3b6   :  { %4380 = vadd.xlane.f32.xlu1 %v4379_v49  ;;  %v4500_v34 = vsel %vm4493_vm3, %v4485_v32, 0.0  ;;  %v4509_v42 = vsel %vm4493_vm3, %v4488_v39, 0.0  ;;  %v4491_v3 = vmul.f32 %v6026_v28, %v8605_v22  ;;  %v4570_v63 = vmul.f32 %v6027_v30, %v8578_v13 }
 0x3b7   :  { %v4506_v38 = vsel %vm4493_vm3, %v4487_v52, 0.0  ;;  %v4515_v41 = vsel %vm4493_vm3, %v4490_v54, 0.0  ;;  %v4512_v59 = vsel %vm4493_vm3, %v4489_v4, 0.0  ;;  %v4521_v60 = vsel %vm4493_vm3, %v4492_v56, 0.0 }
 0x3b8   :  { %4377 = vadd.xlane.f32.xlu0 %v4376_v40  ;;  %v4518_v49 = vsel %vm4493_vm3, %v4491_v3, 0.0  ;;  %v4583_v6 = vsel %vm4579_vm4, %v4570_v63, 0.0  ;;  %v4569_v0 = vmul.f32 %v6027_v30, %v8567_v33  ;;  %v4572_v40 = vmul.f32 %v6027_v30, %v8545_v5  ;;  %v6029_v3 = vld [vmem:[%s9294_s6 + $0x5] ss:$0 sm:$0xff] }
 0x3b9   :  { %v4571_v36 = vmul.f32 %v6027_v30, %v8547_v31  ;;  %v4573_v33 = vmul.f32 %v6027_v30, %v8575_v24  ;;  %v4576_v25 = vmul.f32 %v6027_v30, %v8581_v17  ;;  %v4578_v11 = vmul.f32 %v6027_v30, %v8595_v35 }
 0x3ba   :  { %4412 = vadd.xlane.f32.xlu1 %v4411_v14  ;;  %v4580_v14 = vsel %vm4579_vm4, %v4569_v0, 0.0  ;;  %v4589_v19 = vsel %vm4579_vm4, %v4572_v40, 0.0  ;;  %v4577_v28 = vmul.f32 %v6027_v30, %v8605_v22  ;;  %v4711_v0 = vmul.f32 %v6029_v3, %v8547_v31 }
 0x3bb   :  { %v4601_v27 = vsel %vm4579_vm4, %v4576_v25, 0.0  ;;  %v4607_v8 = vsel %vm4579_vm4, %v4578_v11, 0.0  ;;  %vm5744_vm11 = vcmask 1042434   ;;  %vm5746_vm12 = vcmask 1043459  }
 0x3bc   :  { %4409 = vadd.xlane.f32.xlu0 %v4408_v62  ;;  %v4574_v62 = vmul.f32 %v6027_v30, %v8585_v21  ;;  %v4575_v21 = vmul.f32 %v6027_v30, %v8597_v57  ;;  %v4604_v1 = vsel %vm4579_vm4, %v4577_v28, 0.0  ;;  %v4718_v28 = vmul.f32 %v6029_v3, %v8595_v35 }
 0x3bd   :  { %vm5748_vm13 = vcmask 1044484   ;;  %vm5756_vm14 = vcmask 36864  }
 0x3be   :  { %4418 = vadd.xlane.f32.xlu1 %v4417_v47  ;;  %v4586_v47 = vsel %vm4579_vm4, %v4571_v36, 0.0  ;;  %v4595_v53 = vsel %vm4579_vm4, %v4574_v62, 0.0  ;;  %v4598_v20 = vsel %vm4579_vm4, %v4575_v21, 0.0  ;;  %v4713_v36 = vmul.f32 %v6029_v3, %v8575_v24 }
 0x3c0   :  { %4415 = vadd.xlane.f32.xlu0 %v4414_v26  ;;  %v4231_v26 = vmul.f32 %v8508_v7, %v8468_v9  ;;  %v6028_v9 = vld [vmem:[%s9294_s6 + $0x4] ss:$0 sm:$0xff] }
 0x3c1   :  { %v4657_v32 = vmul.f32 %v6028_v9, %v8545_v5  ;;  %v4660_v39 = vmul.f32 %v6028_v9, %v8597_v57 }
 0x3c2   :  { %4424 = vadd.xlane.f32.xlu1 %v4423_v29  ;;  %v4592_v29 = vsel %vm4579_vm4, %v4573_v33, 0.0  ;;  %v4715_v33 = vmul.f32 %v6029_v3, %v8597_v57 }
 0x3c3   :  { %v4671_v52 = vsel %vm4351_vm8, %v4657_v32, 0.0  ;;  %v4680_v54 = vsel %vm4351_vm8, %v4660_v39, 0.0 }
 0x3c4   :  { %4421 = vadd.xlane.f32.xlu0 %v4420_v43  ;;  %v4239_v43 = vmul.f32 %v8508_v7, %v8480_v2 }
 0x3c6   :  { %4430 = vadd.xlane.f32.xlu1 %v4429_v12  ;;  %v4254_v12 = vmul.f32 %v8515_v50, %v4231_v26  ;;  %v4735_v26 = vsel %vm4407_vm2, %v4715_v33, 0.0 }
 0x3c8   :  { %4427 = vadd.xlane.f32.xlu0 %v4426_v16  ;;  %v4656_v16 = vmul.f32 %v6028_v9, %v8547_v31  ;;  %v4277_v2 = vadd.f32 %v8522_v48, %v4254_v12 }
 0x3ca   :  { %4436 = vadd.xlane.f32.xlu1 %v4435_v18  ;;  %v4262_v18 = vmul.f32 %v8515_v50, %v4239_v43  ;;  %v4668_v44 = vsel %vm4351_vm8, %v4656_v16, 0.0  ;;  %v4309_v61 = vmul.f32 0.2, %v4277_v2  ;;  %vm4293_vm5 = vcmp.gt.f32.partialorder %v4277_v2, 0.0 }
 0x3cb   :  { %v4716_v43 = vmul.f32 %v6029_v3, %v8581_v17 }
 0x3cc   :  { %4433 = vadd.xlane.f32.xlu0 %v4432_v51  ;;  %v4655_v51 = vmul.f32 %v6028_v9, %v8578_v13  ;;  %v4285_v45 = vadd.f32 %v8522_v48, %v4262_v18  ;;  %v4744_v18 = vsel %vm4407_vm2, %v4718_v28, 0.0 }
 0x3ce   :  { %4498 = vadd.xlane.f32.xlu1 %v4497_v55  ;;  %v4658_v55 = vmul.f32 %v6028_v9, %v8575_v24  ;;  %vm4301_vm6 = vcmp.gt.f32.partialorder %v4285_v45, 0.0 }
 0x3d0   :  { %4495 = vadd.xlane.f32.xlu0 %v4494_v46  ;;  %v4665_v46 = vsel %vm4351_vm8, %v4655_v51, 0.0 }
 0x3d2   :  { %4504 = vadd.xlane.f32.xlu1 %v4503_v58  ;;  %v4674_v58 = vsel %vm4351_vm8, %v4658_v55, 0.0 }
 0x3d4   :  { %4501 = vadd.xlane.f32.xlu0 %v4500_v34  ;;  %v4317_v34 = vmul.f32 0.2, %v4285_v45 }
 0x3d6   :  { %4510 = vadd.xlane.f32.xlu1 %v4509_v42  ;;  %v8700_v42 = vsel %vm4293_vm5, %v4277_v2, %v4309_v61  ;;  %v8706_v4 = vsel %vm4301_vm6, %v4285_v45, %v4317_v34 }
 0x3d7   :  { %v4719_v12 = vmul.f32 %v6029_v3, %v8706_v4 }
 0x3d8   :  { %4507 = vadd.xlane.f32.xlu0 %v4506_v38  ;;  %v4659_v38 = vmul.f32 %v6028_v9, %v8700_v42 }
 0x3da   :  { %4516 = vadd.xlane.f32.xlu1 %v4515_v41  ;;  %v4662_v41 = vmul.f32 %v6028_v9, %v8605_v22  ;;  %v4677_v56 = vsel %vm4351_vm8, %v4659_v38, 0.0 }
 0x3dc   :  { %4513 = vadd.xlane.f32.xlu0 %v4512_v59  ;;  %v4686_v30 = vsel %vm4351_vm8, %v4662_v41, 0.0  ;;  %v4661_v59 = vmul.f32 %v6028_v9, %v8581_v17  ;;  %v6031_v41 = vld [vmem:[%s9294_s6 + $0x7] ss:$0 sm:$0xff] }
 0x3dd   :  { %v4884_v33 = vmul.f32 %v6031_v41, %v8700_v42 }
 0x3de   :  { %4522 = vadd.xlane.f32.xlu1 %v4521_v60  ;;  %v4664_v60 = vmul.f32 %v6028_v9, %v8706_v4  ;;  %v4683_v63 = vsel %vm4351_vm8, %v4661_v59, 0.0 }
 0x3e0   :  { %4519 = vadd.xlane.f32.xlu0 %v4518_v49  ;;  %v4692_v49 = vsel %vm4351_vm8, %v4664_v60, 0.0  ;;  %v4881_v60 = vmul.f32 %v6031_v41, %v8547_v31 }
 0x3e2   :  { %4584 = vadd.xlane.f32.xlu1 %v4583_v6  ;;  %v4663_v6 = vmul.f32 %v6028_v9, %v8595_v35  ;;  %v6030_v9 = vld [vmem:[%s9294_s6 + $0x6] ss:$0 sm:$0xff] }
 0x3e3   :  { %v4796_v16 = vmul.f32 %v6030_v9, %v8547_v31  ;;  %v4797_v45 = vmul.f32 %v6030_v9, %v8545_v5  ;;  %v4800_v61 = vmul.f32 %v6030_v9, %v8597_v57  ;;  %v4799_v32 = vmul.f32 %v6030_v9, %v8700_v42 }
 0x3e4   :  { %4581 = vadd.xlane.f32.xlu0 %v4580_v14  ;;  %v4689_v40 = vsel %vm4351_vm8, %v4663_v6, 0.0  ;;  %v4723_v14 = vsel %vm4407_vm2, %v4711_v0, 0.0  ;;  %v4802_v39 = vmul.f32 %v6030_v9, %v8605_v22  ;;  %v4804_v38 = vmul.f32 %v6030_v9, %v8706_v4 }
 0x3e5   :  { %v4808_v2 = vsel %vm4493_vm3, %v4796_v16, 0.0  ;;  %v4817_v34 = vsel %vm4493_vm3, %v4799_v32, 0.0  ;;  %v4803_v59 = vmul.f32 %v6030_v9, %v8595_v35  ;;  %v4883_v6 = vmul.f32 %v6031_v41, %v8575_v24 }
 0x3e6   :  { %4590 = vadd.xlane.f32.xlu1 %v4589_v19  ;;  %v4710_v19 = vmul.f32 %v6029_v3, %v8578_v13 }
 0x3e8   :  { %4587 = vadd.xlane.f32.xlu0 %v4586_v47  ;;  %v4720_v62 = vsel %vm4407_vm2, %v4710_v19, 0.0  ;;  %v4729_v47 = vsel %vm4407_vm2, %v4713_v36, 0.0  ;;  %v4882_v19 = vmul.f32 %v6031_v41, %v8545_v5  ;;  %v4885_v36 = vmul.f32 %v6031_v41, %v8597_v57 }
 0x3ea   :  { %4596 = vadd.xlane.f32.xlu1 %v4595_v53  ;;  %v4712_v53 = vmul.f32 %v6029_v3, %v8545_v5 }
 0x3ec   :  { %4593 = vadd.xlane.f32.xlu0 %v4592_v29  ;;  %v4726_v25 = vsel %vm4407_vm2, %v4712_v53, 0.0  ;;  %v4714_v29 = vmul.f32 %v6029_v3, %v8700_v42  ;;  %v4905_v53 = vsel %vm4579_vm4, %v4885_v36, 0.0 }
 0x3ee   :  { %4602 = vadd.xlane.f32.xlu1 %v4601_v27  ;;  %v4717_v27 = vmul.f32 %v6029_v3, %v8605_v22  ;;  %v4732_v21 = vsel %vm4407_vm2, %v4714_v29, 0.0  ;;  %v4829_v3 = vsel %vm4493_vm3, %v4803_v59, 0.0 }
 0x3f0   :  { %4599 = vadd.xlane.f32.xlu0 %v4598_v20  ;;  %v4741_v11 = vsel %vm4407_vm2, %v4717_v27, 0.0  ;;  %v4738_v20 = vsel %vm4407_vm2, %v4716_v43, 0.0  ;;  %v4902_v27 = vsel %vm4579_vm4, %v4884_v33, 0.0  ;;  %v4889_v43 = vmul.f32 %v6031_v41, %v8706_v4 }
 0x3f2   :  { %4608 = vadd.xlane.f32.xlu1 %v4607_v8  ;;  %v4747_v8 = vsel %vm4407_vm2, %v4719_v12, 0.0  ;;  %v4240_v12 = vmul.f32 %v8508_v7, %v8482_v37  ;;  %v4917_v16 = vsel %vm4579_vm4, %v4889_v43, 0.0  ;;  %v8851_v43 = vld [vmem:[%s9294_s6 + $0x9] ss:$0 sm:$0xff] }
 0x3f4   :  { %4605 = vadd.xlane.f32.xlu0 %v4604_v1  ;;  %v4795_v1 = vmul.f32 %v6030_v9, %v8578_v13 }
 0x3f6   :  { %4669 = vadd.xlane.f32.xlu1 %v4668_v44  ;;  %v4798_v44 = vmul.f32 %v6030_v9, %v8575_v24  ;;  %v4805_v51 = vsel %vm4493_vm3, %v4795_v1, 0.0 }
 0x3f8   :  { %4666 = vadd.xlane.f32.xlu0 %v4665_v46  ;;  %v4814_v55 = vsel %vm4493_vm3, %v4798_v44, 0.0  ;;  %v4811_v46 = vsel %vm4493_vm3, %v4797_v45, 0.0 }
 0x3fa   :  { %4675 = vadd.xlane.f32.xlu1 %v4674_v58  ;;  %v4820_v58 = vsel %vm4493_vm3, %v4800_v61, 0.0 }
 0x3fc   :  { %4672 = vadd.xlane.f32.xlu0 %v4671_v52  ;;  %v4826_v52 = vsel %vm4493_vm3, %v4802_v39, 0.0 }
 0x3fe   :  { %4681 = vadd.xlane.f32.xlu1 %v4680_v54  ;;  %v4801_v54 = vmul.f32 %v6030_v9, %v8581_v17 }
 0x400   :  { %4678 = vadd.xlane.f32.xlu0 %v4677_v56  ;;  %v4823_v56 = vsel %vm4493_vm3, %v4801_v54, 0.0 }
 0x402   :  { %4687 = vadd.xlane.f32.xlu1 %v4686_v30  ;;  %v4832_v30 = vsel %vm4493_vm3, %v4804_v38, 0.0 }
 0x404   :  { %4684 = vadd.xlane.f32.xlu0 %v4683_v63  ;;  %v4893_v63 = vsel %vm4579_vm4, %v4881_v60, 0.0 }
 0x406   :  { %4693 = vadd.xlane.f32.xlu1 %v4692_v49  ;;  %v4880_v49 = vmul.f32 %v6031_v41, %v8578_v13  ;;  %v4896_v13 = vsel %vm4579_vm4, %v4882_v19, 0.0 }
 0x408   :  { %4690 = vadd.xlane.f32.xlu0 %v4689_v40  ;;  %v4890_v40 = vsel %vm4579_vm4, %v4880_v49, 0.0 }
 0x40a   :  { %4724 = vadd.xlane.f32.xlu1 %v4723_v14  ;;  %v4899_v14 = vsel %vm4579_vm4, %v4883_v6, 0.0 }
 0x40c   :  { %4721 = vadd.xlane.f32.xlu0 %v4720_v62 }
 0x40e   :  { %4730 = vadd.xlane.f32.xlu1 %v4729_v47 }
 0x410   :  { %4727 = vadd.xlane.f32.xlu0 %v4726_v25  ;;  %v4887_v25 = vmul.f32 %v6031_v41, %v8605_v22 }
 0x412   :  { %4736 = vadd.xlane.f32.xlu1 %v4735_v26  ;;  %v4232_v26 = vmul.f32 %v8508_v7, %v8470_v23  ;;  %v8794_v23 = vld [vmem:[%s9294_s6 + $0x8] ss:$0 sm:$0xff] }
 0x413   :  { %v4966_v37 = vmul.f32 %v8794_v23, %v8545_v5  ;;  %v4965_v61 = vmul.f32 %v8794_v23, %v8547_v31  ;;  %v4967_v38 = vmul.f32 %v8794_v23, %v8575_v24 }
 0x414   :  { %4733 = vadd.xlane.f32.xlu0 %v4732_v21  ;;  %v4911_v21 = vsel %vm4579_vm4, %v4887_v25, 0.0  ;;  %v4255_v9 = vmul.f32 %v8515_v50, %v4232_v26 }
 0x415   :  { %v4978_v45 = vsel %vm4351_vm8, %v4966_v37, 0.0  ;;  %v4981_v49 = vsel %vm4351_vm8, %v4967_v38, 0.0 }
 0x416   :  { %4742 = vadd.xlane.f32.xlu1 %v4741_v11  ;;  %v4886_v11 = vmul.f32 %v6031_v41, %v8581_v17  ;;  %v4278_v1 = vadd.f32 %v8522_v48, %v4255_v9 }
 0x418   :  { %4739 = vadd.xlane.f32.xlu0 %v4738_v20  ;;  %v4908_v28 = vsel %vm4579_vm4, %v4886_v11, 0.0  ;;  %vm4294_vm1 = vcmp.gt.f32.partialorder %v4278_v1, 0.0 }
 0x41a   :  { %4748 = vadd.xlane.f32.xlu1 %v4747_v8 }
 0x41c   :  { %4745 = vadd.xlane.f32.xlu0 %v4744_v18  ;;  %v4888_v18 = vmul.f32 %v6031_v41, %v8595_v35  ;;  %v4970_v41 = vmul.f32 %v8794_v23, %v8581_v17 }
 0x41e   :  { %4809 = vadd.xlane.f32.xlu1 %v4808_v2  ;;  %v4263_v2 = vmul.f32 %v8515_v50, %v4240_v12  ;;  %v4990_v6 = vsel %vm4351_vm8, %v4970_v41, 0.0 }
 0x420   :  { %4806 = vadd.xlane.f32.xlu0 %v4805_v51  ;;  %v4286_v50 = vadd.f32 %v8522_v48, %v4263_v2 }
 0x422   :  { %4815 = vadd.xlane.f32.xlu1 %v4814_v55  ;;  %v4914_v55 = vsel %vm4579_vm4, %v4888_v18, 0.0  ;;  %vm4302_vm7 = vcmp.gt.f32.partialorder %v4286_v50, 0.0 }
 0x424   :  { %4812 = vadd.xlane.f32.xlu0 %v4811_v46  ;;  %v4968_v46 = vmul.f32 %v8794_v23, %v8700_v42 }
 0x426   :  { %4821 = vadd.xlane.f32.xlu1 %v4820_v58  ;;  %v4310_v58 = vmul.f32 0.2, %v4278_v1  ;;  %v4984_v54 = vsel %vm4351_vm8, %v4968_v46, 0.0 }
 0x428   :  { %4818 = vadd.xlane.f32.xlu0 %v4817_v34 }
 0x42a   :  { %4827 = vadd.xlane.f32.xlu1 %v4826_v52  ;;  %v4975_v52 = vsel %vm4351_vm8, %v4965_v61, 0.0 }
 0x42c   :  { %4824 = vadd.xlane.f32.xlu0 %v4823_v56  ;;  %v8829_v56 = vsel %vm4294_vm1, %v4278_v1, %v4310_v58 }
 0x42e   :  { %4833 = vadd.xlane.f32.xlu1 %v4832_v30  ;;  %v4318_v30 = vmul.f32 0.2, %v4286_v50 }
 0x430   :  { %4830 = vadd.xlane.f32.xlu0 %v4829_v3 }
 0x432   :  { %4894 = vadd.xlane.f32.xlu1 %v4893_v63 }
 0x433   :  { %v8769_v0 = vpop.xlane.xlu1 %4359 }
 0x434   :  { %4891 = vadd.xlane.f32.xlu0 %v4890_v40  ;;  %v4969_v40 = vmul.f32 %v8794_v23, %v8829_v56 }
 0x435   :  { %v4354_v47 = vpop.xlane.xlu0 %4353 }
 0x436   :  { %4900 = vadd.xlane.f32.xlu1 %v4899_v14  ;;  %v4972_v14 = vmul.f32 %v8794_v23, %v8595_v35 }
 0x437   :  { %v8775_v62 = vpop.xlane.xlu1 %4362 }
 0x438   :  { %4897 = vadd.xlane.f32.xlu0 %v4896_v13  ;;  %v8838_v13 = vsel %vm4302_vm7, %v4286_v50, %v4318_v30 }
 0x439   :  { %v4357_v29 = vpop.xlane.xlu0 %4356 }
 0x43a   :  { %4906 = vadd.xlane.f32.xlu1 %v4905_v53 }
 0x43b   :  { %v8783_v57 = vpop.xlane.xlu1 %4368 }
 0x43c   :  { %4903 = vadd.xlane.f32.xlu0 %v4902_v27  ;;  %v4996_v27 = vsel %vm4351_vm8, %v4972_v14, 0.0 }
 0x43d   :  { %v8797_v20 = vpop.xlane.xlu0 %4365 }
 0x43e   :  { %4912 = vadd.xlane.f32.xlu1 %v4911_v21  ;;  %v4971_v21 = vmul.f32 %v8794_v23, %v8605_v22 }
 0x43f   :  { %v8799_v8 = vpop.xlane.xlu1 %4374 }
 0x440   :  { %4909 = vadd.xlane.f32.xlu0 %v4908_v28  ;;  %v4993_v18 = vsel %vm4351_vm8, %v4971_v21, 0.0 }
 0x441   :  { %v8808_v44 = vpop.xlane.xlu0 %4371 }
 0x442   :  { %4918 = vadd.xlane.f32.xlu1 %v4917_v16 }
 0x443   :  { %v8810_v51 = vpop.xlane.xlu1 %4380 }
 0x444   :  { %4915 = vadd.xlane.f32.xlu0 %v4914_v55 }
 0x445   :  { %v8819_v32 = vpop.xlane.xlu0 %4377 }
 0x446   :  { %4979 = vadd.xlane.f32.xlu1 %v4978_v45 }
 0x447   :  { %v4413_v39 = vpop.xlane.xlu1 %4412 }
 0x448   :  { %v4449_v34 = vrot.slane %v4413_v39, 1  ;;  %4976 = vadd.xlane.f32.xlu0 %v4975_v52  ;;  %v5023_v39 = vmul.f32 %v8851_v43, %v8700_v42 }
 0x449   :  { %v4410_v59 = vpop.xlane.xlu0 %4409 }
 0x44a   :  { %v8827_v48 = vadd.f32 %v4449_v34, %v4357_v29  ;;  %4985 = vadd.xlane.f32.xlu1 %v4984_v54  ;;  %v4448_v3 = vrot.slane %v4410_v59, 1  ;;  %v4987_v29 = vsel %vm4351_vm8, %v4969_v40, 0.0  ;;  %v5039_v30 = vsel %vm4407_vm2, %v5023_v39, 0.0 }
 0x44b   :  { %v4419_v60 = vpop.xlane.xlu1 %4418  ;;  %v5022_v59 = vmul.f32 %v8851_v43, %v8575_v24 }
 0x44c   :  { %v4451_v63 = vrot.slane %v4419_v60, 1  ;;  %v4468_v19 = vadd.f32 %v4448_v3, %v4354_v47  ;;  %4982 = vadd.xlane.f32.xlu0 %v4981_v49  ;;  %v4974_v47 = vmul.f32 %v8794_v23, %v8838_v13  ;;  %v5025_v60 = vmul.f32 %v8851_v43, %v8581_v17 }
 0x44d   :  { %v4416_v53 = vpop.xlane.xlu0 %4415  ;;  %v5036_v40 = vsel %vm4407_vm2, %v5022_v59, 0.0 }
 0x44e   :  { %v4471_v36 = vadd.f32 %v4451_v63, %v8775_v62  ;;  %4991 = vadd.xlane.f32.xlu1 %v4990_v6  ;;  %v4450_v25 = vrot.slane %v4416_v53, 1  ;;  %v5002_v37 = vsel %vm4351_vm8, %v4974_v47, 0.0  ;;  %v5045_v14 = vsel %vm4407_vm2, %v5025_v60, 0.0 }
 0x44f   :  { %v4425_v33 = vpop.xlane.xlu1 %4424  ;;  %v5024_v53 = vmul.f32 %v8851_v43, %v8829_v56 }
 0x450   :  { %v4453_v26 = vrot.slane %v4425_v33, 1  ;;  %v4470_v11 = vadd.f32 %v4450_v25, %v8769_v0  ;;  %4988 = vadd.xlane.f32.xlu0 %v4987_v29  ;;  %v4973_v0 = vmul.f32 %v8794_v23, %v8706_v4  ;;  %v5020_v23 = vmul.f32 %v8851_v43, %v8547_v31 }
 0x451   :  { %v4422_v12 = vpop.xlane.xlu0 %4421  ;;  %v5027_v33 = vmul.f32 %v8851_v43, %v8595_v35  ;;  %v5042_v47 = vsel %vm4407_vm2, %v5024_v53, 0.0 }
 0x452   :  { %v4473_v62 = vadd.f32 %v4453_v26, %v8783_v57  ;;  %4997 = vadd.xlane.f32.xlu1 %v4996_v27  ;;  %v4452_v28 = vrot.slane %v4422_v12, 1  ;;  %v5021_v57 = vmul.f32 %v8851_v43, %v8545_v5  ;;  %v4999_v50 = vsel %vm4351_vm8, %v4973_v0, 0.0 }
 0x453   :  { %v4431_v9 = vpop.xlane.xlu1 %4430  ;;  %v5030_v41 = vsel %vm4407_vm2, %v5020_v23, 0.0  ;;  %v5051_v12 = vsel %vm4407_vm2, %v5027_v33, 0.0 }
 0x454   :  { %v4455_v16 = vrot.slane %v4431_v9, 1  ;;  %v4472_v2 = vadd.f32 %v4452_v28, %v8797_v20  ;;  %4994 = vadd.xlane.f32.xlu0 %v4993_v18  ;;  %v5033_v58 = vsel %vm4407_vm2, %v5021_v57, 0.0 }
 0x455   :  { %v4428_v55 = vpop.xlane.xlu0 %4427 }
 0x456   :  { %v4475_v1 = vadd.f32 %v4455_v16, %v8799_v8  ;;  %5003 = vadd.xlane.f32.xlu1 %v5002_v37  ;;  %v4454_v61 = vrot.slane %v4428_v55, 1 }
 0x457   :  { %v4437_v45 = vpop.xlane.xlu1 %4436 }
 0x458   :  { %v4457_v46 = vrot.slane %v4437_v45, 1  ;;  %v4474_v20 = vadd.f32 %v4454_v61, %v8808_v44  ;;  %5000 = vadd.xlane.f32.xlu0 %v4999_v50  ;;  %v5028_v45 = vmul.f32 %v8851_v43, %v8706_v4 }
 0x459   :  { %v4434_v34 = vpop.xlane.xlu0 %4433 }
 0x45a   :  { %v4477_v8 = vadd.f32 %v4457_v46, %v8810_v51  ;;  %5034 = vadd.xlane.f32.xlu1 %v5033_v58  ;;  %v4456_v54 = vrot.slane %v4434_v34, 1  ;;  %v5054_v39 = vsel %vm4407_vm2, %v5028_v45, 0.0 }
 0x45b   :  { %v4499_v52 = vpop.xlane.xlu1 %4498 }
 0x45c   :  { %v4535_v38 = vrot.slane %v4499_v52, 2  ;;  %v4476_v44 = vadd.f32 %v4456_v54, %v8819_v32  ;;  %5031 = vadd.xlane.f32.xlu0 %v5030_v41  ;;  %v5029_v54 = vmul.f32 %v8851_v43, %v8838_v13 }
 0x45d   :  { %v4496_v3 = vpop.xlane.xlu0 %4495 }
 0x45e   :  { %v4555_v51 = vadd.f32 %v4535_v38, %v8827_v48  ;;  %5040 = vadd.xlane.f32.xlu1 %v5039_v30  ;;  %v4534_v49 = vrot.slane %v4496_v3, 2  ;;  %v8890_v48 = vld [vmem:[%s9294_s6 + $0xa] ss:$0 sm:$0xff]  ;;  %v5057_v3 = vsel %vm4407_vm2, %v5029_v54, 0.0 }
 0x45f   :  { %v4505_v63 = vpop.xlane.xlu1 %4504  ;;  %v5110_v61 = vmul.f32 %v8890_v48, %v8581_v17  ;;  %v5106_v52 = vmul.f32 %v8890_v48, %v8545_v5 }
 0x460   :  { %v4537_v6 = vrot.slane %v4505_v63, 2  ;;  %v8883_v25 = vadd.f32 %v4534_v49, %v4468_v19  ;;  %5037 = vadd.xlane.f32.xlu0 %v5036_v40  ;;  %v5026_v19 = vmul.f32 %v8851_v43, %v8605_v22  ;;  %v5111_v63 = vmul.f32 %v8890_v48, %v8605_v22 }
 0x461   :  { %v4502_v26 = vpop.xlane.xlu0 %4501  ;;  %v5130_v34 = vsel %vm4493_vm3, %v5110_v61, 0.0  ;;  %v5118_v60 = vsel %vm4493_vm3, %v5106_v52, 0.0  ;;  %v5112_v43 = vmul.f32 %v8890_v48, %v8595_v35  ;;  %v13_v52 = vstv %s9295_s7 }
 0x462   :  { %v8885_v32 = vadd.f32 %v4537_v6, %v4471_v36  ;;  %5046 = vadd.xlane.f32.xlu1 %v5045_v14  ;;  %v4536_v27 = vrot.slane %v4502_v26, 2  ;;  %v5105_v36 = vmul.f32 %v8890_v48, %v8547_v31  ;;  %v5048_v57 = vsel %vm4407_vm2, %v5026_v19, 0.0  ;;  %14 = vst [vmem:[#allocation3] sm:$0x1] %v13_v52 }
 0x463   :  { %v4511_v29 = vpop.xlane.xlu1 %4510  ;;  %v5133_v53 = vsel %vm4493_vm3, %v5111_v63, 0.0  ;;  %v5136_v33 = vsel %vm4493_vm3, %v5112_v43, 0.0  ;;  %v5107_v26 = vmul.f32 %v8890_v48, %v8575_v24 }
 0x464   :  { %v4539_v21 = vrot.slane %v4511_v29, 2  ;;  %v8898_v9 = vadd.f32 %v4536_v27, %v4470_v11  ;;  %5043 = vadd.xlane.f32.xlu0 %v5042_v47  ;;  %v5115_v55 = vsel %vm4493_vm3, %v5105_v36, 0.0  ;;  %v5113_v29 = vmul.f32 %v8890_v48, %v8706_v4 }
 0x465   :  { %v4508_v16 = vpop.xlane.xlu0 %4507  ;;  %v5121_v36 = vsel %vm4493_vm3, %v5107_v26, 0.0 }
 0x466   :  { %v4559_v28 = vadd.f32 %v4539_v21, %v4473_v62  ;;  %5052 = vadd.xlane.f32.xlu1 %v5051_v12  ;;  %v4538_v37 = vrot.slane %v4508_v16, 2  ;;  %v5139_v16 = vsel %vm4493_vm3, %v5113_v29, 0.0 }
 0x467   :  { %v4517_v18 = vpop.xlane.xlu1 %4516 }
 0x468   :  { %v4541_v0 = vrot.slane %v4517_v18, 2  ;;  %v8906_v46 = vadd.f32 %v4538_v37, %v4472_v2  ;;  %5049 = vadd.xlane.f32.xlu0 %v5048_v57  ;;  %v5108_v18 = vmul.f32 %v8890_v48, %v8700_v42 }
 0x469   :  { %v4514_v62 = vpop.xlane.xlu0 %4513 }
 0x46a   :  { %v8908_v11 = vadd.f32 %v4541_v0, %v4475_v1  ;;  %5116 = vadd.xlane.f32.xlu1 %v5115_v55  ;;  %v4540_v58 = vrot.slane %v4514_v62, 2  ;;  %v7107_v55 = vmov 0   ;;  %v5124_v62 = vsel %vm4493_vm3, %v5108_v18, 0.0 }
 0x46b   :  { %v4523_v50 = vpop.xlane.xlu1 %4522  ;;  %6961 = vset.pattern.permute.xlu0 %v7107_v55  ;;  %6962 = vset.pattern.permute.xlu1 %v7107_v55 }
 0x46c   :  { %v4543_v23 = vrot.slane %v4523_v50, 2  ;;  %v8916_v2 = vadd.f32 %v4540_v58, %v4474_v20  ;;  %5055 = vadd.xlane.f32.xlu0 %v5054_v39 }
 0x46d   :  { %v4520_v38 = vpop.xlane.xlu0 %4519 }
 0x46e   :  { %v8918_v1 = vadd.f32 %v4543_v23, %v4477_v8  ;;  %5131 = vadd.xlane.f32.xlu1 %v5130_v34  ;;  %v4542_v30 = vrot.slane %v4520_v38, 2 }
 0x46f   :  { %v4585_v41 = vpop.xlane.xlu1 %4584 }
 0x470   :  { %v4621_v59 = vrot.slane %v4585_v41, 3  ;;  %v8926_v20 = vadd.f32 %v4542_v30, %v4476_v44  ;;  %5119 = vadd.xlane.f32.xlu0 %v5118_v60  ;;  %v8937_v44 = vld [vmem:[%s9294_s6 + $0xb] ss:$0 sm:$0xff] }
 0x471   :  { %v4582_v49 = vpop.xlane.xlu0 %4581  ;;  %v5191_v37 = vmul.f32 %v8937_v44, %v8545_v5  ;;  %v5190_v58 = vmul.f32 %v8937_v44, %v8547_v31  ;;  %v5196_v23 = vmul.f32 %v8937_v44, %v8605_v22  ;;  %v5195_v30 = vmul.f32 %v8937_v44, %v8581_v17 }
 0x472   :  { %5058 = vadd.xlane.f32.xlu1 %v5057_v3  ;;  %v4641_v8 = vadd.f32 %v4621_v59, %v4555_v51  ;;  %v4620_v40 = vrot.slane %v4582_v49, 3  ;;  %v5109_v17 = vmul.f32 %v8890_v48, %v8829_v56  ;;  %v5192_v29 = vmul.f32 %v8937_v44, %v8575_v24 }
 0x473   :  { %v4591_v6 = vpop.xlane.xlu1 %4590  ;;  %v5203_v50 = vsel %vm4579_vm4, %v5191_v37, 0.0  ;;  %v5200_v31 = vsel %vm4579_vm4, %v5190_v58, 0.0  ;;  %v5218_v41 = vsel %vm4579_vm4, %v5196_v23, 0.0  ;;  %v5215_v49 = vsel %vm4579_vm4, %v5195_v30, 0.0 }
 0x474   :  { %v4623_v14 = vrot.slane %v4591_v6, 3  ;;  %5134 = vadd.xlane.f32.xlu0 %v5133_v53  ;;  %v4640_v51 = vadd.f32 %v4620_v40, %v8883_v25  ;;  %v5197_v40 = vmul.f32 %v8937_v44, %v8595_v35  ;;  %v5194_v55 = vmul.f32 %v8937_v44, %v8829_v56 }
 0x475   :  { %v4588_v21 = vpop.xlane.xlu0 %4587 }
 0x476   :  { %5137 = vadd.xlane.f32.xlu1 %v5136_v33  ;;  %v4643_v27 = vadd.f32 %v4623_v14, %v8885_v32  ;;  %v4622_v12 = vrot.slane %v4588_v21, 3  ;;  %v5221_v26 = vsel %vm4579_vm4, %v5197_v40, 0.0  ;;  %v5212_v23 = vsel %vm4579_vm4, %v5194_v55, 0.0 }
 0x477   :  { %v4597_v47 = vpop.xlane.xlu1 %4596  ;;  %v4241_v55 = vmul.f32 %v8508_v7, %v8484_v10 }
 0x478   :  { %v4625_v19 = vrot.slane %v4597_v47, 3  ;;  %5122 = vadd.xlane.f32.xlu0 %v5121_v36  ;;  %v4642_v25 = vadd.f32 %v4622_v12, %v8898_v9  ;;  %v5199_v36 = vmul.f32 %v8937_v44, %v8838_v13 }
 0x479   :  { %v4594_v32 = vpop.xlane.xlu0 %4593 }
 0x47a   :  { %5140 = vadd.xlane.f32.xlu1 %v5139_v16  ;;  %v4645_v0 = vadd.f32 %v4625_v19, %v4559_v28  ;;  %v4624_v45 = vrot.slane %v4594_v32, 3  ;;  %v5206_v19 = vsel %vm4579_vm4, %v5192_v29, 0.0  ;;  %v8989_v16 = vld [vmem:[%s9294_s6 + $0xc] ss:$0 sm:$0xff] }
 0x47b   :  { %v4603_v57 = vpop.xlane.xlu1 %4602  ;;  %v5280_v30 = vmul.f32 %v8989_v16, %v8605_v22 }
 0x47c   :  { %v4627_v61 = vrot.slane %v4603_v57, 3  ;;  %5125 = vadd.xlane.f32.xlu0 %v5124_v62  ;;  %v4644_v9 = vadd.f32 %v4624_v45, %v8906_v46  ;;  %v5114_v46 = vmul.f32 %v8890_v48, %v8838_v13  ;;  %v5198_v48 = vmul.f32 %v8937_v44, %v8706_v4 }
 0x47d   :  { %v4600_v39 = vpop.xlane.xlu0 %4599  ;;  %v5227_v57 = vsel %vm4579_vm4, %v5199_v36, 0.0  ;;  %v5276_v45 = vmul.f32 %v8989_v16, %v8575_v24 }
 0x47e   :  { %5204 = vadd.xlane.f32.xlu1 %v5203_v50  ;;  %v4647_v28 = vadd.f32 %v4627_v61, %v8908_v11  ;;  %v4626_v54 = vrot.slane %v4600_v39, 3  ;;  %v5142_v6 = vsel %vm4493_vm3, %v5114_v46, 0.0  ;;  %v9012_v39 = vld [vmem:[%s9294_s6 + $0xd] ss:$0 sm:$0xff] }
 0x47f   :  { %v4609_v34 = vpop.xlane.xlu1 %4608  ;;  %v5331_v46 = vmul.f32 %v9012_v39, %v8575_v24  ;;  %v5336_v40 = vmul.f32 %v9012_v39, %v8595_v35 }
 0x480   :  { %v4629_v38 = vrot.slane %v4609_v34, 3  ;;  %5201 = vadd.xlane.f32.xlu0 %v5200_v31  ;;  %v4646_v11 = vadd.f32 %v4626_v54, %v8916_v2 }
 0x481   :  { %v4606_v60 = vpop.xlane.xlu0 %4605 }
 0x482   :  { %5219 = vadd.xlane.f32.xlu1 %v5218_v41  ;;  %v4649_v59 = vadd.f32 %v4629_v38, %v8918_v1  ;;  %v4628_v63 = vrot.slane %v4606_v60, 3 }
 0x483   :  { %v4670_v3 = vpop.xlane.xlu1 %4669 }
 0x484   :  { %v4696_v43 = vadd.f32 %v4670_v3, %v4641_v8  ;;  %5216 = vadd.xlane.f32.xlu0 %v5215_v49  ;;  %v4648_v2 = vadd.f32 %v4628_v63, %v8926_v20  ;;  %v5127_v8 = vsel %vm4493_vm3, %v5109_v17, 0.0  ;;  %v5300_v49 = vsel %vm4351_vm8, %v5280_v30, 0.0 }
 0x485   :  { %v4667_v14 = vpop.xlane.xlu0 %4666  ;;  %v5330_v17 = vmul.f32 %v9012_v39, %v8545_v5 }
 0x486   :  { %5143 = vadd.xlane.f32.xlu1 %v5142_v6  ;;  %v4695_v53 = vadd.f32 %v4667_v14, %v4640_v51  ;;  %v5224_v51 = vsel %vm4579_vm4, %v5198_v48, 0.0  ;;  %v5343_v6 = vsel %vm4407_vm2, %v5331_v46, 0.0  ;;  %v5358_v48 = vsel %vm4407_vm2, %v5336_v40, 0.0 }
 0x487   :  { %v4676_v1 = vpop.xlane.xlu1 %4675  ;;  %v5340_v29 = vsel %vm4407_vm2, %v5330_v17, 0.0 }
 0x488   :  { %v4698_v33 = vadd.f32 %v4676_v1, %v4643_v27  ;;  %5128 = vadd.xlane.f32.xlu0 %v5127_v8  ;;  %v5193_v27 = vmul.f32 %v8937_v44, %v8700_v42  ;;  %v5281_v44 = vmul.f32 %v8989_v16, %v8595_v35 }
 0x489   :  { %v4673_v21 = vpop.xlane.xlu0 %4672 }
 0x48a   :  { %5222 = vadd.xlane.f32.xlu1 %v5221_v26  ;;  %v4697_v12 = vadd.f32 %v4673_v21, %v4642_v25  ;;  %v5209_v32 = vsel %vm4579_vm4, %v5193_v27, 0.0  ;;  %v5303_v41 = vsel %vm4351_vm8, %v5281_v44, 0.0  ;;  %v5335_v21 = vmul.f32 %v9012_v39, %v8605_v22 }
 0x48b   :  { %v4682_v47 = vpop.xlane.xlu1 %4681  ;;  %v5283_v44 = vmul.f32 %v8989_v16, %v8838_v13 }
 0x48c   :  { %v4700_v20 = vadd.f32 %v4682_v47, %v4645_v0  ;;  %5207 = vadd.xlane.f32.xlu0 %v5206_v19  ;;  %v5282_v47 = vmul.f32 %v8989_v16, %v8706_v4 }
 0x48d   :  { %v4679_v18 = vpop.xlane.xlu0 %4678 }
 0x48e   :  { %5225 = vadd.xlane.f32.xlu1 %v5224_v51  ;;  %v4699_v25 = vadd.f32 %v4679_v18, %v4644_v9  ;;  %v5288_v9 = vsel %vm4351_vm8, %v5276_v45, 0.0  ;;  %v5355_v18 = vsel %vm4407_vm2, %v5335_v21, 0.0 }
 0x48f   :  { %v4688_v37 = vpop.xlane.xlu1 %4687 }
 0x490   :  { %v8991_v0 = vadd.f32 %v4688_v37, %v4647_v28  ;;  %5210 = vadd.xlane.f32.xlu0 %v5209_v32  ;;  %v5275_v28 = vmul.f32 %v8989_v16, %v8545_v5  ;;  %v5306_v37 = vsel %vm4351_vm8, %v5282_v47, 0.0  ;;  %v5277_v32 = vmul.f32 %v8989_v16, %v8700_v42 }
 0x491   :  { %v4685_v61 = vpop.xlane.xlu0 %4684 }
 0x492   :  { %5228 = vadd.xlane.f32.xlu1 %v5227_v57  ;;  %v8999_v50 = vadd.f32 %v4685_v61, %v4646_v11  ;;  %v5285_v31 = vsel %vm4351_vm8, %v5275_v28, 0.0  ;;  %v5337_v57 = vmul.f32 %v9012_v39, %v8706_v4  ;;  %v5291_v28 = vsel %vm4351_vm8, %v5277_v32, 0.0 }
 0x493   :  { %v4694_v62 = vpop.xlane.xlu1 %4693 }
 0x494   :  { %v9001_v58 = vadd.f32 %v4694_v62, %v4649_v59  ;;  %5213 = vadd.xlane.f32.xlu0 %v5212_v23 }
 0x495   :  { %v4691_v34 = vpop.xlane.xlu0 %4690 }
 0x496   :  { %5289 = vadd.xlane.f32.xlu1 %v5288_v9  ;;  %v9014_v54 = vadd.f32 %v4691_v34, %v4648_v2  ;;  %v5332_v9 = vmul.f32 %v9012_v39, %v8700_v42 }
 0x497   :  { %v4725_v52 = vpop.xlane.xlu1 %4724 }
 0x498   :  { %v4761_v38 = vrot.slane %v4725_v52, 1  ;;  %5286 = vadd.xlane.f32.xlu0 %v5285_v31  ;;  %v7104_v52 = vld [vmem:[%s9292_s4] ss:$0 sm:$0xff] }
 0x499   :  { %v4722_v59 = vpop.xlane.xlu0 %4721 }
 0x49a   :  { %v9022_v11 = vadd.f32 %v4761_v38, %v4696_v43  ;;  %5304 = vadd.xlane.f32.xlu1 %v5303_v41  ;;  %v4760_v3 = vrot.slane %v4722_v59, 1  ;;  %v4264_v38 = vmul.f32 %v7104_v52, %v4241_v55  ;;  %v5278_v59 = vmul.f32 %v8989_v16, %v8829_v56 }
 0x49b   :  { %v4731_v60 = vpop.xlane.xlu1 %4730 }
 0x49c   :  { %v4763_v63 = vrot.slane %v4731_v60, 1  ;;  %v9030_v2 = vadd.f32 %v4760_v3, %v4695_v53  ;;  %5301 = vadd.xlane.f32.xlu0 %v5300_v49  ;;  %v7105_v49 = vld [vmem:[%s9293_s5] ss:$0 sm:$0xff] }
 0x49d   :  { %v4728_v14 = vpop.xlane.xlu0 %4727 }
 0x49e   :  { %v9032_v43 = vadd.f32 %v4763_v63, %v4698_v33  ;;  %5344 = vadd.xlane.f32.xlu1 %v5343_v6  ;;  %v4762_v8 = vrot.slane %v4728_v14, 1  ;;  %v9085_v63 = vld [vmem:[%s9294_s6 + $0xe] ss:$0 sm:$0xff]  ;;  %v4287_v6 = vadd.f32 %v7105_v49, %v4264_v38 }
 0x49f   :  { %v4737_v1 = vpop.xlane.xlu1 %4736 }
 0x4a0   :  { %v4765_v26 = vrot.slane %v4737_v1, 1  ;;  %v9040_v53 = vadd.f32 %v4762_v8, %v4697_v12  ;;  %5341 = vadd.xlane.f32.xlu0 %v5340_v29  ;;  %v5333_v1 = vmul.f32 %v9012_v39, %v8829_v56  ;;  %v5416_v8 = vmul.f32 %v9085_v63, %v8575_v24 }
 0x4a1   :  { %v4734_v19 = vpop.xlane.xlu0 %4733  ;;  %v4319_v29 = vmul.f32 0.2, %v4287_v6  ;;  %vm4303_vm9 = vcmp.gt.f32.partialorder %v4287_v6, 0.0 }
 0x4a2   :  { %v9042_v33 = vadd.f32 %v4765_v26, %v4700_v20  ;;  %5359 = vadd.xlane.f32.xlu1 %v5358_v48  ;;  %v4764_v27 = vrot.slane %v4734_v19, 1  ;;  %v5349_v19 = vsel %vm4407_vm2, %v5333_v1, 0.0 }
 0x4a3   :  { %v4743_v51 = vpop.xlane.xlu1 %4742 }
 0x4a4   :  { %v4767_v36 = vrot.slane %v4743_v51, 1  ;;  %v9050_v12 = vadd.f32 %v4764_v27, %v4699_v25  ;;  %5356 = vadd.xlane.f32.xlu0 %v5355_v18  ;;  %v5361_v25 = vsel %vm4407_vm2, %v5337_v57, 0.0  ;;  %v5428_v51 = vsel %vm4493_vm3, %v5416_v8, 0.0 }
 0x4a5   :  { %v4740_v45 = vpop.xlane.xlu0 %4739  ;;  %v5415_v27 = vmul.f32 %v9085_v63, %v8545_v5 }
 0x4a6   :  { %v9053_v20 = vadd.f32 %v4767_v36, %v8991_v0  ;;  %5307 = vadd.xlane.f32.xlu1 %v5306_v37  ;;  %v4766_v62 = vrot.slane %v4740_v45, 1  ;;  %v4233_v0 = vmul.f32 %v8508_v7, %v8472_v15  ;;  %v5346_v15 = vsel %vm4407_vm2, %v5332_v9, 0.0 }
 0x4a7   :  { %v4749_v61 = vpop.xlane.xlu1 %4748  ;;  %v5309_v7 = vsel %vm4351_vm8, %v5283_v44, 0.0  ;;  %v5421_v36 = vmul.f32 %v9085_v63, %v8595_v35  ;;  %v5425_v57 = vsel %vm4493_vm3, %v5415_v27, 0.0  ;;  %v5420_v45 = vmul.f32 %v9085_v63, %v8605_v22 }
 0x4a8   :  { %v4769_v23 = vrot.slane %v4749_v61, 1  ;;  %v4786_v34 = vadd.f32 %v4766_v62, %v8999_v50  ;;  %5292 = vadd.xlane.f32.xlu0 %v5291_v28  ;;  %v5338_v50 = vmul.f32 %v9012_v39, %v8838_v13 }
 0x4a9   :  { %v4746_v31 = vpop.xlane.xlu0 %4745  ;;  %v5443_v55 = vsel %vm4493_vm3, %v5421_v36, 0.0 }
 0x4aa   :  { %v9067_v10 = vadd.f32 %v4769_v23, %v9001_v58  ;;  %5362 = vadd.xlane.f32.xlu1 %v5361_v25  ;;  %v4768_v30 = vrot.slane %v4746_v31, 1  ;;  %v4256_v58 = vmul.f32 %v7104_v52, %v4233_v0  ;;  %v5440_v25 = vsel %vm4493_vm3, %v5420_v45, 0.0 }
 0x4ab   :  { %v4810_v41 = vpop.xlane.xlu1 %4809 }
 0x4ac   :  { %v4846_v46 = vrot.slane %v4810_v41, 2  ;;  %v4788_v60 = vadd.f32 %v4768_v30, %v9014_v54  ;;  %5347 = vadd.xlane.f32.xlu0 %v5346_v15  ;;  %v5294_v54 = vsel %vm4351_vm8, %v5278_v59, 0.0  ;;  %v4279_v48 = vadd.f32 %v7105_v49, %v4256_v58 }
 0x4ad   :  { %v4807_v17 = vpop.xlane.xlu0 %4806 }
 0x4ae   :  { %v9080_v3 = vadd.f32 %v4846_v46, %v9022_v11  ;;  %5310 = vadd.xlane.f32.xlu1 %v5309_v7  ;;  %v4845_v14 = vrot.slane %v4807_v17, 2  ;;  %v5364_v11 = vsel %vm4407_vm2, %v5338_v50, 0.0  ;;  %v4311_v18 = vmul.f32 0.2, %v4279_v48 }
 0x4af   :  { %v9090_v40 = vpop.xlane.xlu1 %4815  ;;  %vm4295_vm10 = vcmp.gt.f32.partialorder %v4279_v48, 0.0  ;;  %v5422_v7 = vmul.f32 %v9085_v63, %v8706_v4 }
 0x4b0   :  { %v4865_v26 = vadd.f32 %v4845_v14, %v9030_v2  ;;  %5295 = vadd.xlane.f32.xlu0 %v5294_v54  ;;  %v9107_v2 = vsel %vm4303_vm9, %v4287_v6, %v4319_v29  ;;  %v9117_v62 = vsel %vm4295_vm10, %v4279_v48, %v4311_v18  ;;  %v5417_v14 = vmul.f32 %v9085_v63, %v8700_v42 }
 0x4b1   :  { %v4813_v21 = vpop.xlane.xlu0 %4812  ;;  %v5284_v61 = vmul.f32 %v8989_v16, %v9107_v2  ;;  %v5279_v0 = vmul.f32 %v8989_v16, %v9117_v62  ;;  %v5339_v52 = vmul.f32 %v9012_v39, %v9107_v2  ;;  %v5334_v15 = vmul.f32 %v9012_v39, %v9117_v62 }
 0x4b2   :  { %5365 = vadd.xlane.f32.xlu1 %v5364_v11  ;;  %v4847_v58 = vrot.slane %v4813_v21, 2  ;;  %v5446_v17 = vsel %vm4493_vm3, %v5422_v7, 0.0  ;;  %v5423_v39 = vmul.f32 %v9085_v63, %v8838_v13  ;;  %v5431_v21 = vsel %vm4493_vm3, %v5417_v14, 0.0 }
 0x4b3   :  { %v9099_v47 = vpop.xlane.xlu1 %4821  ;;  %v5312_v44 = vsel %vm4351_vm8, %v5284_v61, 0.0  ;;  %v5297_v46 = vsel %vm4351_vm8, %v5279_v0, 0.0  ;;  %v5367_v59 = vsel %vm4407_vm2, %v5339_v52, 0.0  ;;  %v5352_v6 = vsel %vm4407_vm2, %v5334_v15, 0.0 }
 0x4b4   :  { %5350 = vadd.xlane.f32.xlu0 %v5349_v19  ;;  %v4867_v8 = vadd.f32 %v4847_v58, %v9040_v53  ;;  %v5449_v19 = vsel %vm4493_vm3, %v5423_v39, 0.0  ;;  %v4850_v15 = vrot.slane %v9099_v47, 2  ;;  %vm5742_vm8 = vcmask 1041409  }
 0x4b5   :  { %v4819_v37 = vpop.xlane.xlu0 %4818 }
 0x4b6   :  { %5429 = vadd.xlane.f32.xlu1 %v5428_v51  ;;  %v4849_v29 = vrot.slane %v4819_v37, 2  ;;  %v5418_v51 = vmul.f32 %v9085_v63, %v8829_v56 }
 0x4b7   :  { %v9109_v32 = vpop.xlane.xlu1 %4827 }
 0x4b8   :  { %5426 = vadd.xlane.f32.xlu0 %v5425_v57  ;;  %v4869_v53 = vadd.f32 %v4849_v29, %v9050_v12  ;;  %v5434_v57 = vsel %vm4493_vm3, %v5418_v51, 0.0  ;;  %v4848_v12 = vrot.slane %v9090_v40, 2  ;;  %v4852_v14 = vrot.slane %v9109_v32, 2 }
 0x4b9   :  { %v4825_v23 = vpop.xlane.xlu0 %4824 }
 0x4ba   :  { %5444 = vadd.xlane.f32.xlu1 %v5443_v55  ;;  %v4851_v28 = vrot.slane %v4825_v23, 2  ;;  %v4868_v40 = vadd.f32 %v4848_v12, %v9032_v43  ;;  %v4872_v32 = vadd.f32 %v4852_v14, %v9053_v20 }
 0x4bb   :  { %v9119_v9 = vpop.xlane.xlu1 %4833 }
 0x4bc   :  { %v4871_v38 = vadd.f32 %v4851_v28, %v4786_v34  ;;  %5441 = vadd.xlane.f32.xlu0 %v5440_v25 }
 0x4bd   :  { %v4831_v31 = vpop.xlane.xlu0 %4830 }
 0x4be   :  { %5313 = vadd.xlane.f32.xlu1 %v5312_v44  ;;  %v4853_v30 = vrot.slane %v4831_v31, 2 }
 0x4bf   :  { %v4895_v41 = vpop.xlane.xlu1 %4894 }
 0x4c0   :  { %v9133_v16 = vadd.f32 %v4853_v30, %v4788_v60  ;;  %5298 = vadd.xlane.f32.xlu0 %v5297_v46  ;;  %v9144_v60 = vld [vmem:[%s9294_s6 + $0xf] ss:$0 sm:$0xff] }
 0x4c1   :  { %v4892_v34 = vpop.xlane.xlu0 %4891  ;;  %v5501_v27 = vmul.f32 %v9144_v60, %v8575_v24  ;;  %v5500_v45 = vmul.f32 %v9144_v60, %v8545_v5  ;;  %v5506_v61 = vmul.f32 %v9144_v60, %v8595_v35  ;;  %v4931_v24 = vrot.slane %v4895_v41, 3 }
 0x4c2   :  { %5368 = vadd.xlane.f32.xlu1 %v5367_v59  ;;  %v4930_v49 = vrot.slane %v4892_v34, 3  ;;  %v5505_v5 = vmul.f32 %v9144_v60, %v8605_v22  ;;  %v5424_v35 = vmul.f32 %v9085_v63, %v9107_v2 }
 0x4c3   :  { %v4901_v50 = vpop.xlane.xlu1 %4900  ;;  %v5513_v55 = vsel %vm4579_vm4, %v5501_v27, 0.0  ;;  %v5510_v0 = vsel %vm4579_vm4, %v5500_v45, 0.0  ;;  %v5528_v52 = vsel %vm4579_vm4, %v5506_v61, 0.0  ;;  %v4951_v41 = vadd.f32 %v4931_v24, %v9080_v3 }
 0x4c4   :  { %5353 = vadd.xlane.f32.xlu0 %v5352_v6  ;;  %v4950_v54 = vadd.f32 %v4930_v49, %v4865_v26  ;;  %v4933_v31 = vrot.slane %v4901_v50, 3  ;;  %v5525_v58 = vsel %vm4579_vm4, %v5505_v5, 0.0  ;;  %v5452_v22 = vsel %vm4493_vm3, %v5424_v35, 0.0 }
 0x4c5   :  { %v4898_v11 = vpop.xlane.xlu0 %4897  ;;  %v5419_v50 = vmul.f32 %v9085_v63, %v9117_v62  ;;  %v5507_v49 = vmul.f32 %v9144_v60, %v8706_v4  ;;  %v5502_v4 = vmul.f32 %v9144_v60, %v8700_v42  ;;  %v5509_v27 = vmul.f32 %v9144_v60, %v9107_v2 }
 0x4c6   :  { %5447 = vadd.xlane.f32.xlu1 %v5446_v17  ;;  %v4932_v48 = vrot.slane %v4898_v11, 3  ;;  %v4870_v17 = vadd.f32 %v4850_v15, %v9042_v33 }
 0x4c7   :  { %v9146_v1 = vpop.xlane.xlu1 %4906  ;;  %v5437_v63 = vsel %vm4493_vm3, %v5419_v50, 0.0  ;;  %v5516_v51 = vsel %vm4579_vm4, %v5502_v4, 0.0 }
 0x4c8   :  { %5432 = vadd.xlane.f32.xlu0 %v5431_v21  ;;  %v4952_v26 = vadd.f32 %v4932_v48, %v4867_v8  ;;  %v4935_v3 = vrot.slane %v9146_v1, 3  ;;  %v5531_v8 = vsel %vm4579_vm4, %v5507_v49, 0.0  ;;  %v5508_v1 = vmul.f32 %v9144_v60, %v8838_v13 }
 0x4c9   :  { %v4904_v36 = vpop.xlane.xlu0 %4903  ;;  %v5503_v13 = vmul.f32 %v9144_v60, %v8829_v56  ;;  %v5504_v56 = vmul.f32 %v9144_v60, %v9117_v62 }
 0x4ca   :  { %5450 = vadd.xlane.f32.xlu1 %v5449_v19  ;;  %v4934_v37 = vrot.slane %v4904_v36, 3  ;;  %v4955_v29 = vadd.f32 %v4935_v3, %v4870_v17  ;;  %v5534_v42 = vsel %vm4579_vm4, %v5508_v1, 0.0 }
 0x4cb   :  { %v9155_v18 = vpop.xlane.xlu1 %4912 }
 0x4cc   :  { %5435 = vadd.xlane.f32.xlu0 %v5434_v57  ;;  %v4954_v23 = vadd.f32 %v4934_v37, %v4869_v53  ;;  %v5519_v57 = vsel %vm4579_vm4, %v5503_v13, 0.0 }
 0x4cd   :  { %v4910_v28 = vpop.xlane.xlu0 %4909 }
 0x4ce   :  { %5514 = vadd.xlane.f32.xlu1 %v5513_v55  ;;  %v4936_v44 = vrot.slane %v4910_v28, 3  ;;  %v5537_v55 = vsel %vm4579_vm4, %v5509_v27, 0.0 }
 0x4cf   :  { %v9164_v25 = vpop.xlane.xlu1 %4918 }
 0x4d0   :  { %5511 = vadd.xlane.f32.xlu0 %v5510_v0  ;;  %v4956_v30 = vadd.f32 %v4936_v44, %v4871_v38  ;;  %v4953_v38 = vadd.f32 %v4933_v31, %v4868_v40  ;;  %v4939_v36 = vrot.slane %v9164_v25, 3  ;;  %v5522_v25 = vsel %vm4579_vm4, %v5504_v56, 0.0 }
 0x4d1   :  { %v4916_v46 = vpop.xlane.xlu0 %4915 }
 0x4d2   :  { %5529 = vadd.xlane.f32.xlu1 %v5528_v52  ;;  %v4938_v7 = vrot.slane %v4916_v46, 3 }
 0x4d3   :  { %v4980_v59 = vpop.xlane.xlu1 %4979 }
 0x4d4   :  { %v5006_v34 = vadd.f32 %v4980_v59, %v4951_v41  ;;  %5526 = vadd.xlane.f32.xlu0 %v5525_v58  ;;  %v4958_v43 = vadd.f32 %v4938_v7, %v9133_v16  ;;  %v4937_v16 = vrot.slane %v9155_v18, 3 }
 0x4d5   :  { %v4977_v47 = vpop.xlane.xlu0 %4976 }
 0x4d6   :  { %5453 = vadd.xlane.f32.xlu1 %v5452_v22  ;;  %v5005_v39 = vadd.f32 %v4977_v47, %v4950_v54  ;;  %v4854_v54 = vrot.slane %v9119_v9, 2  ;;  %v4957_v18 = vadd.f32 %v4937_v16, %v4872_v32 }
 0x4d7   :  { %v4986_v6 = vpop.xlane.xlu1 %4985 }
 0x4d8   :  { %v5008_v11 = vadd.f32 %v4986_v6, %v4953_v38  ;;  %5438 = vadd.xlane.f32.xlu0 %v5437_v63  ;;  %v4874_v9 = vadd.f32 %v4854_v54, %v9067_v10  ;;  %v6040_v6 = vld [vmem:[#allocation3] ss:$0 sm:$0xff] }
 0x4d9   :  { %v4983_v33 = vpop.xlane.xlu0 %4982 }
 0x4da   :  { %5532 = vadd.xlane.f32.xlu1 %v5531_v8  ;;  %v5007_v21 = vadd.f32 %v4983_v33, %v4952_v26  ;;  %v4959_v2 = vadd.f32 %v4939_v36, %v4874_v9 }
 0x4db   :  { %v4992_v48 = vpop.xlane.xlu1 %4991 }
 0x4dc   :  { %v5010_v19 = vadd.f32 %v4992_v48, %v4955_v29  ;;  %5517 = vadd.xlane.f32.xlu0 %v5516_v51 }
 0x4dd   :  { %v4989_v20 = vpop.xlane.xlu0 %4988 }
 0x4de   :  { %5535 = vadd.xlane.f32.xlu1 %v5534_v42  ;;  %v5009_v26 = vadd.f32 %v4989_v20, %v4954_v23 }
 0x4df   :  { %v4998_v53 = vpop.xlane.xlu1 %4997 }
 0x4e0   :  { %v5012_v37 = vadd.f32 %v4998_v53, %v4957_v18  ;;  %5520 = vadd.xlane.f32.xlu0 %v5519_v57 }
 0x4e1   :  { %v4995_v45 = vpop.xlane.xlu0 %4994 }
 0x4e2   :  { %5538 = vadd.xlane.f32.xlu1 %v5537_v55  ;;  %v5011_v24 = vadd.f32 %v4995_v45, %v4956_v30 }
 0x4e3   :  { %v5004_v61 = vpop.xlane.xlu1 %5003 }
 0x4e4   :  { %v5014_v28 = vadd.f32 %v5004_v61, %v4959_v2  ;;  %5523 = vadd.xlane.f32.xlu0 %v5522_v25 }
 0x4e5   :  { %v5001_v10 = vpop.xlane.xlu0 %5000 }
 0x4e6   :  { %v5013_v12 = vadd.f32 %v5001_v10, %v4958_v43 }
 0x4e7   :  { %v5035_v23 = vpop.xlane.xlu1 %5034 }
 0x4e8   :  { %v5071_v44 = vrot.slane %v5035_v23, 1 }
 0x4e9   :  { %v5032_v52 = vpop.xlane.xlu0 %5031 }
 0x4ea   :  { %v5091_v0 = vadd.f32 %v5071_v44, %v5006_v34  ;;  %v5070_v35 = vrot.slane %v5032_v52, 1 }
 0x4eb   :  { %v5041_v5 = vpop.xlane.xlu1 %5040 }
 0x4ec   :  { %v5073_v31 = vrot.slane %v5041_v5, 1  ;;  %v5090_v62 = vadd.f32 %v5070_v35, %v5005_v39 }
 0x4ed   :  { %v5038_v41 = vpop.xlane.xlu0 %5037 }
 0x4ee   :  { %v5093_v60 = vadd.f32 %v5073_v31, %v5008_v11  ;;  %v5072_v59 = vrot.slane %v5038_v41, 1 }
 0x4ef   :  { %v5047_v46 = vpop.xlane.xlu1 %5046 }
 0x4f0   :  { %v5075_v40 = vrot.slane %v5047_v46, 1  ;;  %v5092_v30 = vadd.f32 %v5072_v59, %v5007_v21 }
 0x4f1   :  { %v5044_v7 = vpop.xlane.xlu0 %5043 }
 0x4f2   :  { %v5095_v15 = vadd.f32 %v5075_v40, %v5010_v19  ;;  %v5074_v22 = vrot.slane %v5044_v7, 1 }
 0x4f3   :  { %v5053_v58 = vpop.xlane.xlu1 %5052 }
 0x4f4   :  { %v5077_v50 = vrot.slane %v5053_v58, 1  ;;  %v5094_v49 = vadd.f32 %v5074_v22, %v5009_v26 }
 0x4f5   :  { %v5050_v38 = vpop.xlane.xlu0 %5049 }
 0x4f6   :  { %v5097_v3 = vadd.f32 %v5077_v50, %v5012_v37  ;;  %v5076_v43 = vrot.slane %v5050_v38, 1 }
 0x4f7   :  { %v5117_v34 = vpop.xlane.xlu1 %5116 }
 0x4f8   :  { %v5155_v47 = vrot.slane %v5117_v34, 2  ;;  %v5096_v17 = vadd.f32 %v5076_v43, %v5011_v24 }
 0x4f9   :  { %v5056_v39 = vpop.xlane.xlu0 %5055 }
 0x4fa   :  { %v5175_v14 = vadd.f32 %v5155_v47, %v5090_v62  ;;  %v5078_v63 = vrot.slane %v5056_v39, 1  ;;  %5587 = vperm.xlu0 %6961, %v6040_v6  }
 0x4fb   :  { %v5132_v11 = vpop.xlane.xlu1 %5131 }
 0x4fc   :  { %v5160_v8 = vrot.slane %v5132_v11, 2  ;;  %v5098_v4 = vadd.f32 %v5078_v63, %v5013_v12 }
 0x4fd   :  { %v5120_v16 = vpop.xlane.xlu0 %5119 }
 0x4fe   :  { %v5180_v1 = vadd.f32 %v5160_v8, %v5095_v15  ;;  %v5156_v33 = vrot.slane %v5120_v16, 2 }
 0x4ff   :  { %v5059_v29 = vpop.xlane.xlu1 %5058 }
 0x500   :  { %v5079_v48 = vrot.slane %v5059_v29, 1  ;;  %v5176_v32 = vadd.f32 %v5156_v33, %v5091_v0 }
 0x501   :  { %v5135_v21 = vpop.xlane.xlu0 %5134 }
 0x502   :  { %v5099_v54 = vadd.f32 %v5079_v48, %v5014_v28  ;;  %v5161_v51 = vrot.slane %v5135_v21, 2 }
 0x503   :  { %v5138_v19 = vpop.xlane.xlu1 %5137 }
 0x504   :  { %v5162_v42 = vrot.slane %v5138_v19, 2  ;;  %v5181_v13 = vadd.f32 %v5161_v51, %v5096_v17 }
 0x505   :  { %v5123_v36 = vpop.xlane.xlu0 %5122 }
 0x506   :  { %v5182_v27 = vadd.f32 %v5162_v42, %v5097_v3  ;;  %v5157_v20 = vrot.slane %v5123_v36, 2 }
 0x507   :  { %v5141_v18 = vpop.xlane.xlu1 %5140 }
 0x508   :  { %v5163_v53 = vrot.slane %v5141_v18, 2  ;;  %v5177_v9 = vadd.f32 %v5157_v20, %v5092_v30 }
 0x509   :  { %v5126_v37 = vpop.xlane.xlu0 %5125 }
 0x50a   :  { %v5183_v26 = vadd.f32 %v5163_v53, %v5098_v4  ;;  %v5158_v55 = vrot.slane %v5126_v37, 2 }
 0x50b   :  { %v5205_v57 = vpop.xlane.xlu1 %5204 }
 0x50c   :  { %v5241_v56 = vrot.slane %v5205_v57, 3  ;;  %v5178_v2 = vadd.f32 %v5158_v55, %v5093_v60 }
 0x50d   :  { %v5202_v61 = vpop.xlane.xlu0 %5201 }
 0x50e   :  { %v9208_v45 = vadd.f32 %v5241_v56, %v5176_v32  ;;  %v5240_v28 = vrot.slane %v5202_v61, 3 }
 0x50f   :  { %v5220_v24 = vpop.xlane.xlu1 %5219 }
 0x510   :  { %v5246_v25 = vrot.slane %v5220_v24, 3  ;;  %v5260_v10 = vadd.f32 %v5240_v28, %v5175_v14 }
 0x511   :  { %v5217_v12 = vpop.xlane.xlu0 %5216 }
 0x512   :  { %v9210_v23 = vadd.f32 %v5246_v25, %v5181_v13  ;;  %v5245_v0 = vrot.slane %v5217_v12, 3 }
 0x513   :  { %v5144_v44 = vpop.xlane.xlu1 %5143 }
 0x514   :  { %v5164_v52 = vrot.slane %v5144_v44, 2  ;;  %v5265_v35 = vadd.f32 %v5245_v0, %v5180_v1 }
 0x515   :  { %v5129_v31 = vpop.xlane.xlu0 %5128 }
 0x516   :  { %v5184_v5 = vadd.f32 %v5164_v52, %v5099_v54  ;;  %v5159_v41 = vrot.slane %v5129_v31, 2 }
 0x517   :  { %v5223_v62 = vpop.xlane.xlu1 %5222 }
 0x518   :  { %v5247_v46 = vrot.slane %v5223_v62, 3  ;;  %v5179_v60 = vadd.f32 %v5159_v41, %v5094_v49 }
 0x519   :  { %v5208_v40 = vpop.xlane.xlu0 %5207 }
 0x51a   :  { %v9212_v59 = vadd.f32 %v5247_v46, %v5182_v27  ;;  %v5242_v15 = vrot.slane %v5208_v40, 3 }
 0x51b   :  { %v5226_v30 = vpop.xlane.xlu1 %5225 }
 0x51c   :  { %v5248_v7 = vrot.slane %v5226_v30, 3  ;;  %v5262_v58 = vadd.f32 %v5242_v15, %v5177_v9 }
 0x51d   :  { %v5211_v50 = vpop.xlane.xlu0 %5210 }
 0x51e   :  { %v9214_v22 = vadd.f32 %v5248_v7, %v5183_v26  ;;  %v5243_v38 = vrot.slane %v5211_v50, 3 }
 0x51f   :  { %v5229_v3 = vpop.xlane.xlu1 %5228 }
 0x520   :  { %v5249_v34 = vrot.slane %v5229_v3, 3  ;;  %v5263_v43 = vadd.f32 %v5243_v38, %v5178_v2 }
 0x521   :  { %v5214_v6 = vpop.xlane.xlu0 %5213 }
 0x522   :  { %v9216_v47 = vadd.f32 %v5249_v34, %v5184_v5  ;;  %v5244_v14 = vrot.slane %v5214_v6, 3 }
 0x523   :  { %v5290_v17 = vpop.xlane.xlu1 %5289 }
 0x524   :  { %v5264_v49 = vadd.f32 %v5244_v14, %v5179_v60  ;;  %v5316_v7 = vadd.f32 %v5290_v17, %v9208_v45 }
 0x525   :  { %v5287_v39 = vpop.xlane.xlu0 %5286 }
 0x526   :  { %v5315_v63 = vadd.f32 %v5287_v39, %v5260_v10 }
 0x527   :  { %v5305_v11 = vpop.xlane.xlu1 %5304 }
 0x528   :  { %v5321_v14 = vadd.f32 %v5305_v11, %v9210_v23 }
 0x529   :  { %v5302_v8 = vpop.xlane.xlu0 %5301 }
 0x52a   :  { %v5320_v1 = vadd.f32 %v5302_v8, %v5265_v35 }
 0x52b   :  { %v5345_v4 = vpop.xlane.xlu1 %5344 }
 0x52c   :  { %v5381_v30 = vrot.slane %v5345_v4, 1 }
 0x52d   :  { %v5342_v16 = vpop.xlane.xlu0 %5341 }
 0x52e   :  { %v5380_v33 = vrot.slane %v5342_v16, 1  ;;  %v5401_v39 = vadd.f32 %v5381_v30, %v5316_v7 }
 0x52f   :  { %v5360_v29 = vpop.xlane.xlu1 %5359 }
 0x530   :  { %v5400_v48 = vadd.f32 %v5380_v33, %v5315_v63  ;;  %v5386_v38 = vrot.slane %v5360_v29, 1 }
 0x531   :  { %v5357_v32 = vpop.xlane.xlu0 %5356 }
 0x532   :  { %v5385_v21 = vrot.slane %v5357_v32, 1  ;;  %v5406_v17 = vadd.f32 %v5386_v38, %v5321_v14 }
 0x533   :  { %v9218_v54 = vpop.xlane.xlu1 %5307 }
 0x534   :  { %v5405_v19 = vadd.f32 %v5385_v21, %v5320_v1 }
 0x535   :  { %v5293_v51 = vpop.xlane.xlu0 %5292 }
 0x536   :  { %v5317_v13 = vadd.f32 %v5293_v51, %v5262_v58 }
 0x537   :  { %v9220_v42 = vpop.xlane.xlu1 %5362 }
 0x539   :  { %v5348_v27 = vpop.xlane.xlu0 %5347 }
 0x53a   :  { %v5382_v18 = vrot.slane %v5348_v27, 1 }
 0x53b   :  { %v9222_v36 = vpop.xlane.xlu1 %5310 }
 0x53c   :  { %v9224_v20 = vadd.f32 %v5382_v18, %v5317_v13 }
 0x53d   :  { %v5296_v53 = vpop.xlane.xlu0 %5295 }
 0x53e   :  { %v5318_v9 = vadd.f32 %v5296_v53, %v5263_v43 }
 0x53f   :  { %v9226_v26 = vpop.xlane.xlu1 %5365 }
 0x541   :  { %v5351_v37 = vpop.xlane.xlu0 %5350 }
 0x542   :  { %v5383_v57 = vrot.slane %v5351_v37, 1  ;;  %v5387_v37 = vrot.slane %v9220_v42, 1 }
 0x543   :  { %v5430_v56 = vpop.xlane.xlu1 %5429 }
 0x544   :  { %v9228_v55 = vadd.f32 %v5383_v57, %v5318_v9  ;;  %v5466_v58 = vrot.slane %v5430_v56, 2 }
 0x545   :  { %v5427_v2 = vpop.xlane.xlu0 %5426 }
 0x546   :  { %v5465_v50 = vrot.slane %v5427_v2, 2  ;;  %v5486_v21 = vadd.f32 %v5466_v58, %v5401_v39 }
 0x547   :  { %v5445_v24 = vpop.xlane.xlu1 %5444 }
 0x548   :  { %v5471_v1 = vrot.slane %v5445_v24, 2  ;;  %v5485_v45 = vadd.f32 %v5465_v50, %v5400_v48 }
 0x549   :  { %v5442_v61 = vpop.xlane.xlu0 %5441 }
 0x54a   :  { %v5470_v34 = vrot.slane %v5442_v61, 2  ;;  %v5491_v18 = vadd.f32 %v5471_v1, %v5406_v17 }
 0x54b   :  { %v9230_v25 = vpop.xlane.xlu1 %5313 }
 0x54c   :  { %v5490_v51 = vadd.f32 %v5470_v34, %v5405_v19  ;;  %v5388_v34 = vrot.slane %v9226_v26, 1 }
 0x54d   :  { %v5299_v28 = vpop.xlane.xlu0 %5298 }
 0x54e   :  { %v5319_v43 = vadd.f32 %v5299_v28, %v5264_v49  ;;  %v5322_v28 = vadd.f32 %v9218_v54, %v9212_v59 }
 0x54f   :  { %v9232_v44 = vpop.xlane.xlu1 %5368 }
 0x550   :  { %v5389_v1 = vrot.slane %v9232_v44, 1 }
 0x551   :  { %v5354_v10 = vpop.xlane.xlu0 %5353 }
 0x552   :  { %v5384_v15 = vrot.slane %v5354_v10, 1 }
 0x553   :  { %v9236_v52 = vpop.xlane.xlu1 %5447 }
 0x554   :  { %v5404_v16 = vadd.f32 %v5384_v15, %v5319_v43  ;;  %v5472_v10 = vrot.slane %v9236_v52, 2 }
 0x555   :  { %v5433_v12 = vpop.xlane.xlu0 %5432 }
 0x556   :  { %v5467_v53 = vrot.slane %v5433_v12, 2 }
 0x557   :  { %v9238_v31 = vpop.xlane.xlu1 %5450 }
 0x558   :  { %v5487_v42 = vadd.f32 %v5467_v53, %v9224_v20  ;;  %v5473_v14 = vrot.slane %v9238_v31, 2 }
 0x559   :  { %v9234_v0 = vpop.xlane.xlu0 %5435 }
 0x55a   :  { %v5468_v50 = vrot.slane %v9234_v0, 2 }
 0x55b   :  { %v5515_v41 = vpop.xlane.xlu1 %5514 }
 0x55c   :  { %v5551_v63 = vrot.slane %v5515_v41, 3  ;;  %v5407_v41 = vadd.f32 %v5387_v37, %v5322_v28  ;;  %v5488_v39 = vadd.f32 %v5468_v50, %v9228_v55 }
 0x55d   :  { %v5512_v5 = vpop.xlane.xlu0 %5511 }
 0x55e   :  { %v5550_v8 = vrot.slane %v5512_v5, 3  ;;  %v5571_v27 = vadd.f32 %v5551_v63, %v5486_v21  ;;  %v5492_v58 = vadd.f32 %v5472_v10, %v5407_v41 }
 0x55f   :  { %v5530_v40 = vpop.xlane.xlu1 %5529 }
 0x560   :  { %v5556_v13 = vrot.slane %v5530_v40, 3  ;;  %v5570_v49 = vadd.f32 %v5550_v8, %v5485_v45 }
 0x561   :  { %v5527_v35 = vpop.xlane.xlu0 %5526 }
 0x562   :  { %v5555_v33 = vrot.slane %v5527_v35, 3  ;;  %v5576_v2 = vadd.f32 %v5556_v13, %v5491_v18 }
 0x563   :  { %v9244_v32 = vpop.xlane.xlu1 %5453 }
 0x564   :  { %v5575_v23 = vadd.f32 %v5555_v33, %v5490_v51 }
 0x565   :  { %v5439_v62 = vpop.xlane.xlu0 %5438 }
 0x566   :  { %v5469_v6 = vrot.slane %v5439_v62, 2 }
 0x567   :  { %v5533_v48 = vpop.xlane.xlu1 %5532 }
 0x568   :  { %v5489_v29 = vadd.f32 %v5469_v6, %v5404_v16  ;;  %v5557_v40 = vrot.slane %v5533_v48, 3  ;;  %v5323_v6 = vadd.f32 %v9222_v36, %v9214_v22  ;;  %v5474_v22 = vrot.slane %v9244_v32, 2 }
 0x569   :  { %v5518_v46 = vpop.xlane.xlu0 %5517 }
 0x56a   :  { %v5552_v61 = vrot.slane %v5518_v46, 3  ;;  %v5408_v16 = vadd.f32 %v5388_v34, %v5323_v6  ;;  %v5700_v6 = vlaneseq }
 0x56b   :  { %v5536_v38 = vpop.xlane.xlu1 %5535 }
 0x56c   :  { %v5572_v46 = vadd.f32 %v5552_v61, %v5487_v42  ;;  %v5558_v33 = vrot.slane %v5536_v38, 3 }
 0x56d   :  { %v9240_v60 = vpop.xlane.xlu0 %5520 }
 0x56e   :  { %v5553_v43 = vrot.slane %v9240_v60, 3  ;;  %v5324_v60 = vadd.f32 %v9230_v25, %v9216_v47 }
 0x56f   :  { %v5539_v36 = vpop.xlane.xlu1 %5538 }
 0x570   :  { %v5573_v26 = vadd.f32 %v5553_v43, %v5488_v39  ;;  %v5409_v45 = vadd.f32 %v5389_v1, %v5324_v60  ;;  %v5559_v44 = vrot.slane %v5539_v36, 3  ;;  %v5703_v39 = vshrl.u32 %v5700_v6, 7 }
 0x571   :  { %v5524_v3 = vpop.xlane.xlu0 %5523 }
 0x572   :  { %v5554_v4 = vrot.slane %v5524_v3, 3  ;;  %v5577_v3 = vadd.f32 %v5557_v40, %v5492_v58 }
 0x574   :  { %v5574_v11 = vadd.f32 %v5554_v4, %v5489_v29  ;;  %v5493_v4 = vadd.f32 %v5473_v14, %v5408_v16  ;;  %v5494_v29 = vadd.f32 %v5474_v22, %v5409_v45 }
 0x576   :  { %v5578_v51 = vadd.f32 %v5558_v33, %v5493_v4  ;;  %v5579_v53 = vadd.f32 %v5559_v44, %v5494_v29 }
 0x579   :  { %v9246_v9 = vpop.permute.xlu0 %5587 }
 0x57a   :  { %v5590_v57 = vadd.f32 %v9246_v9, %v5570_v49  ;;  %v5591_v56 = vadd.f32 %v9246_v9, %v5571_v27  ;;  %v5594_v19 = vadd.f32 %v9246_v9, %v5574_v11  ;;  %v5595_v24 = vadd.f32 %v9246_v9, %v5575_v23 }
 0x57b   :  { %v5596_v35 = vadd.f32 %v9246_v9, %v5576_v2  ;;  %v5592_v59 = vadd.f32 %v9246_v9, %v5572_v46  ;;  %v5597_v0 = vadd.f32 %v9246_v9, %v5577_v3  ;;  %v5593_v21 = vadd.f32 %v9246_v9, %v5573_v26 }
 0x57c   :  { %v5600_v12 = vsub.f32 0.0, %v5590_v57  ;;  %v5601_v5 = vsub.f32 0.0, %v5591_v56  ;;  %v5604_v62 = vsub.f32 0.0, %v5594_v19  ;;  %v5605_v30 = vsub.f32 0.0, %v5595_v24 }
 0x57d   :  { %v5606_v54 = vsub.f32 0.0, %v5596_v35  ;;  %v5602_v63 = vsub.f32 0.0, %v5592_v59  ;;  %v5607_v31 = vsub.f32 0.0, %v5597_v0  ;;  %v5598_v18 = vadd.f32 %v9246_v9, %v5578_v51 }
 0x57e   :  { %v5610_v15 = vmul.f32 1.442695, %v5600_v12  ;;  %v5612_v7 = vmul.f32 1.442695, %v5601_v5  ;;  %v5618_v52 = vmul.f32 1.442695, %v5604_v62  ;;  %v5599_v37 = vadd.f32 %v9246_v9, %v5579_v53 }
 0x57f   :  { %v5620_v20 = vmul.f32 1.442695, %v5605_v30  ;;  %v5622_v8 = vmul.f32 1.442695, %v5606_v54  ;;  %v5614_v55 = vmul.f32 1.442695, %v5602_v63 }
 0x580   :  { %7063 = vpow2.f32 %v5610_v15  ;;  %v5624_v27 = vmul.f32 1.442695, %v5607_v31  ;;  %v5603_v47 = vsub.f32 0.0, %v5593_v21  ;;  %v5608_v57 = vsub.f32 0.0, %v5598_v18 }
 0x581   :  { %7065 = vpow2.f32 %v5612_v7  ;;  %v5609_v61 = vsub.f32 0.0, %v5599_v37  ;;  %v5701_v0 = vand.u32 127, %v5700_v6 }
 0x582   :  { %7067 = vpow2.f32 %v5618_v52  ;;  %v5616_v56 = vmul.f32 1.442695, %v5603_v47  ;;  %v5626_v19 = vmul.f32 1.442695, %v5608_v57 }
 0x583   :  { %7069 = vpow2.f32 %v5620_v20  ;;  %v5628_v12 = vmul.f32 1.442695, %v5609_v61 }
 0x584   :  { %7071 = vpow2.f32 %v5622_v8  ;;  %v5704_v8 = vsub.s32 %v5701_v0, %v5703_v39 }
 0x585   :  { %7073 = vpow2.f32 %v5614_v55 }
 0x58a   :  { %v7064_v17 = vpop.eup %7063 }
 0x58b   :  { %v7066_v13 = vpop.eup %7065  ;;  %v5630_v49 = vadd.f32 1.0, %v7064_v17 }
 0x58c   :  { %v5631_v25 = vadd.f32 1.0, %v7066_v13  ;;  %v7068_v32 = vpop.eup %7067 }
 0x58d   :  { %7075 = vrcp.f32 %v5630_v49  ;;  %v7070_v23 = vpop.eup %7069  ;;  %v5634_v11 = vadd.f32 1.0, %v7068_v32 }
 0x58e   :  { %7077 = vpow2.f32 %v5624_v27  ;;  %v5635_v2 = vadd.f32 1.0, %v7070_v23  ;;  %v7072_v48 = vpop.eup %7071 }
 0x58f   :  { %7079 = vrcp.f32 %v5631_v25  ;;  %v5636_v24 = vadd.f32 1.0, %v7072_v48  ;;  %v7074_v28 = vpop.eup %7073 }
 0x590   :  { %7081 = vrcp.f32 %v5634_v11  ;;  %v5632_v42 = vadd.f32 1.0, %v7074_v28 }
 0x591   :  { %7083 = vpow2.f32 %v5616_v56 }
 0x592   :  { %7085 = vrcp.f32 %v5635_v2 }
 0x593   :  { %7087 = vpow2.f32 %v5626_v19 }
 0x594   :  { %7089 = vrcp.f32 %v5636_v24 }
 0x595   :  { %7091 = vpow2.f32 %v5628_v12 }
 0x596   :  { %7093 = vrcp.f32 %v5632_v42 }
 0x597   :  { %v7076_v10 = vpop.eup %7075 }
 0x598   :  { %5671 = vperm.xlu1 %6962, %v7076_v10   ;;  %v7078_v5 = vpop.eup %7077 }
 0x599   :  { %v7080_v9 = vpop.eup %7079  ;;  %v5637_v62 = vadd.f32 1.0, %v7078_v5 }
 0x59a   :  { %v7082_v35 = vpop.eup %7081 }
 0x59b   :  { %5683 = vperm.xlu0 %6961, %v7082_v35   ;;  %v7084_v41 = vpop.eup %7083  ;;  %7095 = vrcp.f32 %v5637_v62 }
 0x59c   :  { %5674 = vperm.xlu1 %6962, %v7080_v9   ;;  %v7086_v40 = vpop.eup %7085  ;;  %v5633_v30 = vadd.f32 1.0, %v7084_v41 }
 0x59d   :  { %v7088_v46 = vpop.eup %7087 }
 0x59e   :  { %v7090_v15 = vpop.eup %7089  ;;  %v5638_v7 = vadd.f32 1.0, %v7088_v46  ;;  %7097 = vrcp.f32 %v5633_v30 }
 0x59f   :  { %v7092_v58 = vpop.eup %7091 }
 0x5a0   :  { %5686 = vperm.xlu1 %6962, %v7086_v40   ;;  %v7094_v50 = vpop.eup %7093  ;;  %v5639_v59 = vadd.f32 1.0, %v7092_v58  ;;  %7099 = vrcp.f32 %v5638_v7 }
 0x5a2   :  { %7101 = vrcp.f32 %v5639_v59 }
 0x5a4   :  { %5689 = vperm.xlu1 %6962, %v7090_v15  }
 0x5a5   :  { %v7096_v54 = vpop.eup %7095 }
 0x5a8   :  { %5677 = vperm.xlu1 %6962, %v7094_v50   ;;  %v7098_v52 = vpop.eup %7097 }
 0x5aa   :  { %v7100_v3 = vpop.eup %7099 }
 0x5ac   :  { %5692 = vperm.xlu1 %6962, %v7096_v54   ;;  %v7102_v38 = vpop.eup %7101 }
 0x5b0   :  { %5680 = vperm.xlu1 %6962, %v7098_v52  }
 0x5b4   :  { %5695 = vperm.xlu1 %6962, %v7100_v3  }
 0x5b8   :  { %5698 = vperm.xlu1 %6962, %v7102_v38  }
 0x617   :  { %v5672_v20 = vpop.permute.xlu1 %5671 }
 0x618   :  { %v5705_v60 = vrot.slane %v5672_v20, %v5704_v8 }
 0x61a   :  { %v5684_v26 = vpop.permute.xlu0 %5683 }
 0x61b   :  { %v5675_v34 = vpop.permute.xlu1 %5674  ;;  %v5721_v4 = vrot.slane %v5684_v26, %v5704_v8 }
 0x61c   :  { %v5709_v16 = vrot.slane %v5675_v34, %v5704_v8 }
 0x61e   :  { %v5743_v36 = vsel %vm5742_vm8, %v5709_v16, %v5705_v60 }
 0x61f   :  { %v5687_v43 = vpop.permute.xlu1 %5686 }
 0x620   :  { %v5725_v13 = vrot.slane %v5687_v43, %v5704_v8 }
 0x623   :  { %v5690_v14 = vpop.permute.xlu1 %5689 }
 0x624   :  { %v5729_v45 = vrot.slane %v5690_v14, %v5704_v8 }
 0x626   :  { %v5750_v27 = vsel %vm5742_vm8, %v5729_v45, %v5725_v13 }
 0x627   :  { %v5678_v63 = vpop.permute.xlu1 %5677 }
 0x628   :  { %v5713_v33 = vrot.slane %v5678_v63, %v5704_v8 }
 0x62a   :  { %v5745_v21 = vsel %vm5744_vm11, %v5713_v33, %v5743_v36 }
 0x62b   :  { %v5693_v1 = vpop.permute.xlu1 %5692 }
 0x62c   :  { %v5733_v44 = vrot.slane %v5693_v1, %v5704_v8 }
 0x62e   :  { %v5751_v18 = vsel %vm5744_vm11, %v5733_v44, %v5750_v27 }
 0x62f   :  { %v5681_v22 = vpop.permute.xlu1 %5680 }
 0x630   :  { %v5717_v31 = vrot.slane %v5681_v22, %v5704_v8 }
 0x632   :  { %v5747_v55 = vsel %vm5746_vm12, %v5717_v31, %v5745_v21 }
 0x633   :  { %v5749_v17 = vsel %vm5748_vm13, %v5721_v4, %v5747_v55  ;;  %v5696_v51 = vpop.permute.xlu1 %5695 }
 0x634   :  { %5757 = vst.msk [vmem:[%s9296_s8] sm:$0x1f] %vm5756_vm14, %v5749_v17  ;;  %v5737_v29 = vrot.slane %v5696_v51, %v5704_v8 }
 0x636   :  { %v5752_v25 = vsel %vm5746_vm12, %v5737_v29, %v5751_v18 }
 0x637   :  { %v5699_v49 = vpop.permute.xlu1 %5698 }
 0x638   :  { %v5741_v47 = vrot.slane %v5699_v49, %v5704_v8 }
 0x63a   :  { %v5753_v32 = vsel %vm5748_vm13, %v5741_v47, %v5752_v25 }
 0x63b   :  { %5758 = vst.msk [vmem:[%s9296_s8 + $0x8] sm:$0x1f] %vm5756_vm14, %v5753_v32 }

</bundles_post_ra>
